<compile_context>
chip_gen: v7x
topology: tpu7x:2x2x1
jax: 0.10.0
libtpu: 0.0.40
codegen_flags: <defaults>
</compile_context>

<pallas_src>
import functools
import numpy as np
import jax
import jax.numpy as jnp
from jax.experimental import pallas as pl
from jax.experimental.pallas import tpu as pltpu


# ------------------------------- helpers ------------------------------------

try:
    # Cap scoped VMEM: 48 MiB is safe on v5e/v6e (128 MiB physical) and leaves
    # headroom on v7x (64 MiB physical).
    _VMEM_LIMIT = min(48 * 1024 * 1024,
                      (int(pltpu.get_tpu_info().vmem_capacity_bytes) * 3) // 4)
except Exception:
    _VMEM_LIMIT = 32 * 1024 * 1024


def _round_up(n, m):
    return ((n + m - 1) // m) * m


def _pick_tile(dim, candidates):
    """Largest candidate tile that evenly divides `dim`, else the full dim."""
    for c in candidates:
        if dim % c == 0:
            return c
    return dim


def _pad_rows_to(m):
    """Row-padding target so row blocks satisfy the (8,128) rule and never
    degenerate into a single huge full-array block at large M."""
    if m <= 8:
        return m
    if m < 256:
        return _round_up(m, 8)
    return _round_up(m, 256)


def _maybe_pad_rows(x, mp):
    m = x.shape[0]
    if m == mp:
        return x
    return jnp.pad(x, ((0, mp - m), (0, 0)))


def _gelu(y):
    # TODO(synk): PyTorch nn.GELU defaults to exact erf; tanh approximation is
    # used here (numerically very close, lowers cleanly to the TPU EUP).
    c = 0.7978845608028654  # sqrt(2/pi)
    return 0.5 * y * (1.0 + jnp.tanh(c * (y + 0.044715 * y * y * y)))


# --------------------------- tiled linear kernel -----------------------------

def _linear_kernel(*refs, activation, nk, has_residual):
    if has_residual:
        x_ref, w_ref, b_ref, r_ref, o_ref, acc_ref = refs
    else:
        x_ref, w_ref, b_ref, o_ref, acc_ref = refs
        r_ref = None

    @pl.when(pl.program_id(2) == 0)
    def _():
        acc_ref[...] = jnp.zeros_like(acc_ref)

    acc_ref[...] += jnp.dot(x_ref[...].astype(jnp.bfloat16),
                            w_ref[...].astype(jnp.bfloat16),
                            preferred_element_type=jnp.float32)

    @pl.when(pl.program_id(2) == nk - 1)
    def _():
        y = acc_ref[...] + b_ref[...]
        if activation == "gelu":
            y = _gelu(y)
        if has_residual:
            y = y + r_ref[...].astype(jnp.float32)
        o_ref[...] = y.astype(o_ref.dtype)


def linear(x, w, b, *, activation=None, residual=None, out_dtype=jnp.float32):
    """(M,K) @ (K,N) + b, optional fused GELU and residual add. Tiled/pipelined."""
    M, K = x.shape
    N = w.shape[1]
    has_res = residual is not None

    Mp = _pad_rows_to(M)
    xp = _maybe_pad_rows(x, Mp)
    rp = _maybe_pad_rows(residual, Mp) if has_res else None

    tm = _pick_tile(Mp, (256, 128))
    tn = _pick_tile(N, (512, 256, 128))
    tk = _pick_tile(K, (512, 256, 128))
    grid = (Mp // tm, N // tn, K // tk)

    in_specs = [pl.BlockSpec((tm, tk), lambda i, j, k: (i, k)),
                pl.BlockSpec((tk, tn), lambda i, j, k: (k, j)),
                pl.BlockSpec((1, tn), lambda i, j, k: (0, j))]
    args = [xp, w, b.reshape(1, N)]
    if has_res:
        in_specs.append(pl.BlockSpec((tm, tn), lambda i, j, k: (i, j)))
        args.append(rp)

    cost = pl.CostEstimate(
        flops=2 * Mp * N * K,
        transcendentals=(Mp * N if activation == "gelu" else 0),
        bytes_accessed=int(Mp * K * xp.dtype.itemsize + K * N * w.dtype.itemsize
                           + Mp * N * jnp.dtype(out_dtype).itemsize + 4 * N
                           + (Mp * N * 4 if has_res else 0)))

    out = pl.pallas_call(
        functools.partial(_linear_kernel, activation=activation,
                          nk=grid[2], has_residual=has_res),
        out_shape=jax.ShapeDtypeStruct((Mp, N), out_dtype),
        grid=grid,
        in_specs=in_specs,
        out_specs=pl.BlockSpec((tm, tn), lambda i, j, k: (i, j)),
        scratch_shapes=[pltpu.VMEM((tm, tn), jnp.float32)],
        compiler_params=pltpu.CompilerParams(
            dimension_semantics=("parallel", "parallel", "arbitrary"),
            vmem_limit_bytes=_VMEM_LIMIT),
        cost_estimate=cost,
    )(*args)
    return out if Mp == M else out[:M]


# ------------------------ fused LayerNorm + linear ---------------------------

def _ln_linear_kernel(x_ref, g_ref, bta_ref, w_ref, b_ref, o_ref, h_ref, *,
                      activation):
    # LayerNorm of the (tm, K) row block is computed once (at j == 0) and
    # cached in a bf16 VMEM scratch, then reused for every output column tile.
    @pl.when(pl.program_id(1) == 0)
    def _():
        x = x_ref[...].astype(jnp.float32)
        mu = jnp.mean(x, axis=-1, keepdims=True)
        xc = x - mu
        var = jnp.mean(xc * xc, axis=-1, keepdims=True)
        inv = jax.lax.rsqrt(var + 1e-5)
        h_ref[...] = (xc * inv * g_ref[...] + bta_ref[...]).astype(jnp.bfloat16)

    y = jnp.dot(h_ref[...], w_ref[...].astype(jnp.bfloat16),
                preferred_element_type=jnp.float32) + b_ref[...]
    if activation == "gelu":
        y = _gelu(y)
    o_ref[...] = y.astype(o_ref.dtype)


def ln_linear(x, g, beta, w, b, *, activation=None, out_dtype=jnp.float32):
    """LayerNorm(x) @ w + b with LN fused into the matmul prologue (K whole)."""
    M, K = x.shape
    N = w.shape[1]
    Mp = _pad_rows_to(M)
    xp = _maybe_pad_rows(x, Mp)

    tm = _pick_tile(Mp, (256, 128))
    tn = _pick_tile(N, (512, 256, 128))
    grid = (Mp // tm, N // tn)

    cost = pl.CostEstimate(
        flops=2 * Mp * N * K + 8 * Mp * K,
        transcendentals=(Mp * N if activation == "gelu" else 0) + Mp,
        bytes_accessed=int(Mp * K * 4 + K * N * w.dtype.itemsize
                           + Mp * N * jnp.dtype(out_dtype).itemsize + 8 * K + 4 * N))

    out = pl.pallas_call(
        functools.partial(_ln_linear_kernel, activation=activation),
        out_shape=jax.ShapeDtypeStruct((Mp, N), out_dtype),
        grid=grid,
        in_specs=[pl.BlockSpec((tm, K), lambda i, j: (i, 0)),
                  pl.BlockSpec((1, K), lambda i, j: (0, 0)),
                  pl.BlockSpec((1, K), lambda i, j: (0, 0)),
                  pl.BlockSpec((K, tn), lambda i, j: (0, j)),
                  pl.BlockSpec((1, tn), lambda i, j: (0, j))],
        out_specs=pl.BlockSpec((tm, tn), lambda i, j: (i, j)),
        scratch_shapes=[pltpu.VMEM((tm, K), jnp.bfloat16)],
        compiler_params=pltpu.CompilerParams(
            # j ("arbitrary") carries the cached-LN scratch dependency.
            dimension_semantics=("parallel", "arbitrary"),
            vmem_limit_bytes=_VMEM_LIMIT),
        cost_estimate=cost,
    )(xp, g.reshape(1, K), beta.reshape(1, K), w, b.reshape(1, N))
    return out if Mp == M else out[:M]


# ---------------------------- plain LayerNorm --------------------------------

def _layernorm_kernel(x_ref, g_ref, b_ref, o_ref):
    x = x_ref[...]
    mu = jnp.mean(x, axis=-1, keepdims=True)
    xc = x - mu
    var = jnp.mean(xc * xc, axis=-1, keepdims=True)
    inv = jax.lax.rsqrt(var + 1e-5)
    o_ref[...] = xc * inv * g_ref[...] + b_ref[...]


def layernorm(x, g, b):
    M, D = x.shape
    Mp = _pad_rows_to(M)
    xp = _maybe_pad_rows(x, Mp)
    tm = _pick_tile(Mp, (512, 256, 128))
    out = pl.pallas_call(
        _layernorm_kernel,
        out_shape=jax.ShapeDtypeStruct((Mp, D), jnp.float32),
        grid=(Mp // tm,),
        in_specs=[pl.BlockSpec((tm, D), lambda i: (i, 0)),
                  pl.BlockSpec((1, D), lambda i: (0, 0)),
                  pl.BlockSpec((1, D), lambda i: (0, 0))],
        out_specs=pl.BlockSpec((tm, D), lambda i: (i, 0)),
        compiler_params=pltpu.CompilerParams(
            dimension_semantics=("parallel",),
            vmem_limit_bytes=_VMEM_LIMIT),
    )(xp, g.reshape(1, D), b.reshape(1, D))
    return out if Mp == M else out[:M]


# ------------------------------- attention -----------------------------------

def _attention_kernel(qkv_ref, o_ref, *, num_heads, d_model):
    # One grid step = one batch element; all heads handled here and the output
    # is written as a single lane-dense (S, D) block in (B*S, D) layout.
    dh = d_model // num_heads
    scale = 1.0 / float(np.sqrt(dh))
    qkv = qkv_ref[...]                               # (S, 3*D) bf16
    outs = []
    for h in range(num_heads):
        q = qkv[:, h * dh:(h + 1) * dh]
        k = qkv[:, d_model + h * dh:d_model + (h + 1) * dh]
        v = qkv[:, 2 * d_model + h * dh:2 * d_model + (h + 1) * dh]
        s = jax.lax.dot_general(q, k, (((1,), (1,)), ((), ())),
                                preferred_element_type=jnp.float32) * scale
        s = s - jnp.max(s, axis=-1, keepdims=True)
        e = jnp.exp(s)
        p = e * pl.reciprocal(jnp.sum(e, axis=-1, keepdims=True), approx=True)
        outs.append(jnp.dot(p.astype(jnp.bfloat16), v,
                            preferred_element_type=jnp.float32))
    o_ref[...] = jnp.concatenate(outs, axis=-1).astype(o_ref.dtype)


def attention(qkv_flat, B, S, D, num_heads):
    """Scaled dot-product attention fed directly from the fused (B*S, 3D) QKV
    buffer (no XLA transpose round-trips)."""
    # TODO(synk): for long sequences, stream K/V blocks flash-style with
    # running max/denominator instead of holding full (S, S) scores.
    qkv3 = qkv_flat.reshape(B, S, 3 * D)             # free, layout-preserving
    out = pl.pallas_call(
        functools.partial(_attention_kernel, num_heads=num_heads, d_model=D),
        out_shape=jax.ShapeDtypeStruct((B, S, D), jnp.bfloat16),
        grid=(B,),
        in_specs=[pl.BlockSpec((None, S, 3 * D), lambda b: (b, 0, 0))],
        out_specs=pl.BlockSpec((None, S, D), lambda b: (b, 0, 0)),
        compiler_params=pltpu.CompilerParams(
            dimension_semantics=("parallel",),
            vmem_limit_bytes=_VMEM_LIMIT),
    )(qkv3)
    return out.reshape(B * S, D)


# -------------------------------- CLIP head ----------------------------------

def _l2norm_kernel(x_ref, o_ref):
    x = x_ref[...]
    # x / ||x|| with no eps (matches torch .norm exactly), rsqrt-multiply form.
    o_ref[...] = x * jax.lax.rsqrt(jnp.sum(x * x, axis=-1, keepdims=True))


def l2_normalize(x):
    M, D = x.shape
    Mp = _pad_rows_to(M)
    xp = _maybe_pad_rows(x, Mp)
    tm = _pick_tile(Mp, (512, 256, 128))
    out = pl.pallas_call(
        _l2norm_kernel,
        out_shape=jax.ShapeDtypeStruct((Mp, D), jnp.float32),
        grid=(Mp // tm,),
        in_specs=[pl.BlockSpec((tm, D), lambda i: (i, 0))],
        out_specs=pl.BlockSpec((tm, D), lambda i: (i, 0)),
        compiler_params=pltpu.CompilerParams(
            dimension_semantics=("parallel",),
            vmem_limit_bytes=_VMEM_LIMIT),
    )(xp)
    return out if Mp == M else out[:M]


def _logits_kernel(ni_ref, nt_ref, s_ref, o_ref):
    scale = jnp.exp(s_ref[0, 0])
    o_ref[...] = scale * jax.lax.dot_general(
        ni_ref[...], nt_ref[...], (((1,), (1,)), ((), ())),
        preferred_element_type=jnp.float32)


def clip_logits(img_n, txt_n, log_scale):
    """scale * img_n @ txt_n.T, tiled over (image-batch, text-batch)."""
    Bi, D = img_n.shape
    Bt = txt_n.shape[0]
    Bip, Btp = _pad_rows_to(Bi), _pad_rows_to(Bt)
    ip = _maybe_pad_rows(img_n, Bip)
    tp = _maybe_pad_rows(txt_n, Btp)
    tb = _pick_tile(Bip, (256, 128))
    tbt = _pick_tile(Btp, (256, 128))
    out = pl.pallas_call(
        _logits_kernel,
        out_shape=jax.ShapeDtypeStruct((Bip, Btp), jnp.float32),
        grid=(Bip // tb, Btp // tbt),
        in_specs=[pl.BlockSpec((tb, D), lambda i, j: (i, 0)),
                  pl.BlockSpec((tbt, D), lambda i, j: (j, 0)),
                  pl.BlockSpec((1, 1), lambda i, j: (0, 0))],
        out_specs=pl.BlockSpec((tb, tbt), lambda i, j: (i, j)),
        compiler_params=pltpu.CompilerParams(
            dimension_semantics=("parallel", "parallel"),
            vmem_limit_bytes=_VMEM_LIMIT),
    )(ip, tp, log_scale.reshape(1, 1))
    return out[:Bi, :Bt]


# ---------------------------- model composition ------------------------------

def mha(x_flat, p, num_heads, B, S):
    D = x_flat.shape[1]
    # LN1 fused with a single QKV projection; bf16 output feeds attention.
    qkv = ln_linear(x_flat, p["ln1_g"], p["ln1_b"], p["w_qkv"], p["b_qkv"],
                    out_dtype=jnp.bfloat16)                  # (B*S, 3D)
    o = attention(qkv, B, S, D, num_heads)                   # (B*S, D) bf16
    # output projection with the residual add fused into the matmul epilogue
    return linear(o, p["wo"], p["bo"], residual=x_flat)      # f32 residual stream


def transformer_block(x_flat, p, num_heads, B, S):
    x_flat = mha(x_flat, p, num_heads, B, S)
    h = ln_linear(x_flat, p["ln2_g"], p["ln2_b"], p["w1"], p["b1"],
                  activation="gelu", out_dtype=jnp.bfloat16)
    return linear(h, p["w2"], p["b2"], residual=x_flat)


def vision_encoder(params, image):
    # image: NCHW, matching PyTorch conv2d(patch_size, stride=patch_size)
    B, C, H, W = image.shape
    ps = params["patch_size"]
    D = params["align_dim"]
    nh, nw = H // ps, W // ps
    patches = (image.reshape(B, C, nh, ps, nw, ps)
                    .transpose(0, 2, 4, 1, 3, 5)
                    .reshape(B * nh * nw, C * ps * ps))
    x = linear(patches, params["patch_w"], params["patch_b"]).reshape(B, nh * nw, D)
    cls = jnp.broadcast_to(params["cls_token"], (B, 1, D))
    x = jnp.concatenate([cls, x], axis=1) + params["pos_embed"]
    S = nh * nw + 1
    xf = x.reshape(B * S, D)
    for lyr in params["layers"]:
        xf = transformer_block(xf, lyr, params["num_heads"], B, S)
    pooled = xf.reshape(B, S, D)[:, 0, :]          # class-token pooled
    # final LN applied after pooling (exact: LN is per-token)
    return layernorm(pooled, params["lnf_g"], params["lnf_b"])   # (B, align_dim)


def text_encoder(params, text):
    B, L = text.shape
    Dt = params["embed_dim"]
    # token embedding as an XLA gather
    x = jnp.take(params["emb_table"], text.reshape(-1), axis=0).reshape(B, L, Dt)
    x = x + params["pos_embed"][:, :L, :]
    xf = x.reshape(B * L, Dt)
    for lyr in params["layers"]:
        xf = transformer_block(xf, lyr, params["num_heads"], B, L)
    pooled = xf.reshape(B, L, Dt)[:, -1, :]        # last-token pooling
    # TODO(synk): reference CLIP uses causal text attention + argmax-EOT pooling;
    # sub-module source was not provided, so bidirectional attention + last-token
    # pooling is used here.
    # final LN fused with the alignment projection (exact: LN is per-token)
    return ln_linear(pooled, params["lnf_g"], params["lnf_b"],
                     params["proj_w"], params["proj_b"])         # (B, align_dim)


def clip_forward(params, image, text):
    img_feat = vision_encoder(params["vision"], image)
    txt_feat = text_encoder(params["text"], text)
    img_n = l2_normalize(img_feat)
    txt_n = l2_normalize(txt_feat)
    logits_per_image = clip_logits(img_n, txt_n, params["scale_factor"])
    logits_per_text = logits_per_image.T   # exact: scale * txt_n @ img_n.T
    return logits_per_image, logits_per_text


# --------------------------- deterministic init ------------------------------

def init_layer(key, dim, mlp_dim):
    ks = jax.random.split(key, 4)
    std = 0.02
    f32, bf16 = jnp.float32, jnp.bfloat16
    return {
        "ln1_g": jnp.ones((dim,), f32), "ln1_b": jnp.zeros((dim,), f32),
        "w_qkv": (std * jax.random.normal(ks[0], (dim, 3 * dim), f32)).astype(bf16),
        "b_qkv": jnp.zeros((3 * dim,), f32),
        "wo": (std * jax.random.normal(ks[1], (dim, dim), f32)).astype(bf16),
        "bo": jnp.zeros((dim,), f32),
        "ln2_g": jnp.ones((dim,), f32), "ln2_b": jnp.zeros((dim,), f32),
        "w1": (std * jax.random.normal(ks[2], (dim, mlp_dim), f32)).astype(bf16),
        "b1": jnp.zeros((mlp_dim,), f32),
        "w2": (std * jax.random.normal(ks[3], (mlp_dim, dim), f32)).astype(bf16),
        "b2": jnp.zeros((dim,), f32),
    }


def init_clip_params(key, *, align_dim, in_channel, patch_size, img_size,
                     vision_num_layers, vision_num_heads, vision_mlp_dim,
                     vocab_size, text_max_len, text_embed_dim,
                     text_num_layers, text_num_heads, text_mlp_dim):
    f32, bf16 = jnp.float32, jnp.bfloat16
    std = 0.02
    kv, kt = jax.random.split(key)
    num_patches = (img_size // patch_size) ** 2

    kv_parts = jax.random.split(kv, vision_num_layers + 3)
    vision = {
        "patch_size": patch_size, "align_dim": align_dim, "num_heads": vision_num_heads,
        "patch_w": (std * jax.random.normal(
            kv_parts[0], (in_channel * patch_size * patch_size, align_dim), f32)).astype(bf16),
        "patch_b": jnp.zeros((align_dim,), f32),
        "cls_token": std * jax.random.normal(kv_parts[1], (1, 1, align_dim), f32),
        "pos_embed": std * jax.random.normal(kv_parts[2], (1, num_patches + 1, align_dim), f32),
        "layers": [init_layer(kv_parts[3 + i], align_dim, vision_mlp_dim)
                   for i in range(vision_num_layers)],
        "lnf_g": jnp.ones((align_dim,), f32), "lnf_b": jnp.zeros((align_dim,), f32),
    }

    kt_parts = jax.random.split(kt, text_num_layers + 3)
    text = {
        "embed_dim": text_embed_dim, "vocab_size": vocab_size, "num_heads": text_num_heads,
        "emb_table": std * jax.random.normal(kt_parts[0], (vocab_size, text_embed_dim), f32),
        "pos_embed": std * jax.random.normal(kt_parts[1], (1, text_max_len, text_embed_dim), f32),
        "layers": [init_layer(kt_parts[3 + i], text_embed_dim, text_mlp_dim)
                   for i in range(text_num_layers)],
        "lnf_g": jnp.ones((text_embed_dim,), f32), "lnf_b": jnp.zeros((text_embed_dim,), f32),
        "proj_w": (std * jax.random.normal(kt_parts[2], (text_embed_dim, align_dim), f32)).astype(bf16),
        "proj_b": jnp.zeros((align_dim,), f32),
    }

    return {
        "vision": vision,
        "text": text,
        "scale_factor": jnp.asarray(np.log(1.0 / 0.07), f32),  # nn.Parameter(ones([]) * log(1/0.07))
    }


# ---------------------------------- driver -----------------------------------

if __name__ == "__main__":
    cfg = dict(
        align_dim=32, in_channel=3, patch_size=4, img_size=16,
        vision_num_layers=2, vision_num_heads=2, vision_mlp_dim=64,
        vocab_size=64, text_max_len=8, text_embed_dim=32,
        text_num_layers=2, text_num_heads=2, text_mlp_dim=64,
    )
    key = jax.random.PRNGKey(0)
    kp, ki, kt = jax.random.split(key, 3)

    params = init_clip_params(kp, **cfg)

    B = 2
    image = jax.random.normal(ki, (B, cfg["in_channel"], cfg["img_size"], cfg["img_size"]),
                              dtype=jnp.float32)
    text = jax.random.randint(kt, (B, cfg["text_max_len"]), 0, cfg["vocab_size"],
                              dtype=jnp.int32)

    fwd = jax.jit(lambda img, txt: clip_forward(params, img, txt))
    logits_per_image, logits_per_text = jax.block_until_ready(fwd(image, text))

    assert logits_per_image.shape == (B, B)
    assert logits_per_text.shape == (B, B)
    assert bool(jnp.allclose(logits_per_image, jnp.transpose(logits_per_text), atol=1e-3))
    assert bool(jnp.all(jnp.isfinite(logits_per_image)))
    print("KERNEL_OK")
</pallas_src>

<mosaic_0001>
module attributes {stable_mosaic.version = 11 : i64} {
  func.func @_linear_kernel(%arg0: i32, %arg1: i32, %arg2: i32, %arg3: memref<32x48xf32, #tpu.memory_space<vmem>>, %arg4: memref<48x32xbf16, #tpu.memory_space<vmem>>, %arg5: memref<1x32xf32, #tpu.memory_space<vmem>>, %arg6: memref<32x32xf32, #tpu.memory_space<vmem>>, %arg7: memref<32x32xf32, #tpu.memory_space<vmem>>) attributes {dimension_semantics = [#tpu.dimension_semantics<parallel>, #tpu.dimension_semantics<parallel>, #tpu.dimension_semantics<arbitrary>], iteration_bounds = array<i64: 1, 1, 1>, scalar_prefetch = 0 : i64, scratch_operands = 1 : i64, tpu.core_type = #tpu.core_type<tc>, window_params = [{transform_indices = @transform_0, window_bounds = array<i64: 32, 48>}, {transform_indices = @transform_1, window_bounds = array<i64: 48, 32>}, {transform_indices = @transform_2, window_bounds = array<i64: 1, 32>}, {transform_indices = @transform_3, window_bounds = array<i64: 32, 32>}]} {
    %c0_i32 = arith.constant 0 : i32
    %0 = arith.cmpi eq, %arg2, %c0_i32 : i32
    %1 = arith.extui %0 : i1 to i32
    %c0_i32_0 = arith.constant 0 : i32
    %2 = arith.cmpi ne, %1, %c0_i32_0 : i32
    scf.if %2 {
      %cst_10 = arith.constant 0.000000e+00 : f32
      %13 = vector.broadcast %cst_10 : f32 to vector<32x32xf32>
      %c0_11 = arith.constant 0 : index
      %c0_12 = arith.constant 0 : index
      %14 = vector.load %arg7[%c0_11, %c0_12] : memref<32x32xf32, #tpu.memory_space<vmem>>, vector<32x32xf32>
      tpu.vector_store %arg7[%c0_11, %c0_12], %13 {strides = array<i32>} : memref<32x32xf32, #tpu.memory_space<vmem>>, vector<32x32xf32>,
    } else {
    }
    %c0 = arith.constant 0 : index
    %c0_1 = arith.constant 0 : index
    %3 = vector.load %arg7[%c0, %c0_1] : memref<32x32xf32, #tpu.memory_space<vmem>>, vector<32x32xf32>
    %c0_2 = arith.constant 0 : index
    %c0_3 = arith.constant 0 : index
    %4 = vector.load %arg3[%c0_2, %c0_3] : memref<32x48xf32, #tpu.memory_space<vmem>>, vector<32x48xf32>
    %5 = arith.truncf %4 : vector<32x48xf32> to vector<32x48xbf16>
    %c0_4 = arith.constant 0 : index
    %c0_5 = arith.constant 0 : index
    %6 = vector.load %arg4[%c0_4, %c0_5] : memref<48x32xbf16, #tpu.memory_space<vmem>>, vector<48x32xbf16>
    %cst = arith.constant dense<0.000000e+00> : vector<32x32xf32>
    %7 = tpu.matmul %5, %6, %cst {dimension_numbers = #tpu.dot_dimension_numbers<[1], [0], [0], [1], [0, 0, 1, 1], [], []>} : vector<32x48xbf16>, vector<48x32xbf16>, vector<32x32xf32> -> vector<32x32xf32>
    %8 = arith.addf %3, %7 : vector<32x32xf32>
    %c0_6 = arith.constant 0 : index
    %c0_7 = arith.constant 0 : index
    %9 = vector.load %arg7[%c0_6, %c0_7] : memref<32x32xf32, #tpu.memory_space<vmem>>, vector<32x32xf32>
    tpu.vector_store %arg7[%c0_6, %c0_7], %8 {strides = array<i32>} : memref<32x32xf32, #tpu.memory_space<vmem>>, vector<32x32xf32>,
    %c0_i32_8 = arith.constant 0 : i32
    %10 = arith.cmpi eq, %arg2, %c0_i32_8 : i32
    %11 = arith.extui %10 : i1 to i32
    %c0_i32_9 = arith.constant 0 : i32
    %12 = arith.cmpi ne, %11, %c0_i32_9 : i32
    scf.if %12 {
      %c0_10 = arith.constant 0 : index
      %c0_11 = arith.constant 0 : index
      %13 = vector.load %arg7[%c0_10, %c0_11] : memref<32x32xf32, #tpu.memory_space<vmem>>, vector<32x32xf32>
      %c0_12 = arith.constant 0 : index
      %c0_13 = arith.constant 0 : index
      %14 = vector.load %arg5[%c0_12, %c0_13] : memref<1x32xf32, #tpu.memory_space<vmem>>, vector<1x32xf32>
      %15 = vector.broadcast %14 : vector<1x32xf32> to vector<32x32xf32>
      %16 = arith.addf %13, %15 : vector<32x32xf32>
      %c0_14 = arith.constant 0 : index
      %c0_15 = arith.constant 0 : index
      %17 = vector.load %arg6[%c0_14, %c0_15] : memref<32x32xf32, #tpu.memory_space<vmem>>, vector<32x32xf32>
      tpu.vector_store %arg6[%c0_14, %c0_15], %16 {strides = array<i32>} : memref<32x32xf32, #tpu.memory_space<vmem>>, vector<32x32xf32>,
    } else {
    }
    return
  }
  func.func @transform_0(%arg0: i32, %arg1: i32, %arg2: i32) -> (i32, i32) {
    %c0_i32 = arith.constant 0 : i32
    return %arg0, %arg2 : i32, i32
  }
  func.func @transform_1(%arg0: i32, %arg1: i32, %arg2: i32) -> (i32, i32) {
    %c0_i32 = arith.constant 0 : i32
    return %arg2, %arg1 : i32, i32
  }
  func.func @transform_2(%arg0: i32, %arg1: i32, %arg2: i32) -> (i32, i32) {
    %c0_i32 = arith.constant 0 : i32
    %c0_i32_0 = arith.constant 0 : i32
    return %c0_i32, %arg1 : i32, i32
  }
  func.func @transform_3(%arg0: i32, %arg1: i32, %arg2: i32) -> (i32, i32) {
    %c0_i32 = arith.constant 0 : i32
    return %arg0, %arg1 : i32, i32
  }
}

module attributes {stable_mosaic.version = 11 : i64} {
  func.func @_attention_kernel(%arg0: i32, %arg1: memref<1x17x96xbf16, #tpu.memory_space<vmem>>, %arg2: memref<1x17x32xbf16, #tpu.memory_space<vmem>>) attributes {dimension_semantics = [#tpu.dimension_semantics<parallel>], iteration_bounds = array<i64: 2>, scalar_prefetch = 0 : i64, scratch_operands = 0 : i64, tpu.core_type = #tpu.core_type<tc>, window_params = [{transform_indices = @transform_0, window_bounds = array<i64: 1, 17, 96>}, {transform_indices = @transform_1, window_bounds = array<i64: 1, 17, 32>}]} {
    %c0 = arith.constant 0 : index
    %c0_0 = arith.constant 0 : index
    %c0_1 = arith.constant 0 : index
    %0 = vector.load %arg1[%c0, %c0_0, %c0_1] : memref<1x17x96xbf16, #tpu.memory_space<vmem>>, vector<1x17x96xbf16>
    %1 = vector.shape_cast %0 : vector<1x17x96xbf16> to vector<17x96xbf16>
    %2 = vector.extract_strided_slice %1 {offsets = [0, 0], sizes = [17, 16], strides = [1, 1]} : vector<17x96xbf16> to vector<17x16xbf16>
    %3 = vector.extract_strided_slice %1 {offsets = [0, 32], sizes = [17, 16], strides = [1, 1]} : vector<17x96xbf16> to vector<17x16xbf16>
    %4 = vector.extract_strided_slice %1 {offsets = [0, 64], sizes = [17, 16], strides = [1, 1]} : vector<17x96xbf16> to vector<17x16xbf16>
    %cst = arith.constant dense<0.000000e+00> : vector<17x17xf32>
    %5 = tpu.matmul %2, %3, %cst {dimension_numbers = #tpu.dot_dimension_numbers<[1], [1], [0], [0], [0, 0, 1, 0], [], []>} : vector<17x16xbf16>, vector<17x16xbf16>, vector<17x17xf32> -> vector<17x17xf32>
    %cst_2 = arith.constant 2.500000e-01 : f32
    %6 = vector.broadcast %cst_2 : f32 to vector<17x17xf32>
    %7 = arith.mulf %5, %6 : vector<17x17xf32>
    %cst_3 = arith.constant dense<0xFF800000> : vector<17xf32>
    %8 = vector.multi_reduction <maximumf>, %7, %cst_3 [1] : vector<17x17xf32> to vector<17xf32>
    %9 = vector.shape_cast %8 : vector<17xf32> to vector<17x1xf32>
    %10 = vector.broadcast %9 : vector<17x1xf32> to vector<17x17xf32>
    %11 = arith.subf %7, %10 : vector<17x17xf32>
    %12 = math.exp %11 : vector<17x17xf32>
    %cst_4 = arith.constant dense<0.000000e+00> : vector<17xf32>
    %13 = vector.multi_reduction <add>, %12, %cst_4 [1] : vector<17x17xf32> to vector<17xf32>
    %14 = vector.shape_cast %13 : vector<17xf32> to vector<17x1xf32>
    %15 = tpu.reciprocal %14 {approx = true} : vector<17x1xf32> -> vector<17x1xf32>
    %16 = vector.broadcast %15 : vector<17x1xf32> to vector<17x17xf32>
    %17 = arith.mulf %12, %16 : vector<17x17xf32>
    %18 = arith.truncf %17 : vector<17x17xf32> to vector<17x17xbf16>
    %cst_5 = arith.constant dense<0.000000e+00> : vector<17x16xf32>
    %19 = tpu.matmul %18, %4, %cst_5 {dimension_numbers = #tpu.dot_dimension_numbers<[1], [0], [0], [1], [0, 0, 1, 1], [], []>} : vector<17x17xbf16>, vector<17x16xbf16>, vector<17x16xf32> -> vector<17x16xf32>
    %20 = vector.extract_strided_slice %1 {offsets = [0, 16], sizes = [17, 16], strides = [1, 1]} : vector<17x96xbf16> to vector<17x16xbf16>
    %21 = vector.extract_strided_slice %1 {offsets = [0, 48], sizes = [17, 16], strides = [1, 1]} : vector<17x96xbf16> to vector<17x16xbf16>
    %22 = vector.extract_strided_slice %1 {offsets = [0, 80], sizes = [17, 16], strides = [1, 1]} : vector<17x96xbf16> to vector<17x16xbf16>
    %cst_6 = arith.constant dense<0.000000e+00> : vector<17x17xf32>
    %23 = tpu.matmul %20, %21, %cst_6 {dimension_numbers = #tpu.dot_dimension_numbers<[1], [1], [0], [0], [0, 0, 1, 0], [], []>} : vector<17x16xbf16>, vector<17x16xbf16>, vector<17x17xf32> -> vector<17x17xf32>
    %cst_7 = arith.constant 2.500000e-01 : f32
    %24 = vector.broadcast %cst_7 : f32 to vector<17x17xf32>
    %25 = arith.mulf %23, %24 : vector<17x17xf32>
    %cst_8 = arith.constant dense<0xFF800000> : vector<17xf32>
    %26 = vector.multi_reduction <maximumf>, %25, %cst_8 [1] : vector<17x17xf32> to vector<17xf32>
    %27 = vector.shape_cast %26 : vector<17xf32> to vector<17x1xf32>
    %28 = vector.broadcast %27 : vector<17x1xf32> to vector<17x17xf32>
    %29 = arith.subf %25, %28 : vector<17x17xf32>
    %30 = math.exp %29 : vector<17x17xf32>
    %cst_9 = arith.constant dense<0.000000e+00> : vector<17xf32>
    %31 = vector.multi_reduction <add>, %30, %cst_9 [1] : vector<17x17xf32> to vector<17xf32>
    %32 = vector.shape_cast %31 : vector<17xf32> to vector<17x1xf32>
    %33 = tpu.reciprocal %32 {approx = true} : vector<17x1xf32> -> vector<17x1xf32>
    %34 = vector.broadcast %33 : vector<17x1xf32> to vector<17x17xf32>
    %35 = arith.mulf %30, %34 : vector<17x17xf32>
    %36 = arith.truncf %35 : vector<17x17xf32> to vector<17x17xbf16>
    %cst_10 = arith.constant dense<0.000000e+00> : vector<17x16xf32>
    %37 = tpu.matmul %36, %22, %cst_10 {dimension_numbers = #tpu.dot_dimension_numbers<[1], [0], [0], [1], [0, 0, 1, 1], [], []>} : vector<17x17xbf16>, vector<17x16xbf16>, vector<17x16xf32> -> vector<17x16xf32>
    %38 = tpu.concatenate %19, %37 in 1 : vector<17x16xf32>, vector<17x16xf32> -> vector<17x32xf32>
    %39 = arith.truncf %38 : vector<17x32xf32> to vector<17x32xbf16>
    %c0_11 = arith.constant 0 : index
    %c0_12 = arith.constant 0 : index
    %c0_13 = arith.constant 0 : index
    %40 = vector.load %arg2[%c0_11, %c0_12, %c0_13] : memref<1x17x32xbf16, #tpu.memory_space<vmem>>, vector<1x17x32xbf16>
    %41 = vector.shape_cast %40 : vector<1x17x32xbf16> to vector<17x32xbf16>
    %42 = vector.shape_cast %39 : vector<17x32xbf16> to vector<1x17x32xbf16>
    tpu.vector_store %arg2[%c0_11, %c0_12, %c0_13], %42 {strides = array<i32>} : memref<1x17x32xbf16, #tpu.memory_space<vmem>>, vector<1x17x32xbf16>,
    return
  }
  func.func @transform_0(%arg0: i32) -> (i32, i32, i32) {
    %c0_i32 = arith.constant 0 : i32
    %c0_i32_0 = arith.constant 0 : i32
    %c0_i32_1 = arith.constant 0 : i32
    return %arg0, %c0_i32, %c0_i32_0 : i32, i32, i32
  }
  func.func @transform_1(%arg0: i32) -> (i32, i32, i32) {
    %c0_i32 = arith.constant 0 : i32
    %c0_i32_0 = arith.constant 0 : i32
    %c0_i32_1 = arith.constant 0 : i32
    return %arg0, %c0_i32, %c0_i32_0 : i32, i32, i32
  }
}

module attributes {stable_mosaic.version = 11 : i64} {
  func.func @_ln_linear_kernel(%arg0: i32, %arg1: i32, %arg2: memref<40x32xf32, #tpu.memory_space<vmem>>, %arg3: memref<1x32xf32, #tpu.memory_space<vmem>>, %arg4: memref<1x32xf32, #tpu.memory_space<vmem>>, %arg5: memref<32x96xbf16, #tpu.memory_space<vmem>>, %arg6: memref<1x96xf32, #tpu.memory_space<vmem>>, %arg7: memref<40x96xbf16, #tpu.memory_space<vmem>>, %arg8: memref<40x32xbf16, #tpu.memory_space<vmem>>) attributes {dimension_semantics = [#tpu.dimension_semantics<parallel>, #tpu.dimension_semantics<arbitrary>], iteration_bounds = array<i64: 1, 1>, scalar_prefetch = 0 : i64, scratch_operands = 1 : i64, tpu.core_type = #tpu.core_type<tc>, window_params = [{transform_indices = @transform_0, window_bounds = array<i64: 40, 32>}, {pipeline_mode = #tpu.pipeline_mode<synchronous>, transform_indices = @transform_1, window_bounds = array<i64: 1, 32>}, {pipeline_mode = #tpu.pipeline_mode<synchronous>, transform_indices = @transform_2, window_bounds = array<i64: 1, 32>}, {transform_indices = @transform_3, window_bounds = array<i64: 32, 96>}, {transform_indices = @transform_4, window_bounds = array<i64: 1, 96>}, {transform_indices = @transform_5, window_bounds = array<i64: 40, 96>}]} {
    %c0_i32 = arith.constant 0 : i32
    %0 = arith.cmpi eq, %arg1, %c0_i32 : i32
    %1 = arith.extui %0 : i1 to i32
    %c0_i32_0 = arith.constant 0 : i32
    %2 = arith.cmpi ne, %1, %c0_i32_0 : i32
    scf.if %2 {
      %c0_8 = arith.constant 0 : index
      %c0_9 = arith.constant 0 : index
      %11 = vector.load %arg2[%c0_8, %c0_9] : memref<40x32xf32, #tpu.memory_space<vmem>>, vector<40x32xf32>
      %cst_10 = arith.constant dense<0.000000e+00> : vector<40xf32>
      %12 = vector.multi_reduction <add>, %11, %cst_10 [1] : vector<40x32xf32> to vector<40xf32>
      %13 = vector.shape_cast %12 : vector<40xf32> to vector<40x1xf32>
      %cst_11 = arith.constant 3.200000e+01 : f32
      %14 = vector.broadcast %cst_11 : f32 to vector<40x1xf32>
      %15 = arith.divf %13, %14 : vector<40x1xf32>
      %16 = vector.broadcast %15 : vector<40x1xf32> to vector<40x32xf32>
      %17 = arith.subf %11, %16 : vector<40x32xf32>
      %18 = arith.mulf %17, %17 : vector<40x32xf32>
      %cst_12 = arith.constant dense<0.000000e+00> : vector<40xf32>
      %19 = vector.multi_reduction <add>, %18, %cst_12 [1] : vector<40x32xf32> to vector<40xf32>
      %20 = vector.shape_cast %19 : vector<40xf32> to vector<40x1xf32>
      %cst_13 = arith.constant 3.200000e+01 : f32
      %21 = vector.broadcast %cst_13 : f32 to vector<40x1xf32>
      %22 = arith.divf %20, %21 : vector<40x1xf32>
      %cst_14 = arith.constant 9.99999974E-6 : f32
      %23 = vector.broadcast %cst_14 : f32 to vector<40x1xf32>
      %24 = arith.addf %22, %23 : vector<40x1xf32>
      %25 = math.rsqrt %24 : vector<40x1xf32>
      %26 = vector.broadcast %25 : vector<40x1xf32> to vector<40x32xf32>
      %27 = arith.mulf %17, %26 : vector<40x32xf32>
      %c0_15 = arith.constant 0 : index
      %c0_16 = arith.constant 0 : index
      %28 = vector.load %arg3[%c0_15, %c0_16] : memref<1x32xf32, #tpu.memory_space<vmem>>, vector<1x32xf32>
      %29 = vector.broadcast %28 : vector<1x32xf32> to vector<40x32xf32>
      %30 = arith.mulf %27, %29 : vector<40x32xf32>
      %c0_17 = arith.constant 0 : index
      %c0_18 = arith.constant 0 : index
      %31 = vector.load %arg4[%c0_17, %c0_18] : memref<1x32xf32, #tpu.memory_space<vmem>>, vector<1x32xf32>
      %32 = vector.broadcast %31 : vector<1x32xf32> to vector<40x32xf32>
      %33 = arith.addf %30, %32 : vector<40x32xf32>
      %34 = arith.truncf %33 : vector<40x32xf32> to vector<40x32xbf16>
      %c0_19 = arith.constant 0 : index
      %c0_20 = arith.constant 0 : index
      %35 = vector.load %arg8[%c0_19, %c0_20] : memref<40x32xbf16, #tpu.memory_space<vmem>>, vector<40x32xbf16>
      tpu.vector_store %arg8[%c0_19, %c0_20], %34 {strides = array<i32>} : memref<40x32xbf16, #tpu.memory_space<vmem>>, vector<40x32xbf16>,
    } else {
    }
    %c0 = arith.constant 0 : index
    %c0_1 = arith.constant 0 : index
    %3 = vector.load %arg8[%c0, %c0_1] : memref<40x32xbf16, #tpu.memory_space<vmem>>, vector<40x32xbf16>
    %c0_2 = arith.constant 0 : index
    %c0_3 = arith.constant 0 : index
    %4 = vector.load %arg5[%c0_2, %c0_3] : memref<32x96xbf16, #tpu.memory_space<vmem>>, vector<32x96xbf16>
    %cst = arith.constant dense<0.000000e+00> : vector<40x96xf32>
    %5 = tpu.matmul %3, %4, %cst {dimension_numbers = #tpu.dot_dimension_numbers<[1], [0], [0], [1], [0, 0, 1, 1], [], []>} : vector<40x32xbf16>, vector<32x96xbf16>, vector<40x96xf32> -> vector<40x96xf32>
    %c0_4 = arith.constant 0 : index
    %c0_5 = arith.constant 0 : index
    %6 = vector.load %arg6[%c0_4, %c0_5] : memref<1x96xf32, #tpu.memory_space<vmem>>, vector<1x96xf32>
    %7 = vector.broadcast %6 : vector<1x96xf32> to vector<40x96xf32>
    %8 = arith.addf %5, %7 : vector<40x96xf32>
    %9 = arith.truncf %8 : vector<40x96xf32> to vector<40x96xbf16>
    %c0_6 = arith.constant 0 : index
    %c0_7 = arith.constant 0 : index
    %10 = vector.load %arg7[%c0_6, %c0_7] : memref<40x96xbf16, #tpu.memory_space<vmem>>, vector<40x96xbf16>
    tpu.vector_store %arg7[%c0_6, %c0_7], %9 {strides = array<i32>} : memref<40x96xbf16, #tpu.memory_space<vmem>>, vector<40x96xbf16>,
    return
  }
  func.func @transform_0(%arg0: i32, %arg1: i32) -> (i32, i32) {
    %c0_i32 = arith.constant 0 : i32
    %c0_i32_0 = arith.constant 0 : i32
    return %arg0, %c0_i32 : i32, i32
  }
  func.func @transform_1(%arg0: i32, %arg1: i32) -> (i32, i32) {
    %c0_i32 = arith.constant 0 : i32
    %c0_i32_0 = arith.constant 0 : i32
    %c0_i32_1 = arith.constant 0 : i32
    return %c0_i32, %c0_i32_0 : i32, i32
  }
  func.func @transform_2(%arg0: i32, %arg1: i32) -> (i32, i32) {
    %c0_i32 = arith.constant 0 : i32
    %c0_i32_0 = arith.constant 0 : i32
    %c0_i32_1 = arith.constant 0 : i32
    return %c0_i32, %c0_i32_0 : i32, i32
  }
  func.func @transform_3(%arg0: i32, %arg1: i32) -> (i32, i32) {
    %c0_i32 = arith.constant 0 : i32
    %c0_i32_0 = arith.constant 0 : i32
    return %c0_i32, %arg1 : i32, i32
  }
  func.func @transform_4(%arg0: i32, %arg1: i32) -> (i32, i32) {
    %c0_i32 = arith.constant 0 : i32
    %c0_i32_0 = arith.constant 0 : i32
    return %c0_i32, %arg1 : i32, i32
  }
  func.func @transform_5(%arg0: i32, %arg1: i32) -> (i32, i32) {
    %c0_i32 = arith.constant 0 : i32
    return %arg0, %arg1 : i32, i32
  }
}

module attributes {stable_mosaic.version = 11 : i64} {
  func.func @_linear_kernel(%arg0: i32, %arg1: i32, %arg2: i32, %arg3: memref<40x32xbf16, #tpu.memory_space<vmem>>, %arg4: memref<32x32xbf16, #tpu.memory_space<vmem>>, %arg5: memref<1x32xf32, #tpu.memory_space<vmem>>, %arg6: memref<40x32xf32, #tpu.memory_space<vmem>>, %arg7: memref<40x32xf32, #tpu.memory_space<vmem>>, %arg8: memref<40x32xf32, #tpu.memory_space<vmem>>) attributes {dimension_semantics = [#tpu.dimension_semantics<parallel>, #tpu.dimension_semantics<parallel>, #tpu.dimension_semantics<arbitrary>], iteration_bounds = array<i64: 1, 1, 1>, scalar_prefetch = 0 : i64, scratch_operands = 1 : i64, tpu.core_type = #tpu.core_type<tc>, window_params = [{transform_indices = @transform_0, window_bounds = array<i64: 40, 32>}, {transform_indices = @transform_1, window_bounds = array<i64: 32, 32>}, {transform_indices = @transform_2, window_bounds = array<i64: 1, 32>}, {transform_indices = @transform_3, window_bounds = array<i64: 40, 32>}, {transform_indices = @transform_4, window_bounds = array<i64: 40, 32>}]} {
    %c0_i32 = arith.constant 0 : i32
    %0 = arith.cmpi eq, %arg2, %c0_i32 : i32
    %1 = arith.extui %0 : i1 to i32
    %c0_i32_0 = arith.constant 0 : i32
    %2 = arith.cmpi ne, %1, %c0_i32_0 : i32
    scf.if %2 {
      %cst_10 = arith.constant 0.000000e+00 : f32
      %12 = vector.broadcast %cst_10 : f32 to vector<40x32xf32>
      %c0_11 = arith.constant 0 : index
      %c0_12 = arith.constant 0 : index
      %13 = vector.load %arg8[%c0_11, %c0_12] : memref<40x32xf32, #tpu.memory_space<vmem>>, vector<40x32xf32>
      tpu.vector_store %arg8[%c0_11, %c0_12], %12 {strides = array<i32>} : memref<40x32xf32, #tpu.memory_space<vmem>>, vector<40x32xf32>,
    } else {
    }
    %c0 = arith.constant 0 : index
    %c0_1 = arith.constant 0 : index
    %3 = vector.load %arg8[%c0, %c0_1] : memref<40x32xf32, #tpu.memory_space<vmem>>, vector<40x32xf32>
    %c0_2 = arith.constant 0 : index
    %c0_3 = arith.constant 0 : index
    %4 = vector.load %arg3[%c0_2, %c0_3] : memref<40x32xbf16, #tpu.memory_space<vmem>>, vector<40x32xbf16>
    %c0_4 = arith.constant 0 : index
    %c0_5 = arith.constant 0 : index
    %5 = vector.load %arg4[%c0_4, %c0_5] : memref<32x32xbf16, #tpu.memory_space<vmem>>, vector<32x32xbf16>
    %cst = arith.constant dense<0.000000e+00> : vector<40x32xf32>
    %6 = tpu.matmul %4, %5, %cst {dimension_numbers = #tpu.dot_dimension_numbers<[1], [0], [0], [1], [0, 0, 1, 1], [], []>} : vector<40x32xbf16>, vector<32x32xbf16>, vector<40x32xf32> -> vector<40x32xf32>
    %7 = arith.addf %3, %6 : vector<40x32xf32>
    %c0_6 = arith.constant 0 : index
    %c0_7 = arith.constant 0 : index
    %8 = vector.load %arg8[%c0_6, %c0_7] : memref<40x32xf32, #tpu.memory_space<vmem>>, vector<40x32xf32>
    tpu.vector_store %arg8[%c0_6, %c0_7], %7 {strides = array<i32>} : memref<40x32xf32, #tpu.memory_space<vmem>>, vector<40x32xf32>,
    %c0_i32_8 = arith.constant 0 : i32
    %9 = arith.cmpi eq, %arg2, %c0_i32_8 : i32
    %10 = arith.extui %9 : i1 to i32
    %c0_i32_9 = arith.constant 0 : i32
    %11 = arith.cmpi ne, %10, %c0_i32_9 : i32
    scf.if %11 {
      %c0_10 = arith.constant 0 : index
      %c0_11 = arith.constant 0 : index
      %12 = vector.load %arg8[%c0_10, %c0_11] : memref<40x32xf32, #tpu.memory_space<vmem>>, vector<40x32xf32>
      %c0_12 = arith.constant 0 : index
      %c0_13 = arith.constant 0 : index
      %13 = vector.load %arg5[%c0_12, %c0_13] : memref<1x32xf32, #tpu.memory_space<vmem>>, vector<1x32xf32>
      %14 = vector.broadcast %13 : vector<1x32xf32> to vector<40x32xf32>
      %15 = arith.addf %12, %14 : vector<40x32xf32>
      %c0_14 = arith.constant 0 : index
      %c0_15 = arith.constant 0 : index
      %16 = vector.load %arg6[%c0_14, %c0_15] : memref<40x32xf32, #tpu.memory_space<vmem>>, vector<40x32xf32>
      %17 = arith.addf %15, %16 : vector<40x32xf32>
      %c0_16 = arith.constant 0 : index
      %c0_17 = arith.constant 0 : index
      %18 = vector.load %arg7[%c0_16, %c0_17] : memref<40x32xf32, #tpu.memory_space<vmem>>, vector<40x32xf32>
      tpu.vector_store %arg7[%c0_16, %c0_17], %17 {strides = array<i32>} : memref<40x32xf32, #tpu.memory_space<vmem>>, vector<40x32xf32>,
    } else {
    }
    return
  }
  func.func @transform_0(%arg0: i32, %arg1: i32, %arg2: i32) -> (i32, i32) {
    %c0_i32 = arith.constant 0 : i32
    return %arg0, %arg2 : i32, i32
  }
  func.func @transform_1(%arg0: i32, %arg1: i32, %arg2: i32) -> (i32, i32) {
    %c0_i32 = arith.constant 0 : i32
    return %arg2, %arg1 : i32, i32
  }
  func.func @transform_2(%arg0: i32, %arg1: i32, %arg2: i32) -> (i32, i32) {
    %c0_i32 = arith.constant 0 : i32
    %c0_i32_0 = arith.constant 0 : i32
    return %c0_i32, %arg1 : i32, i32
  }
  func.func @transform_3(%arg0: i32, %arg1: i32, %arg2: i32) -> (i32, i32) {
    %c0_i32 = arith.constant 0 : i32
    return %arg0, %arg1 : i32, i32
  }
  func.func @transform_4(%arg0: i32, %arg1: i32, %arg2: i32) -> (i32, i32) {
    %c0_i32 = arith.constant 0 : i32
    return %arg0, %arg1 : i32, i32
  }
}

module attributes {stable_mosaic.version = 11 : i64} {
  func.func @_ln_linear_kernel(%arg0: i32, %arg1: i32, %arg2: memref<40x32xf32, #tpu.memory_space<vmem>>, %arg3: memref<1x32xf32, #tpu.memory_space<vmem>>, %arg4: memref<1x32xf32, #tpu.memory_space<vmem>>, %arg5: memref<32x64xbf16, #tpu.memory_space<vmem>>, %arg6: memref<1x64xf32, #tpu.memory_space<vmem>>, %arg7: memref<40x64xbf16, #tpu.memory_space<vmem>>, %arg8: memref<40x32xbf16, #tpu.memory_space<vmem>>) attributes {dimension_semantics = [#tpu.dimension_semantics<parallel>, #tpu.dimension_semantics<arbitrary>], iteration_bounds = array<i64: 1, 1>, scalar_prefetch = 0 : i64, scratch_operands = 1 : i64, tpu.core_type = #tpu.core_type<tc>, window_params = [{transform_indices = @transform_0, window_bounds = array<i64: 40, 32>}, {pipeline_mode = #tpu.pipeline_mode<synchronous>, transform_indices = @transform_1, window_bounds = array<i64: 1, 32>}, {pipeline_mode = #tpu.pipeline_mode<synchronous>, transform_indices = @transform_2, window_bounds = array<i64: 1, 32>}, {transform_indices = @transform_3, window_bounds = array<i64: 32, 64>}, {transform_indices = @transform_4, window_bounds = array<i64: 1, 64>}, {transform_indices = @transform_5, window_bounds = array<i64: 40, 64>}]} {
    %c0_i32 = arith.constant 0 : i32
    %0 = arith.cmpi eq, %arg1, %c0_i32 : i32
    %1 = arith.extui %0 : i1 to i32
    %c0_i32_0 = arith.constant 0 : i32
    %2 = arith.cmpi ne, %1, %c0_i32_0 : i32
    scf.if %2 {
      %c0_12 = arith.constant 0 : index
      %c0_13 = arith.constant 0 : index
      %24 = vector.load %arg2[%c0_12, %c0_13] : memref<40x32xf32, #tpu.memory_space<vmem>>, vector<40x32xf32>
      %cst_14 = arith.constant dense<0.000000e+00> : vector<40xf32>
      %25 = vector.multi_reduction <add>, %24, %cst_14 [1] : vector<40x32xf32> to vector<40xf32>
      %26 = vector.shape_cast %25 : vector<40xf32> to vector<40x1xf32>
      %cst_15 = arith.constant 3.200000e+01 : f32
      %27 = vector.broadcast %cst_15 : f32 to vector<40x1xf32>
      %28 = arith.divf %26, %27 : vector<40x1xf32>
      %29 = vector.broadcast %28 : vector<40x1xf32> to vector<40x32xf32>
      %30 = arith.subf %24, %29 : vector<40x32xf32>
      %31 = arith.mulf %30, %30 : vector<40x32xf32>
      %cst_16 = arith.constant dense<0.000000e+00> : vector<40xf32>
      %32 = vector.multi_reduction <add>, %31, %cst_16 [1] : vector<40x32xf32> to vector<40xf32>
      %33 = vector.shape_cast %32 : vector<40xf32> to vector<40x1xf32>
      %cst_17 = arith.constant 3.200000e+01 : f32
      %34 = vector.broadcast %cst_17 : f32 to vector<40x1xf32>
      %35 = arith.divf %33, %34 : vector<40x1xf32>
      %cst_18 = arith.constant 9.99999974E-6 : f32
      %36 = vector.broadcast %cst_18 : f32 to vector<40x1xf32>
      %37 = arith.addf %35, %36 : vector<40x1xf32>
      %38 = math.rsqrt %37 : vector<40x1xf32>
      %39 = vector.broadcast %38 : vector<40x1xf32> to vector<40x32xf32>
      %40 = arith.mulf %30, %39 : vector<40x32xf32>
      %c0_19 = arith.constant 0 : index
      %c0_20 = arith.constant 0 : index
      %41 = vector.load %arg3[%c0_19, %c0_20] : memref<1x32xf32, #tpu.memory_space<vmem>>, vector<1x32xf32>
      %42 = vector.broadcast %41 : vector<1x32xf32> to vector<40x32xf32>
      %43 = arith.mulf %40, %42 : vector<40x32xf32>
      %c0_21 = arith.constant 0 : index
      %c0_22 = arith.constant 0 : index
      %44 = vector.load %arg4[%c0_21, %c0_22] : memref<1x32xf32, #tpu.memory_space<vmem>>, vector<1x32xf32>
      %45 = vector.broadcast %44 : vector<1x32xf32> to vector<40x32xf32>
      %46 = arith.addf %43, %45 : vector<40x32xf32>
      %47 = arith.truncf %46 : vector<40x32xf32> to vector<40x32xbf16>
      %c0_23 = arith.constant 0 : index
      %c0_24 = arith.constant 0 : index
      %48 = vector.load %arg8[%c0_23, %c0_24] : memref<40x32xbf16, #tpu.memory_space<vmem>>, vector<40x32xbf16>
      tpu.vector_store %arg8[%c0_23, %c0_24], %47 {strides = array<i32>} : memref<40x32xbf16, #tpu.memory_space<vmem>>, vector<40x32xbf16>,
    } else {
    }
    %c0 = arith.constant 0 : index
    %c0_1 = arith.constant 0 : index
    %3 = vector.load %arg8[%c0, %c0_1] : memref<40x32xbf16, #tpu.memory_space<vmem>>, vector<40x32xbf16>
    %c0_2 = arith.constant 0 : index
    %c0_3 = arith.constant 0 : index
    %4 = vector.load %arg5[%c0_2, %c0_3] : memref<32x64xbf16, #tpu.memory_space<vmem>>, vector<32x64xbf16>
    %cst = arith.constant dense<0.000000e+00> : vector<40x64xf32>
    %5 = tpu.matmul %3, %4, %cst {dimension_numbers = #tpu.dot_dimension_numbers<[1], [0], [0], [1], [0, 0, 1, 1], [], []>} : vector<40x32xbf16>, vector<32x64xbf16>, vector<40x64xf32> -> vector<40x64xf32>
    %c0_4 = arith.constant 0 : index
    %c0_5 = arith.constant 0 : index
    %6 = vector.load %arg6[%c0_4, %c0_5] : memref<1x64xf32, #tpu.memory_space<vmem>>, vector<1x64xf32>
    %7 = vector.broadcast %6 : vector<1x64xf32> to vector<40x64xf32>
    %8 = arith.addf %5, %7 : vector<40x64xf32>
    %cst_6 = arith.constant 5.000000e-01 : f32
    %9 = vector.broadcast %cst_6 : f32 to vector<40x64xf32>
    %10 = arith.mulf %9, %8 : vector<40x64xf32>
    %cst_7 = arith.constant 4.471500e-02 : f32
    %11 = vector.broadcast %cst_7 : f32 to vector<40x64xf32>
    %12 = arith.mulf %11, %8 : vector<40x64xf32>
    %13 = arith.mulf %12, %8 : vector<40x64xf32>
    %14 = arith.mulf %13, %8 : vector<40x64xf32>
    %15 = arith.addf %8, %14 : vector<40x64xf32>
    %cst_8 = arith.constant 0.797884583 : f32
    %16 = vector.broadcast %cst_8 : f32 to vector<40x64xf32>
    %17 = arith.mulf %16, %15 : vector<40x64xf32>
    %18 = math.tanh %17 : vector<40x64xf32>
    %cst_9 = arith.constant 1.000000e+00 : f32
    %19 = vector.broadcast %cst_9 : f32 to vector<40x64xf32>
    %20 = arith.addf %19, %18 : vector<40x64xf32>
    %21 = arith.mulf %10, %20 : vector<40x64xf32>
    %22 = arith.truncf %21 : vector<40x64xf32> to vector<40x64xbf16>
    %c0_10 = arith.constant 0 : index
    %c0_11 = arith.constant 0 : index
    %23 = vector.load %arg7[%c0_10, %c0_11] : memref<40x64xbf16, #tpu.memory_space<vmem>>, vector<40x64xbf16>
    tpu.vector_store %arg7[%c0_10, %c0_11], %22 {strides = array<i32>} : memref<40x64xbf16, #tpu.memory_space<vmem>>, vector<40x64xbf16>,
    return
  }
  func.func @transform_0(%arg0: i32, %arg1: i32) -> (i32, i32) {
    %c0_i32 = arith.constant 0 : i32
    %c0_i32_0 = arith.constant 0 : i32
    return %arg0, %c0_i32 : i32, i32
  }
  func.func @transform_1(%arg0: i32, %arg1: i32) -> (i32, i32) {
    %c0_i32 = arith.constant 0 : i32
    %c0_i32_0 = arith.constant 0 : i32
    %c0_i32_1 = arith.constant 0 : i32
    return %c0_i32, %c0_i32_0 : i32, i32
  }
  func.func @transform_2(%arg0: i32, %arg1: i32) -> (i32, i32) {
    %c0_i32 = arith.constant 0 : i32
    %c0_i32_0 = arith.constant 0 : i32
    %c0_i32_1 = arith.constant 0 : i32
    return %c0_i32, %c0_i32_0 : i32, i32
  }
  func.func @transform_3(%arg0: i32, %arg1: i32) -> (i32, i32) {
    %c0_i32 = arith.constant 0 : i32
    %c0_i32_0 = arith.constant 0 : i32
    return %c0_i32, %arg1 : i32, i32
  }
  func.func @transform_4(%arg0: i32, %arg1: i32) -> (i32, i32) {
    %c0_i32 = arith.constant 0 : i32
    %c0_i32_0 = arith.constant 0 : i32
    return %c0_i32, %arg1 : i32, i32
  }
  func.func @transform_5(%arg0: i32, %arg1: i32) -> (i32, i32) {
    %c0_i32 = arith.constant 0 : i32
    return %arg0, %arg1 : i32, i32
  }
}

module attributes {stable_mosaic.version = 11 : i64} {
  func.func @_linear_kernel(%arg0: i32, %arg1: i32, %arg2: i32, %arg3: memref<40x64xbf16, #tpu.memory_space<vmem>>, %arg4: memref<64x32xbf16, #tpu.memory_space<vmem>>, %arg5: memref<1x32xf32, #tpu.memory_space<vmem>>, %arg6: memref<40x32xf32, #tpu.memory_space<vmem>>, %arg7: memref<40x32xf32, #tpu.memory_space<vmem>>, %arg8: memref<40x32xf32, #tpu.memory_space<vmem>>) attributes {dimension_semantics = [#tpu.dimension_semantics<parallel>, #tpu.dimension_semantics<parallel>, #tpu.dimension_semantics<arbitrary>], iteration_bounds = array<i64: 1, 1, 1>, scalar_prefetch = 0 : i64, scratch_operands = 1 : i64, tpu.core_type = #tpu.core_type<tc>, window_params = [{transform_indices = @transform_0, window_bounds = array<i64: 40, 64>}, {transform_indices = @transform_1, window_bounds = array<i64: 64, 32>}, {transform_indices = @transform_2, window_bounds = array<i64: 1, 32>}, {transform_indices = @transform_3, window_bounds = array<i64: 40, 32>}, {transform_indices = @transform_4, window_bounds = array<i64: 40, 32>}]} {
    %c0_i32 = arith.constant 0 : i32
    %0 = arith.cmpi eq, %arg2, %c0_i32 : i32
    %1 = arith.extui %0 : i1 to i32
    %c0_i32_0 = arith.constant 0 : i32
    %2 = arith.cmpi ne, %1, %c0_i32_0 : i32
    scf.if %2 {
      %cst_10 = arith.constant 0.000000e+00 : f32
      %12 = vector.broadcast %cst_10 : f32 to vector<40x32xf32>
      %c0_11 = arith.constant 0 : index
      %c0_12 = arith.constant 0 : index
      %13 = vector.load %arg8[%c0_11, %c0_12] : memref<40x32xf32, #tpu.memory_space<vmem>>, vector<40x32xf32>
      tpu.vector_store %arg8[%c0_11, %c0_12], %12 {strides = array<i32>} : memref<40x32xf32, #tpu.memory_space<vmem>>, vector<40x32xf32>,
    } else {
    }
    %c0 = arith.constant 0 : index
    %c0_1 = arith.constant 0 : index
    %3 = vector.load %arg8[%c0, %c0_1] : memref<40x32xf32, #tpu.memory_space<vmem>>, vector<40x32xf32>
    %c0_2 = arith.constant 0 : index
    %c0_3 = arith.constant 0 : index
    %4 = vector.load %arg3[%c0_2, %c0_3] : memref<40x64xbf16, #tpu.memory_space<vmem>>, vector<40x64xbf16>
    %c0_4 = arith.constant 0 : index
    %c0_5 = arith.constant 0 : index
    %5 = vector.load %arg4[%c0_4, %c0_5] : memref<64x32xbf16, #tpu.memory_space<vmem>>, vector<64x32xbf16>
    %cst = arith.constant dense<0.000000e+00> : vector<40x32xf32>
    %6 = tpu.matmul %4, %5, %cst {dimension_numbers = #tpu.dot_dimension_numbers<[1], [0], [0], [1], [0, 0, 1, 1], [], []>} : vector<40x64xbf16>, vector<64x32xbf16>, vector<40x32xf32> -> vector<40x32xf32>
    %7 = arith.addf %3, %6 : vector<40x32xf32>
    %c0_6 = arith.constant 0 : index
    %c0_7 = arith.constant 0 : index
    %8 = vector.load %arg8[%c0_6, %c0_7] : memref<40x32xf32, #tpu.memory_space<vmem>>, vector<40x32xf32>
    tpu.vector_store %arg8[%c0_6, %c0_7], %7 {strides = array<i32>} : memref<40x32xf32, #tpu.memory_space<vmem>>, vector<40x32xf32>,
    %c0_i32_8 = arith.constant 0 : i32
    %9 = arith.cmpi eq, %arg2, %c0_i32_8 : i32
    %10 = arith.extui %9 : i1 to i32
    %c0_i32_9 = arith.constant 0 : i32
    %11 = arith.cmpi ne, %10, %c0_i32_9 : i32
    scf.if %11 {
      %c0_10 = arith.constant 0 : index
      %c0_11 = arith.constant 0 : index
      %12 = vector.load %arg8[%c0_10, %c0_11] : memref<40x32xf32, #tpu.memory_space<vmem>>, vector<40x32xf32>
      %c0_12 = arith.constant 0 : index
      %c0_13 = arith.constant 0 : index
      %13 = vector.load %arg5[%c0_12, %c0_13] : memref<1x32xf32, #tpu.memory_space<vmem>>, vector<1x32xf32>
      %14 = vector.broadcast %13 : vector<1x32xf32> to vector<40x32xf32>
      %15 = arith.addf %12, %14 : vector<40x32xf32>
      %c0_14 = arith.constant 0 : index
      %c0_15 = arith.constant 0 : index
      %16 = vector.load %arg6[%c0_14, %c0_15] : memref<40x32xf32, #tpu.memory_space<vmem>>, vector<40x32xf32>
      %17 = arith.addf %15, %16 : vector<40x32xf32>
      %c0_16 = arith.constant 0 : index
      %c0_17 = arith.constant 0 : index
      %18 = vector.load %arg7[%c0_16, %c0_17] : memref<40x32xf32, #tpu.memory_space<vmem>>, vector<40x32xf32>
      tpu.vector_store %arg7[%c0_16, %c0_17], %17 {strides = array<i32>} : memref<40x32xf32, #tpu.memory_space<vmem>>, vector<40x32xf32>,
    } else {
    }
    return
  }
  func.func @transform_0(%arg0: i32, %arg1: i32, %arg2: i32) -> (i32, i32) {
    %c0_i32 = arith.constant 0 : i32
    return %arg0, %arg2 : i32, i32
  }
  func.func @transform_1(%arg0: i32, %arg1: i32, %arg2: i32) -> (i32, i32) {
    %c0_i32 = arith.constant 0 : i32
    return %arg2, %arg1 : i32, i32
  }
  func.func @transform_2(%arg0: i32, %arg1: i32, %arg2: i32) -> (i32, i32) {
    %c0_i32 = arith.constant 0 : i32
    %c0_i32_0 = arith.constant 0 : i32
    return %c0_i32, %arg1 : i32, i32
  }
  func.func @transform_3(%arg0: i32, %arg1: i32, %arg2: i32) -> (i32, i32) {
    %c0_i32 = arith.constant 0 : i32
    return %arg0, %arg1 : i32, i32
  }
  func.func @transform_4(%arg0: i32, %arg1: i32, %arg2: i32) -> (i32, i32) {
    %c0_i32 = arith.constant 0 : i32
    return %arg0, %arg1 : i32, i32
  }
}

module attributes {stable_mosaic.version = 11 : i64} {
  func.func @_layernorm_kernel(%arg0: i32, %arg1: memref<2x32xf32, #tpu.memory_space<vmem>>, %arg2: memref<1x32xf32, #tpu.memory_space<vmem>>, %arg3: memref<1x32xf32, #tpu.memory_space<vmem>>, %arg4: memref<2x32xf32, #tpu.memory_space<vmem>>) attributes {dimension_semantics = [#tpu.dimension_semantics<parallel>], iteration_bounds = array<i64: 1>, scalar_prefetch = 0 : i64, scratch_operands = 0 : i64, tpu.core_type = #tpu.core_type<tc>, window_params = [{transform_indices = @transform_0, window_bounds = array<i64: 2, 32>}, {pipeline_mode = #tpu.pipeline_mode<synchronous>, transform_indices = @transform_1, window_bounds = array<i64: 1, 32>}, {pipeline_mode = #tpu.pipeline_mode<synchronous>, transform_indices = @transform_2, window_bounds = array<i64: 1, 32>}, {transform_indices = @transform_3, window_bounds = array<i64: 2, 32>}]} {
    %c0 = arith.constant 0 : index
    %c0_0 = arith.constant 0 : index
    %0 = vector.load %arg1[%c0, %c0_0] : memref<2x32xf32, #tpu.memory_space<vmem>>, vector<2x32xf32>
    %cst = arith.constant dense<0.000000e+00> : vector<2xf32>
    %1 = vector.multi_reduction <add>, %0, %cst [1] : vector<2x32xf32> to vector<2xf32>
    %2 = vector.shape_cast %1 : vector<2xf32> to vector<2x1xf32>
    %cst_1 = arith.constant 3.200000e+01 : f32
    %3 = vector.broadcast %cst_1 : f32 to vector<2x1xf32>
    %4 = arith.divf %2, %3 : vector<2x1xf32>
    %5 = vector.broadcast %4 : vector<2x1xf32> to vector<2x32xf32>
    %6 = arith.subf %0, %5 : vector<2x32xf32>
    %7 = arith.mulf %6, %6 : vector<2x32xf32>
    %cst_2 = arith.constant dense<0.000000e+00> : vector<2xf32>
    %8 = vector.multi_reduction <add>, %7, %cst_2 [1] : vector<2x32xf32> to vector<2xf32>
    %9 = vector.shape_cast %8 : vector<2xf32> to vector<2x1xf32>
    %cst_3 = arith.constant 3.200000e+01 : f32
    %10 = vector.broadcast %cst_3 : f32 to vector<2x1xf32>
    %11 = arith.divf %9, %10 : vector<2x1xf32>
    %cst_4 = arith.constant 9.99999974E-6 : f32
    %12 = vector.broadcast %cst_4 : f32 to vector<2x1xf32>
    %13 = arith.addf %11, %12 : vector<2x1xf32>
    %14 = math.rsqrt %13 : vector<2x1xf32>
    %15 = vector.broadcast %14 : vector<2x1xf32> to vector<2x32xf32>
    %16 = arith.mulf %6, %15 : vector<2x32xf32>
    %c0_5 = arith.constant 0 : index
    %c0_6 = arith.constant 0 : index
    %17 = vector.load %arg2[%c0_5, %c0_6] : memref<1x32xf32, #tpu.memory_space<vmem>>, vector<1x32xf32>
    %18 = vector.broadcast %17 : vector<1x32xf32> to vector<2x32xf32>
    %19 = arith.mulf %16, %18 : vector<2x32xf32>
    %c0_7 = arith.constant 0 : index
    %c0_8 = arith.constant 0 : index
    %20 = vector.load %arg3[%c0_7, %c0_8] : memref<1x32xf32, #tpu.memory_space<vmem>>, vector<1x32xf32>
    %21 = vector.broadcast %20 : vector<1x32xf32> to vector<2x32xf32>
    %22 = arith.addf %19, %21 : vector<2x32xf32>
    %c0_9 = arith.constant 0 : index
    %c0_10 = arith.constant 0 : index
    %23 = vector.load %arg4[%c0_9, %c0_10] : memref<2x32xf32, #tpu.memory_space<vmem>>, vector<2x32xf32>
    tpu.vector_store %arg4[%c0_9, %c0_10], %22 {strides = array<i32>} : memref<2x32xf32, #tpu.memory_space<vmem>>, vector<2x32xf32>,
    return
  }
  func.func @transform_0(%arg0: i32) -> (i32, i32) {
    %c0_i32 = arith.constant 0 : i32
    %c0_i32_0 = arith.constant 0 : i32
    return %arg0, %c0_i32 : i32, i32
  }
  func.func @transform_1(%arg0: i32) -> (i32, i32) {
    %c0_i32 = arith.constant 0 : i32
    %c0_i32_0 = arith.constant 0 : i32
    %c0_i32_1 = arith.constant 0 : i32
    return %c0_i32, %c0_i32_0 : i32, i32
  }
  func.func @transform_2(%arg0: i32) -> (i32, i32) {
    %c0_i32 = arith.constant 0 : i32
    %c0_i32_0 = arith.constant 0 : i32
    %c0_i32_1 = arith.constant 0 : i32
    return %c0_i32, %c0_i32_0 : i32, i32
  }
  func.func @transform_3(%arg0: i32) -> (i32, i32) {
    %c0_i32 = arith.constant 0 : i32
    %c0_i32_0 = arith.constant 0 : i32
    return %arg0, %c0_i32 : i32, i32
  }
}

module attributes {stable_mosaic.version = 11 : i64} {
  func.func @_l2norm_kernel(%arg0: i32, %arg1: memref<2x32xf32, #tpu.memory_space<vmem>>, %arg2: memref<2x32xf32, #tpu.memory_space<vmem>>) attributes {dimension_semantics = [#tpu.dimension_semantics<parallel>], iteration_bounds = array<i64: 1>, scalar_prefetch = 0 : i64, scratch_operands = 0 : i64, tpu.core_type = #tpu.core_type<tc>, window_params = [{transform_indices = @transform_0, window_bounds = array<i64: 2, 32>}, {transform_indices = @transform_1, window_bounds = array<i64: 2, 32>}]} {
    %c0 = arith.constant 0 : index
    %c0_0 = arith.constant 0 : index
    %0 = vector.load %arg1[%c0, %c0_0] : memref<2x32xf32, #tpu.memory_space<vmem>>, vector<2x32xf32>
    %1 = arith.mulf %0, %0 : vector<2x32xf32>
    %cst = arith.constant dense<0.000000e+00> : vector<2xf32>
    %2 = vector.multi_reduction <add>, %1, %cst [1] : vector<2x32xf32> to vector<2xf32>
    %3 = vector.shape_cast %2 : vector<2xf32> to vector<2x1xf32>
    %4 = math.rsqrt %3 : vector<2x1xf32>
    %5 = vector.broadcast %4 : vector<2x1xf32> to vector<2x32xf32>
    %6 = arith.mulf %0, %5 : vector<2x32xf32>
    %c0_1 = arith.constant 0 : index
    %c0_2 = arith.constant 0 : index
    %7 = vector.load %arg2[%c0_1, %c0_2] : memref<2x32xf32, #tpu.memory_space<vmem>>, vector<2x32xf32>
    tpu.vector_store %arg2[%c0_1, %c0_2], %6 {strides = array<i32>} : memref<2x32xf32, #tpu.memory_space<vmem>>, vector<2x32xf32>,
    return
  }
  func.func @transform_0(%arg0: i32) -> (i32, i32) {
    %c0_i32 = arith.constant 0 : i32
    %c0_i32_0 = arith.constant 0 : i32
    return %arg0, %c0_i32 : i32, i32
  }
  func.func @transform_1(%arg0: i32) -> (i32, i32) {
    %c0_i32 = arith.constant 0 : i32
    %c0_i32_0 = arith.constant 0 : i32
    return %arg0, %c0_i32 : i32, i32
  }
}

module attributes {stable_mosaic.version = 11 : i64} {
  func.func @_ln_linear_kernel(%arg0: i32, %arg1: i32, %arg2: memref<16x32xf32, #tpu.memory_space<vmem>>, %arg3: memref<1x32xf32, #tpu.memory_space<vmem>>, %arg4: memref<1x32xf32, #tpu.memory_space<vmem>>, %arg5: memref<32x96xbf16, #tpu.memory_space<vmem>>, %arg6: memref<1x96xf32, #tpu.memory_space<vmem>>, %arg7: memref<16x96xbf16, #tpu.memory_space<vmem>>, %arg8: memref<16x32xbf16, #tpu.memory_space<vmem>>) attributes {dimension_semantics = [#tpu.dimension_semantics<parallel>, #tpu.dimension_semantics<arbitrary>], iteration_bounds = array<i64: 1, 1>, scalar_prefetch = 0 : i64, scratch_operands = 1 : i64, tpu.core_type = #tpu.core_type<tc>, window_params = [{transform_indices = @transform_0, window_bounds = array<i64: 16, 32>}, {pipeline_mode = #tpu.pipeline_mode<synchronous>, transform_indices = @transform_1, window_bounds = array<i64: 1, 32>}, {pipeline_mode = #tpu.pipeline_mode<synchronous>, transform_indices = @transform_2, window_bounds = array<i64: 1, 32>}, {transform_indices = @transform_3, window_bounds = array<i64: 32, 96>}, {transform_indices = @transform_4, window_bounds = array<i64: 1, 96>}, {transform_indices = @transform_5, window_bounds = array<i64: 16, 96>}]} {
    %c0_i32 = arith.constant 0 : i32
    %0 = arith.cmpi eq, %arg1, %c0_i32 : i32
    %1 = arith.extui %0 : i1 to i32
    %c0_i32_0 = arith.constant 0 : i32
    %2 = arith.cmpi ne, %1, %c0_i32_0 : i32
    scf.if %2 {
      %c0_8 = arith.constant 0 : index
      %c0_9 = arith.constant 0 : index
      %11 = vector.load %arg2[%c0_8, %c0_9] : memref<16x32xf32, #tpu.memory_space<vmem>>, vector<16x32xf32>
      %cst_10 = arith.constant dense<0.000000e+00> : vector<16xf32>
      %12 = vector.multi_reduction <add>, %11, %cst_10 [1] : vector<16x32xf32> to vector<16xf32>
      %13 = vector.shape_cast %12 : vector<16xf32> to vector<16x1xf32>
      %cst_11 = arith.constant 3.200000e+01 : f32
      %14 = vector.broadcast %cst_11 : f32 to vector<16x1xf32>
      %15 = arith.divf %13, %14 : vector<16x1xf32>
      %16 = vector.broadcast %15 : vector<16x1xf32> to vector<16x32xf32>
      %17 = arith.subf %11, %16 : vector<16x32xf32>
      %18 = arith.mulf %17, %17 : vector<16x32xf32>
      %cst_12 = arith.constant dense<0.000000e+00> : vector<16xf32>
      %19 = vector.multi_reduction <add>, %18, %cst_12 [1] : vector<16x32xf32> to vector<16xf32>
      %20 = vector.shape_cast %19 : vector<16xf32> to vector<16x1xf32>
      %cst_13 = arith.constant 3.200000e+01 : f32
      %21 = vector.broadcast %cst_13 : f32 to vector<16x1xf32>
      %22 = arith.divf %20, %21 : vector<16x1xf32>
      %cst_14 = arith.constant 9.99999974E-6 : f32
      %23 = vector.broadcast %cst_14 : f32 to vector<16x1xf32>
      %24 = arith.addf %22, %23 : vector<16x1xf32>
      %25 = math.rsqrt %24 : vector<16x1xf32>
      %26 = vector.broadcast %25 : vector<16x1xf32> to vector<16x32xf32>
      %27 = arith.mulf %17, %26 : vector<16x32xf32>
      %c0_15 = arith.constant 0 : index
      %c0_16 = arith.constant 0 : index
      %28 = vector.load %arg3[%c0_15, %c0_16] : memref<1x32xf32, #tpu.memory_space<vmem>>, vector<1x32xf32>
      %29 = vector.broadcast %28 : vector<1x32xf32> to vector<16x32xf32>
      %30 = arith.mulf %27, %29 : vector<16x32xf32>
      %c0_17 = arith.constant 0 : index
      %c0_18 = arith.constant 0 : index
      %31 = vector.load %arg4[%c0_17, %c0_18] : memref<1x32xf32, #tpu.memory_space<vmem>>, vector<1x32xf32>
      %32 = vector.broadcast %31 : vector<1x32xf32> to vector<16x32xf32>
      %33 = arith.addf %30, %32 : vector<16x32xf32>
      %34 = arith.truncf %33 : vector<16x32xf32> to vector<16x32xbf16>
      %c0_19 = arith.constant 0 : index
      %c0_20 = arith.constant 0 : index
      %35 = vector.load %arg8[%c0_19, %c0_20] : memref<16x32xbf16, #tpu.memory_space<vmem>>, vector<16x32xbf16>
      tpu.vector_store %arg8[%c0_19, %c0_20], %34 {strides = array<i32>} : memref<16x32xbf16, #tpu.memory_space<vmem>>, vector<16x32xbf16>,
    } else {
    }
    %c0 = arith.constant 0 : index
    %c0_1 = arith.constant 0 : index
    %3 = vector.load %arg8[%c0, %c0_1] : memref<16x32xbf16, #tpu.memory_space<vmem>>, vector<16x32xbf16>
    %c0_2 = arith.constant 0 : index
    %c0_3 = arith.constant 0 : index
    %4 = vector.load %arg5[%c0_2, %c0_3] : memref<32x96xbf16, #tpu.memory_space<vmem>>, vector<32x96xbf16>
    %cst = arith.constant dense<0.000000e+00> : vector<16x96xf32>
    %5 = tpu.matmul %3, %4, %cst {dimension_numbers = #tpu.dot_dimension_numbers<[1], [0], [0], [1], [0, 0, 1, 1], [], []>} : vector<16x32xbf16>, vector<32x96xbf16>, vector<16x96xf32> -> vector<16x96xf32>
    %c0_4 = arith.constant 0 : index
    %c0_5 = arith.constant 0 : index
    %6 = vector.load %arg6[%c0_4, %c0_5] : memref<1x96xf32, #tpu.memory_space<vmem>>, vector<1x96xf32>
    %7 = vector.broadcast %6 : vector<1x96xf32> to vector<16x96xf32>
    %8 = arith.addf %5, %7 : vector<16x96xf32>
    %9 = arith.truncf %8 : vector<16x96xf32> to vector<16x96xbf16>
    %c0_6 = arith.constant 0 : index
    %c0_7 = arith.constant 0 : index
    %10 = vector.load %arg7[%c0_6, %c0_7] : memref<16x96xbf16, #tpu.memory_space<vmem>>, vector<16x96xbf16>
    tpu.vector_store %arg7[%c0_6, %c0_7], %9 {strides = array<i32>} : memref<16x96xbf16, #tpu.memory_space<vmem>>, vector<16x96xbf16>,
    return
  }
  func.func @transform_0(%arg0: i32, %arg1: i32) -> (i32, i32) {
    %c0_i32 = arith.constant 0 : i32
    %c0_i32_0 = arith.constant 0 : i32
    return %arg0, %c0_i32 : i32, i32
  }
  func.func @transform_1(%arg0: i32, %arg1: i32) -> (i32, i32) {
    %c0_i32 = arith.constant 0 : i32
    %c0_i32_0 = arith.constant 0 : i32
    %c0_i32_1 = arith.constant 0 : i32
    return %c0_i32, %c0_i32_0 : i32, i32
  }
  func.func @transform_2(%arg0: i32, %arg1: i32) -> (i32, i32) {
    %c0_i32 = arith.constant 0 : i32
    %c0_i32_0 = arith.constant 0 : i32
    %c0_i32_1 = arith.constant 0 : i32
    return %c0_i32, %c0_i32_0 : i32, i32
  }
  func.func @transform_3(%arg0: i32, %arg1: i32) -> (i32, i32) {
    %c0_i32 = arith.constant 0 : i32
    %c0_i32_0 = arith.constant 0 : i32
    return %c0_i32, %arg1 : i32, i32
  }
  func.func @transform_4(%arg0: i32, %arg1: i32) -> (i32, i32) {
    %c0_i32 = arith.constant 0 : i32
    %c0_i32_0 = arith.constant 0 : i32
    return %c0_i32, %arg1 : i32, i32
  }
  func.func @transform_5(%arg0: i32, %arg1: i32) -> (i32, i32) {
    %c0_i32 = arith.constant 0 : i32
    return %arg0, %arg1 : i32, i32
  }
}

module attributes {stable_mosaic.version = 11 : i64} {
  func.func @_attention_kernel(%arg0: i32, %arg1: memref<1x8x96xbf16, #tpu.memory_space<vmem>>, %arg2: memref<1x8x32xbf16, #tpu.memory_space<vmem>>) attributes {dimension_semantics = [#tpu.dimension_semantics<parallel>], iteration_bounds = array<i64: 2>, scalar_prefetch = 0 : i64, scratch_operands = 0 : i64, tpu.core_type = #tpu.core_type<tc>, window_params = [{transform_indices = @transform_0, window_bounds = array<i64: 1, 8, 96>}, {transform_indices = @transform_1, window_bounds = array<i64: 1, 8, 32>}]} {
    %c0 = arith.constant 0 : index
    %c0_0 = arith.constant 0 : index
    %c0_1 = arith.constant 0 : index
    %0 = vector.load %arg1[%c0, %c0_0, %c0_1] : memref<1x8x96xbf16, #tpu.memory_space<vmem>>, vector<1x8x96xbf16>
    %1 = vector.shape_cast %0 : vector<1x8x96xbf16> to vector<8x96xbf16>
    %2 = vector.extract_strided_slice %1 {offsets = [0, 0], sizes = [8, 16], strides = [1, 1]} : vector<8x96xbf16> to vector<8x16xbf16>
    %3 = vector.extract_strided_slice %1 {offsets = [0, 32], sizes = [8, 16], strides = [1, 1]} : vector<8x96xbf16> to vector<8x16xbf16>
    %4 = vector.extract_strided_slice %1 {offsets = [0, 64], sizes = [8, 16], strides = [1, 1]} : vector<8x96xbf16> to vector<8x16xbf16>
    %cst = arith.constant dense<0.000000e+00> : vector<8x8xf32>
    %5 = tpu.matmul %2, %3, %cst {dimension_numbers = #tpu.dot_dimension_numbers<[1], [1], [0], [0], [0, 0, 1, 0], [], []>} : vector<8x16xbf16>, vector<8x16xbf16>, vector<8x8xf32> -> vector<8x8xf32>
    %cst_2 = arith.constant 2.500000e-01 : f32
    %6 = vector.broadcast %cst_2 : f32 to vector<8x8xf32>
    %7 = arith.mulf %5, %6 : vector<8x8xf32>
    %cst_3 = arith.constant dense<0xFF800000> : vector<8xf32>
    %8 = vector.multi_reduction <maximumf>, %7, %cst_3 [1] : vector<8x8xf32> to vector<8xf32>
    %9 = vector.shape_cast %8 : vector<8xf32> to vector<8x1xf32>
    %10 = vector.broadcast %9 : vector<8x1xf32> to vector<8x8xf32>
    %11 = arith.subf %7, %10 : vector<8x8xf32>
    %12 = math.exp %11 : vector<8x8xf32>
    %cst_4 = arith.constant dense<0.000000e+00> : vector<8xf32>
    %13 = vector.multi_reduction <add>, %12, %cst_4 [1] : vector<8x8xf32> to vector<8xf32>
    %14 = vector.shape_cast %13 : vector<8xf32> to vector<8x1xf32>
    %15 = tpu.reciprocal %14 {approx = true} : vector<8x1xf32> -> vector<8x1xf32>
    %16 = vector.broadcast %15 : vector<8x1xf32> to vector<8x8xf32>
    %17 = arith.mulf %12, %16 : vector<8x8xf32>
    %18 = arith.truncf %17 : vector<8x8xf32> to vector<8x8xbf16>
    %cst_5 = arith.constant dense<0.000000e+00> : vector<8x16xf32>
    %19 = tpu.matmul %18, %4, %cst_5 {dimension_numbers = #tpu.dot_dimension_numbers<[1], [0], [0], [1], [0, 0, 1, 1], [], []>} : vector<8x8xbf16>, vector<8x16xbf16>, vector<8x16xf32> -> vector<8x16xf32>
    %20 = vector.extract_strided_slice %1 {offsets = [0, 16], sizes = [8, 16], strides = [1, 1]} : vector<8x96xbf16> to vector<8x16xbf16>
    %21 = vector.extract_strided_slice %1 {offsets = [0, 48], sizes = [8, 16], strides = [1, 1]} : vector<8x96xbf16> to vector<8x16xbf16>
    %22 = vector.extract_strided_slice %1 {offsets = [0, 80], sizes = [8, 16], strides = [1, 1]} : vector<8x96xbf16> to vector<8x16xbf16>
    %cst_6 = arith.constant dense<0.000000e+00> : vector<8x8xf32>
    %23 = tpu.matmul %20, %21, %cst_6 {dimension_numbers = #tpu.dot_dimension_numbers<[1], [1], [0], [0], [0, 0, 1, 0], [], []>} : vector<8x16xbf16>, vector<8x16xbf16>, vector<8x8xf32> -> vector<8x8xf32>
    %cst_7 = arith.constant 2.500000e-01 : f32
    %24 = vector.broadcast %cst_7 : f32 to vector<8x8xf32>
    %25 = arith.mulf %23, %24 : vector<8x8xf32>
    %cst_8 = arith.constant dense<0xFF800000> : vector<8xf32>
    %26 = vector.multi_reduction <maximumf>, %25, %cst_8 [1] : vector<8x8xf32> to vector<8xf32>
    %27 = vector.shape_cast %26 : vector<8xf32> to vector<8x1xf32>
    %28 = vector.broadcast %27 : vector<8x1xf32> to vector<8x8xf32>
    %29 = arith.subf %25, %28 : vector<8x8xf32>
    %30 = math.exp %29 : vector<8x8xf32>
    %cst_9 = arith.constant dense<0.000000e+00> : vector<8xf32>
    %31 = vector.multi_reduction <add>, %30, %cst_9 [1] : vector<8x8xf32> to vector<8xf32>
    %32 = vector.shape_cast %31 : vector<8xf32> to vector<8x1xf32>
    %33 = tpu.reciprocal %32 {approx = true} : vector<8x1xf32> -> vector<8x1xf32>
    %34 = vector.broadcast %33 : vector<8x1xf32> to vector<8x8xf32>
    %35 = arith.mulf %30, %34 : vector<8x8xf32>
    %36 = arith.truncf %35 : vector<8x8xf32> to vector<8x8xbf16>
    %cst_10 = arith.constant dense<0.000000e+00> : vector<8x16xf32>
    %37 = tpu.matmul %36, %22, %cst_10 {dimension_numbers = #tpu.dot_dimension_numbers<[1], [0], [0], [1], [0, 0, 1, 1], [], []>} : vector<8x8xbf16>, vector<8x16xbf16>, vector<8x16xf32> -> vector<8x16xf32>
    %38 = tpu.concatenate %19, %37 in 1 : vector<8x16xf32>, vector<8x16xf32> -> vector<8x32xf32>
    %39 = arith.truncf %38 : vector<8x32xf32> to vector<8x32xbf16>
    %c0_11 = arith.constant 0 : index
    %c0_12 = arith.constant 0 : index
    %c0_13 = arith.constant 0 : index
    %40 = vector.load %arg2[%c0_11, %c0_12, %c0_13] : memref<1x8x32xbf16, #tpu.memory_space<vmem>>, vector<1x8x32xbf16>
    %41 = vector.shape_cast %40 : vector<1x8x32xbf16> to vector<8x32xbf16>
    %42 = vector.shape_cast %39 : vector<8x32xbf16> to vector<1x8x32xbf16>
    tpu.vector_store %arg2[%c0_11, %c0_12, %c0_13], %42 {strides = array<i32>} : memref<1x8x32xbf16, #tpu.memory_space<vmem>>, vector<1x8x32xbf16>,
    return
  }
  func.func @transform_0(%arg0: i32) -> (i32, i32, i32) {
    %c0_i32 = arith.constant 0 : i32
    %c0_i32_0 = arith.constant 0 : i32
    %c0_i32_1 = arith.constant 0 : i32
    return %arg0, %c0_i32, %c0_i32_0 : i32, i32, i32
  }
  func.func @transform_1(%arg0: i32) -> (i32, i32, i32) {
    %c0_i32 = arith.constant 0 : i32
    %c0_i32_0 = arith.constant 0 : i32
    %c0_i32_1 = arith.constant 0 : i32
    return %arg0, %c0_i32, %c0_i32_0 : i32, i32, i32
  }
}

module attributes {stable_mosaic.version = 11 : i64} {
  func.func @_linear_kernel(%arg0: i32, %arg1: i32, %arg2: i32, %arg3: memref<16x32xbf16, #tpu.memory_space<vmem>>, %arg4: memref<32x32xbf16, #tpu.memory_space<vmem>>, %arg5: memref<1x32xf32, #tpu.memory_space<vmem>>, %arg6: memref<16x32xf32, #tpu.memory_space<vmem>>, %arg7: memref<16x32xf32, #tpu.memory_space<vmem>>, %arg8: memref<16x32xf32, #tpu.memory_space<vmem>>) attributes {dimension_semantics = [#tpu.dimension_semantics<parallel>, #tpu.dimension_semantics<parallel>, #tpu.dimension_semantics<arbitrary>], iteration_bounds = array<i64: 1, 1, 1>, scalar_prefetch = 0 : i64, scratch_operands = 1 : i64, tpu.core_type = #tpu.core_type<tc>, window_params = [{transform_indices = @transform_0, window_bounds = array<i64: 16, 32>}, {transform_indices = @transform_1, window_bounds = array<i64: 32, 32>}, {transform_indices = @transform_2, window_bounds = array<i64: 1, 32>}, {transform_indices = @transform_3, window_bounds = array<i64: 16, 32>}, {transform_indices = @transform_4, window_bounds = array<i64: 16, 32>}]} {
    %c0_i32 = arith.constant 0 : i32
    %0 = arith.cmpi eq, %arg2, %c0_i32 : i32
    %1 = arith.extui %0 : i1 to i32
    %c0_i32_0 = arith.constant 0 : i32
    %2 = arith.cmpi ne, %1, %c0_i32_0 : i32
    scf.if %2 {
      %cst_10 = arith.constant 0.000000e+00 : f32
      %12 = vector.broadcast %cst_10 : f32 to vector<16x32xf32>
      %c0_11 = arith.constant 0 : index
      %c0_12 = arith.constant 0 : index
      %13 = vector.load %arg8[%c0_11, %c0_12] : memref<16x32xf32, #tpu.memory_space<vmem>>, vector<16x32xf32>
      tpu.vector_store %arg8[%c0_11, %c0_12], %12 {strides = array<i32>} : memref<16x32xf32, #tpu.memory_space<vmem>>, vector<16x32xf32>,
    } else {
    }
    %c0 = arith.constant 0 : index
    %c0_1 = arith.constant 0 : index
    %3 = vector.load %arg8[%c0, %c0_1] : memref<16x32xf32, #tpu.memory_space<vmem>>, vector<16x32xf32>
    %c0_2 = arith.constant 0 : index
    %c0_3 = arith.constant 0 : index
    %4 = vector.load %arg3[%c0_2, %c0_3] : memref<16x32xbf16, #tpu.memory_space<vmem>>, vector<16x32xbf16>
    %c0_4 = arith.constant 0 : index
    %c0_5 = arith.constant 0 : index
    %5 = vector.load %arg4[%c0_4, %c0_5] : memref<32x32xbf16, #tpu.memory_space<vmem>>, vector<32x32xbf16>
    %cst = arith.constant dense<0.000000e+00> : vector<16x32xf32>
    %6 = tpu.matmul %4, %5, %cst {dimension_numbers = #tpu.dot_dimension_numbers<[1], [0], [0], [1], [0, 0, 1, 1], [], []>} : vector<16x32xbf16>, vector<32x32xbf16>, vector<16x32xf32> -> vector<16x32xf32>
    %7 = arith.addf %3, %6 : vector<16x32xf32>
    %c0_6 = arith.constant 0 : index
    %c0_7 = arith.constant 0 : index
    %8 = vector.load %arg8[%c0_6, %c0_7] : memref<16x32xf32, #tpu.memory_space<vmem>>, vector<16x32xf32>
    tpu.vector_store %arg8[%c0_6, %c0_7], %7 {strides = array<i32>} : memref<16x32xf32, #tpu.memory_space<vmem>>, vector<16x32xf32>,
    %c0_i32_8 = arith.constant 0 : i32
    %9 = arith.cmpi eq, %arg2, %c0_i32_8 : i32
    %10 = arith.extui %9 : i1 to i32
    %c0_i32_9 = arith.constant 0 : i32
    %11 = arith.cmpi ne, %10, %c0_i32_9 : i32
    scf.if %11 {
      %c0_10 = arith.constant 0 : index
      %c0_11 = arith.constant 0 : index
      %12 = vector.load %arg8[%c0_10, %c0_11] : memref<16x32xf32, #tpu.memory_space<vmem>>, vector<16x32xf32>
      %c0_12 = arith.constant 0 : index
      %c0_13 = arith.constant 0 : index
      %13 = vector.load %arg5[%c0_12, %c0_13] : memref<1x32xf32, #tpu.memory_space<vmem>>, vector<1x32xf32>
      %14 = vector.broadcast %13 : vector<1x32xf32> to vector<16x32xf32>
      %15 = arith.addf %12, %14 : vector<16x32xf32>
      %c0_14 = arith.constant 0 : index
      %c0_15 = arith.constant 0 : index
      %16 = vector.load %arg6[%c0_14, %c0_15] : memref<16x32xf32, #tpu.memory_space<vmem>>, vector<16x32xf32>
      %17 = arith.addf %15, %16 : vector<16x32xf32>
      %c0_16 = arith.constant 0 : index
      %c0_17 = arith.constant 0 : index
      %18 = vector.load %arg7[%c0_16, %c0_17] : memref<16x32xf32, #tpu.memory_space<vmem>>, vector<16x32xf32>
      tpu.vector_store %arg7[%c0_16, %c0_17], %17 {strides = array<i32>} : memref<16x32xf32, #tpu.memory_space<vmem>>, vector<16x32xf32>,
    } else {
    }
    return
  }
  func.func @transform_0(%arg0: i32, %arg1: i32, %arg2: i32) -> (i32, i32) {
    %c0_i32 = arith.constant 0 : i32
    return %arg0, %arg2 : i32, i32
  }
  func.func @transform_1(%arg0: i32, %arg1: i32, %arg2: i32) -> (i32, i32) {
    %c0_i32 = arith.constant 0 : i32
    return %arg2, %arg1 : i32, i32
  }
  func.func @transform_2(%arg0: i32, %arg1: i32, %arg2: i32) -> (i32, i32) {
    %c0_i32 = arith.constant 0 : i32
    %c0_i32_0 = arith.constant 0 : i32
    return %c0_i32, %arg1 : i32, i32
  }
  func.func @transform_3(%arg0: i32, %arg1: i32, %arg2: i32) -> (i32, i32) {
    %c0_i32 = arith.constant 0 : i32
    return %arg0, %arg1 : i32, i32
  }
  func.func @transform_4(%arg0: i32, %arg1: i32, %arg2: i32) -> (i32, i32) {
    %c0_i32 = arith.constant 0 : i32
    return %arg0, %arg1 : i32, i32
  }
}

module attributes {stable_mosaic.version = 11 : i64} {
  func.func @_ln_linear_kernel(%arg0: i32, %arg1: i32, %arg2: memref<16x32xf32, #tpu.memory_space<vmem>>, %arg3: memref<1x32xf32, #tpu.memory_space<vmem>>, %arg4: memref<1x32xf32, #tpu.memory_space<vmem>>, %arg5: memref<32x64xbf16, #tpu.memory_space<vmem>>, %arg6: memref<1x64xf32, #tpu.memory_space<vmem>>, %arg7: memref<16x64xbf16, #tpu.memory_space<vmem>>, %arg8: memref<16x32xbf16, #tpu.memory_space<vmem>>) attributes {dimension_semantics = [#tpu.dimension_semantics<parallel>, #tpu.dimension_semantics<arbitrary>], iteration_bounds = array<i64: 1, 1>, scalar_prefetch = 0 : i64, scratch_operands = 1 : i64, tpu.core_type = #tpu.core_type<tc>, window_params = [{transform_indices = @transform_0, window_bounds = array<i64: 16, 32>}, {pipeline_mode = #tpu.pipeline_mode<synchronous>, transform_indices = @transform_1, window_bounds = array<i64: 1, 32>}, {pipeline_mode = #tpu.pipeline_mode<synchronous>, transform_indices = @transform_2, window_bounds = array<i64: 1, 32>}, {transform_indices = @transform_3, window_bounds = array<i64: 32, 64>}, {transform_indices = @transform_4, window_bounds = array<i64: 1, 64>}, {transform_indices = @transform_5, window_bounds = array<i64: 16, 64>}]} {
    %c0_i32 = arith.constant 0 : i32
    %0 = arith.cmpi eq, %arg1, %c0_i32 : i32
    %1 = arith.extui %0 : i1 to i32
    %c0_i32_0 = arith.constant 0 : i32
    %2 = arith.cmpi ne, %1, %c0_i32_0 : i32
    scf.if %2 {
      %c0_12 = arith.constant 0 : index
      %c0_13 = arith.constant 0 : index
      %24 = vector.load %arg2[%c0_12, %c0_13] : memref<16x32xf32, #tpu.memory_space<vmem>>, vector<16x32xf32>
      %cst_14 = arith.constant dense<0.000000e+00> : vector<16xf32>
      %25 = vector.multi_reduction <add>, %24, %cst_14 [1] : vector<16x32xf32> to vector<16xf32>
      %26 = vector.shape_cast %25 : vector<16xf32> to vector<16x1xf32>
      %cst_15 = arith.constant 3.200000e+01 : f32
      %27 = vector.broadcast %cst_15 : f32 to vector<16x1xf32>
      %28 = arith.divf %26, %27 : vector<16x1xf32>
      %29 = vector.broadcast %28 : vector<16x1xf32> to vector<16x32xf32>
      %30 = arith.subf %24, %29 : vector<16x32xf32>
      %31 = arith.mulf %30, %30 : vector<16x32xf32>
      %cst_16 = arith.constant dense<0.000000e+00> : vector<16xf32>
      %32 = vector.multi_reduction <add>, %31, %cst_16 [1] : vector<16x32xf32> to vector<16xf32>
      %33 = vector.shape_cast %32 : vector<16xf32> to vector<16x1xf32>
      %cst_17 = arith.constant 3.200000e+01 : f32
      %34 = vector.broadcast %cst_17 : f32 to vector<16x1xf32>
      %35 = arith.divf %33, %34 : vector<16x1xf32>
      %cst_18 = arith.constant 9.99999974E-6 : f32
      %36 = vector.broadcast %cst_18 : f32 to vector<16x1xf32>
      %37 = arith.addf %35, %36 : vector<16x1xf32>
      %38 = math.rsqrt %37 : vector<16x1xf32>
      %39 = vector.broadcast %38 : vector<16x1xf32> to vector<16x32xf32>
      %40 = arith.mulf %30, %39 : vector<16x32xf32>
      %c0_19 = arith.constant 0 : index
      %c0_20 = arith.constant 0 : index
      %41 = vector.load %arg3[%c0_19, %c0_20] : memref<1x32xf32, #tpu.memory_space<vmem>>, vector<1x32xf32>
      %42 = vector.broadcast %41 : vector<1x32xf32> to vector<16x32xf32>
      %43 = arith.mulf %40, %42 : vector<16x32xf32>
      %c0_21 = arith.constant 0 : index
      %c0_22 = arith.constant 0 : index
      %44 = vector.load %arg4[%c0_21, %c0_22] : memref<1x32xf32, #tpu.memory_space<vmem>>, vector<1x32xf32>
      %45 = vector.broadcast %44 : vector<1x32xf32> to vector<16x32xf32>
      %46 = arith.addf %43, %45 : vector<16x32xf32>
      %47 = arith.truncf %46 : vector<16x32xf32> to vector<16x32xbf16>
      %c0_23 = arith.constant 0 : index
      %c0_24 = arith.constant 0 : index
      %48 = vector.load %arg8[%c0_23, %c0_24] : memref<16x32xbf16, #tpu.memory_space<vmem>>, vector<16x32xbf16>
      tpu.vector_store %arg8[%c0_23, %c0_24], %47 {strides = array<i32>} : memref<16x32xbf16, #tpu.memory_space<vmem>>, vector<16x32xbf16>,
    } else {
    }
    %c0 = arith.constant 0 : index
    %c0_1 = arith.constant 0 : index
    %3 = vector.load %arg8[%c0, %c0_1] : memref<16x32xbf16, #tpu.memory_space<vmem>>, vector<16x32xbf16>
    %c0_2 = arith.constant 0 : index
    %c0_3 = arith.constant 0 : index
    %4 = vector.load %arg5[%c0_2, %c0_3] : memref<32x64xbf16, #tpu.memory_space<vmem>>, vector<32x64xbf16>
    %cst = arith.constant dense<0.000000e+00> : vector<16x64xf32>
    %5 = tpu.matmul %3, %4, %cst {dimension_numbers = #tpu.dot_dimension_numbers<[1], [0], [0], [1], [0, 0, 1, 1], [], []>} : vector<16x32xbf16>, vector<32x64xbf16>, vector<16x64xf32> -> vector<16x64xf32>
    %c0_4 = arith.constant 0 : index
    %c0_5 = arith.constant 0 : index
    %6 = vector.load %arg6[%c0_4, %c0_5] : memref<1x64xf32, #tpu.memory_space<vmem>>, vector<1x64xf32>
    %7 = vector.broadcast %6 : vector<1x64xf32> to vector<16x64xf32>
    %8 = arith.addf %5, %7 : vector<16x64xf32>
    %cst_6 = arith.constant 5.000000e-01 : f32
    %9 = vector.broadcast %cst_6 : f32 to vector<16x64xf32>
    %10 = arith.mulf %9, %8 : vector<16x64xf32>
    %cst_7 = arith.constant 4.471500e-02 : f32
    %11 = vector.broadcast %cst_7 : f32 to vector<16x64xf32>
    %12 = arith.mulf %11, %8 : vector<16x64xf32>
    %13 = arith.mulf %12, %8 : vector<16x64xf32>
    %14 = arith.mulf %13, %8 : vector<16x64xf32>
    %15 = arith.addf %8, %14 : vector<16x64xf32>
    %cst_8 = arith.constant 0.797884583 : f32
    %16 = vector.broadcast %cst_8 : f32 to vector<16x64xf32>
    %17 = arith.mulf %16, %15 : vector<16x64xf32>
    %18 = math.tanh %17 : vector<16x64xf32>
    %cst_9 = arith.constant 1.000000e+00 : f32
    %19 = vector.broadcast %cst_9 : f32 to vector<16x64xf32>
    %20 = arith.addf %19, %18 : vector<16x64xf32>
    %21 = arith.mulf %10, %20 : vector<16x64xf32>
    %22 = arith.truncf %21 : vector<16x64xf32> to vector<16x64xbf16>
    %c0_10 = arith.constant 0 : index
    %c0_11 = arith.constant 0 : index
    %23 = vector.load %arg7[%c0_10, %c0_11] : memref<16x64xbf16, #tpu.memory_space<vmem>>, vector<16x64xbf16>
    tpu.vector_store %arg7[%c0_10, %c0_11], %22 {strides = array<i32>} : memref<16x64xbf16, #tpu.memory_space<vmem>>, vector<16x64xbf16>,
    return
  }
  func.func @transform_0(%arg0: i32, %arg1: i32) -> (i32, i32) {
    %c0_i32 = arith.constant 0 : i32
    %c0_i32_0 = arith.constant 0 : i32
    return %arg0, %c0_i32 : i32, i32
  }
  func.func @transform_1(%arg0: i32, %arg1: i32) -> (i32, i32) {
    %c0_i32 = arith.constant 0 : i32
    %c0_i32_0 = arith.constant 0 : i32
    %c0_i32_1 = arith.constant 0 : i32
    return %c0_i32, %c0_i32_0 : i32, i32
  }
  func.func @transform_2(%arg0: i32, %arg1: i32) -> (i32, i32) {
    %c0_i32 = arith.constant 0 : i32
    %c0_i32_0 = arith.constant 0 : i32
    %c0_i32_1 = arith.constant 0 : i32
    return %c0_i32, %c0_i32_0 : i32, i32
  }
  func.func @transform_3(%arg0: i32, %arg1: i32) -> (i32, i32) {
    %c0_i32 = arith.constant 0 : i32
    %c0_i32_0 = arith.constant 0 : i32
    return %c0_i32, %arg1 : i32, i32
  }
  func.func @transform_4(%arg0: i32, %arg1: i32) -> (i32, i32) {
    %c0_i32 = arith.constant 0 : i32
    %c0_i32_0 = arith.constant 0 : i32
    return %c0_i32, %arg1 : i32, i32
  }
  func.func @transform_5(%arg0: i32, %arg1: i32) -> (i32, i32) {
    %c0_i32 = arith.constant 0 : i32
    return %arg0, %arg1 : i32, i32
  }
}

module attributes {stable_mosaic.version = 11 : i64} {
  func.func @_linear_kernel(%arg0: i32, %arg1: i32, %arg2: i32, %arg3: memref<16x64xbf16, #tpu.memory_space<vmem>>, %arg4: memref<64x32xbf16, #tpu.memory_space<vmem>>, %arg5: memref<1x32xf32, #tpu.memory_space<vmem>>, %arg6: memref<16x32xf32, #tpu.memory_space<vmem>>, %arg7: memref<16x32xf32, #tpu.memory_space<vmem>>, %arg8: memref<16x32xf32, #tpu.memory_space<vmem>>) attributes {dimension_semantics = [#tpu.dimension_semantics<parallel>, #tpu.dimension_semantics<parallel>, #tpu.dimension_semantics<arbitrary>], iteration_bounds = array<i64: 1, 1, 1>, scalar_prefetch = 0 : i64, scratch_operands = 1 : i64, tpu.core_type = #tpu.core_type<tc>, window_params = [{transform_indices = @transform_0, window_bounds = array<i64: 16, 64>}, {transform_indices = @transform_1, window_bounds = array<i64: 64, 32>}, {transform_indices = @transform_2, window_bounds = array<i64: 1, 32>}, {transform_indices = @transform_3, window_bounds = array<i64: 16, 32>}, {transform_indices = @transform_4, window_bounds = array<i64: 16, 32>}]} {
    %c0_i32 = arith.constant 0 : i32
    %0 = arith.cmpi eq, %arg2, %c0_i32 : i32
    %1 = arith.extui %0 : i1 to i32
    %c0_i32_0 = arith.constant 0 : i32
    %2 = arith.cmpi ne, %1, %c0_i32_0 : i32
    scf.if %2 {
      %cst_10 = arith.constant 0.000000e+00 : f32
      %12 = vector.broadcast %cst_10 : f32 to vector<16x32xf32>
      %c0_11 = arith.constant 0 : index
      %c0_12 = arith.constant 0 : index
      %13 = vector.load %arg8[%c0_11, %c0_12] : memref<16x32xf32, #tpu.memory_space<vmem>>, vector<16x32xf32>
      tpu.vector_store %arg8[%c0_11, %c0_12], %12 {strides = array<i32>} : memref<16x32xf32, #tpu.memory_space<vmem>>, vector<16x32xf32>,
    } else {
    }
    %c0 = arith.constant 0 : index
    %c0_1 = arith.constant 0 : index
    %3 = vector.load %arg8[%c0, %c0_1] : memref<16x32xf32, #tpu.memory_space<vmem>>, vector<16x32xf32>
    %c0_2 = arith.constant 0 : index
    %c0_3 = arith.constant 0 : index
    %4 = vector.load %arg3[%c0_2, %c0_3] : memref<16x64xbf16, #tpu.memory_space<vmem>>, vector<16x64xbf16>
    %c0_4 = arith.constant 0 : index
    %c0_5 = arith.constant 0 : index
    %5 = vector.load %arg4[%c0_4, %c0_5] : memref<64x32xbf16, #tpu.memory_space<vmem>>, vector<64x32xbf16>
    %cst = arith.constant dense<0.000000e+00> : vector<16x32xf32>
    %6 = tpu.matmul %4, %5, %cst {dimension_numbers = #tpu.dot_dimension_numbers<[1], [0], [0], [1], [0, 0, 1, 1], [], []>} : vector<16x64xbf16>, vector<64x32xbf16>, vector<16x32xf32> -> vector<16x32xf32>
    %7 = arith.addf %3, %6 : vector<16x32xf32>
    %c0_6 = arith.constant 0 : index
    %c0_7 = arith.constant 0 : index
    %8 = vector.load %arg8[%c0_6, %c0_7] : memref<16x32xf32, #tpu.memory_space<vmem>>, vector<16x32xf32>
    tpu.vector_store %arg8[%c0_6, %c0_7], %7 {strides = array<i32>} : memref<16x32xf32, #tpu.memory_space<vmem>>, vector<16x32xf32>,
    %c0_i32_8 = arith.constant 0 : i32
    %9 = arith.cmpi eq, %arg2, %c0_i32_8 : i32
    %10 = arith.extui %9 : i1 to i32
    %c0_i32_9 = arith.constant 0 : i32
    %11 = arith.cmpi ne, %10, %c0_i32_9 : i32
    scf.if %11 {
      %c0_10 = arith.constant 0 : index
      %c0_11 = arith.constant 0 : index
      %12 = vector.load %arg8[%c0_10, %c0_11] : memref<16x32xf32, #tpu.memory_space<vmem>>, vector<16x32xf32>
      %c0_12 = arith.constant 0 : index
      %c0_13 = arith.constant 0 : index
      %13 = vector.load %arg5[%c0_12, %c0_13] : memref<1x32xf32, #tpu.memory_space<vmem>>, vector<1x32xf32>
      %14 = vector.broadcast %13 : vector<1x32xf32> to vector<16x32xf32>
      %15 = arith.addf %12, %14 : vector<16x32xf32>
      %c0_14 = arith.constant 0 : index
      %c0_15 = arith.constant 0 : index
      %16 = vector.load %arg6[%c0_14, %c0_15] : memref<16x32xf32, #tpu.memory_space<vmem>>, vector<16x32xf32>
      %17 = arith.addf %15, %16 : vector<16x32xf32>
      %c0_16 = arith.constant 0 : index
      %c0_17 = arith.constant 0 : index
      %18 = vector.load %arg7[%c0_16, %c0_17] : memref<16x32xf32, #tpu.memory_space<vmem>>, vector<16x32xf32>
      tpu.vector_store %arg7[%c0_16, %c0_17], %17 {strides = array<i32>} : memref<16x32xf32, #tpu.memory_space<vmem>>, vector<16x32xf32>,
    } else {
    }
    return
  }
  func.func @transform_0(%arg0: i32, %arg1: i32, %arg2: i32) -> (i32, i32) {
    %c0_i32 = arith.constant 0 : i32
    return %arg0, %arg2 : i32, i32
  }
  func.func @transform_1(%arg0: i32, %arg1: i32, %arg2: i32) -> (i32, i32) {
    %c0_i32 = arith.constant 0 : i32
    return %arg2, %arg1 : i32, i32
  }
  func.func @transform_2(%arg0: i32, %arg1: i32, %arg2: i32) -> (i32, i32) {
    %c0_i32 = arith.constant 0 : i32
    %c0_i32_0 = arith.constant 0 : i32
    return %c0_i32, %arg1 : i32, i32
  }
  func.func @transform_3(%arg0: i32, %arg1: i32, %arg2: i32) -> (i32, i32) {
    %c0_i32 = arith.constant 0 : i32
    return %arg0, %arg1 : i32, i32
  }
  func.func @transform_4(%arg0: i32, %arg1: i32, %arg2: i32) -> (i32, i32) {
    %c0_i32 = arith.constant 0 : i32
    return %arg0, %arg1 : i32, i32
  }
}

module attributes {stable_mosaic.version = 11 : i64} {
  func.func @_ln_linear_kernel(%arg0: i32, %arg1: i32, %arg2: memref<2x32xf32, #tpu.memory_space<vmem>>, %arg3: memref<1x32xf32, #tpu.memory_space<vmem>>, %arg4: memref<1x32xf32, #tpu.memory_space<vmem>>, %arg5: memref<32x32xbf16, #tpu.memory_space<vmem>>, %arg6: memref<1x32xf32, #tpu.memory_space<vmem>>, %arg7: memref<2x32xf32, #tpu.memory_space<vmem>>, %arg8: memref<2x32xbf16, #tpu.memory_space<vmem>>) attributes {dimension_semantics = [#tpu.dimension_semantics<parallel>, #tpu.dimension_semantics<arbitrary>], iteration_bounds = array<i64: 1, 1>, scalar_prefetch = 0 : i64, scratch_operands = 1 : i64, tpu.core_type = #tpu.core_type<tc>, window_params = [{transform_indices = @transform_0, window_bounds = array<i64: 2, 32>}, {pipeline_mode = #tpu.pipeline_mode<synchronous>, transform_indices = @transform_1, window_bounds = array<i64: 1, 32>}, {pipeline_mode = #tpu.pipeline_mode<synchronous>, transform_indices = @transform_2, window_bounds = array<i64: 1, 32>}, {transform_indices = @transform_3, window_bounds = array<i64: 32, 32>}, {transform_indices = @transform_4, window_bounds = array<i64: 1, 32>}, {transform_indices = @transform_5, window_bounds = array<i64: 2, 32>}]} {
    %c0_i32 = arith.constant 0 : i32
    %0 = arith.cmpi eq, %arg1, %c0_i32 : i32
    %1 = arith.extui %0 : i1 to i32
    %c0_i32_0 = arith.constant 0 : i32
    %2 = arith.cmpi ne, %1, %c0_i32_0 : i32
    scf.if %2 {
      %c0_8 = arith.constant 0 : index
      %c0_9 = arith.constant 0 : index
      %10 = vector.load %arg2[%c0_8, %c0_9] : memref<2x32xf32, #tpu.memory_space<vmem>>, vector<2x32xf32>
      %cst_10 = arith.constant dense<0.000000e+00> : vector<2xf32>
      %11 = vector.multi_reduction <add>, %10, %cst_10 [1] : vector<2x32xf32> to vector<2xf32>
      %12 = vector.shape_cast %11 : vector<2xf32> to vector<2x1xf32>
      %cst_11 = arith.constant 3.200000e+01 : f32
      %13 = vector.broadcast %cst_11 : f32 to vector<2x1xf32>
      %14 = arith.divf %12, %13 : vector<2x1xf32>
      %15 = vector.broadcast %14 : vector<2x1xf32> to vector<2x32xf32>
      %16 = arith.subf %10, %15 : vector<2x32xf32>
      %17 = arith.mulf %16, %16 : vector<2x32xf32>
      %cst_12 = arith.constant dense<0.000000e+00> : vector<2xf32>
      %18 = vector.multi_reduction <add>, %17, %cst_12 [1] : vector<2x32xf32> to vector<2xf32>
      %19 = vector.shape_cast %18 : vector<2xf32> to vector<2x1xf32>
      %cst_13 = arith.constant 3.200000e+01 : f32
      %20 = vector.broadcast %cst_13 : f32 to vector<2x1xf32>
      %21 = arith.divf %19, %20 : vector<2x1xf32>
      %cst_14 = arith.constant 9.99999974E-6 : f32
      %22 = vector.broadcast %cst_14 : f32 to vector<2x1xf32>
      %23 = arith.addf %21, %22 : vector<2x1xf32>
      %24 = math.rsqrt %23 : vector<2x1xf32>
      %25 = vector.broadcast %24 : vector<2x1xf32> to vector<2x32xf32>
      %26 = arith.mulf %16, %25 : vector<2x32xf32>
      %c0_15 = arith.constant 0 : index
      %c0_16 = arith.constant 0 : index
      %27 = vector.load %arg3[%c0_15, %c0_16] : memref<1x32xf32, #tpu.memory_space<vmem>>, vector<1x32xf32>
      %28 = vector.broadcast %27 : vector<1x32xf32> to vector<2x32xf32>
      %29 = arith.mulf %26, %28 : vector<2x32xf32>
      %c0_17 = arith.constant 0 : index
      %c0_18 = arith.constant 0 : index
      %30 = vector.load %arg4[%c0_17, %c0_18] : memref<1x32xf32, #tpu.memory_space<vmem>>, vector<1x32xf32>
      %31 = vector.broadcast %30 : vector<1x32xf32> to vector<2x32xf32>
      %32 = arith.addf %29, %31 : vector<2x32xf32>
      %33 = arith.truncf %32 : vector<2x32xf32> to vector<2x32xbf16>
      %c0_19 = arith.constant 0 : index
      %c0_20 = arith.constant 0 : index
      %34 = vector.load %arg8[%c0_19, %c0_20] : memref<2x32xbf16, #tpu.memory_space<vmem>>, vector<2x32xbf16>
      tpu.vector_store %arg8[%c0_19, %c0_20], %33 {strides = array<i32>} : memref<2x32xbf16, #tpu.memory_space<vmem>>, vector<2x32xbf16>,
    } else {
    }
    %c0 = arith.constant 0 : index
    %c0_1 = arith.constant 0 : index
    %3 = vector.load %arg8[%c0, %c0_1] : memref<2x32xbf16, #tpu.memory_space<vmem>>, vector<2x32xbf16>
    %c0_2 = arith.constant 0 : index
    %c0_3 = arith.constant 0 : index
    %4 = vector.load %arg5[%c0_2, %c0_3] : memref<32x32xbf16, #tpu.memory_space<vmem>>, vector<32x32xbf16>
    %cst = arith.constant dense<0.000000e+00> : vector<2x32xf32>
    %5 = tpu.matmul %3, %4, %cst {dimension_numbers = #tpu.dot_dimension_numbers<[1], [0], [0], [1], [0, 0, 1, 1], [], []>} : vector<2x32xbf16>, vector<32x32xbf16>, vector<2x32xf32> -> vector<2x32xf32>
    %c0_4 = arith.constant 0 : index
    %c0_5 = arith.constant 0 : index
    %6 = vector.load %arg6[%c0_4, %c0_5] : memref<1x32xf32, #tpu.memory_space<vmem>>, vector<1x32xf32>
    %7 = vector.broadcast %6 : vector<1x32xf32> to vector<2x32xf32>
    %8 = arith.addf %5, %7 : vector<2x32xf32>
    %c0_6 = arith.constant 0 : index
    %c0_7 = arith.constant 0 : index
    %9 = vector.load %arg7[%c0_6, %c0_7] : memref<2x32xf32, #tpu.memory_space<vmem>>, vector<2x32xf32>
    tpu.vector_store %arg7[%c0_6, %c0_7], %8 {strides = array<i32>} : memref<2x32xf32, #tpu.memory_space<vmem>>, vector<2x32xf32>,
    return
  }
  func.func @transform_0(%arg0: i32, %arg1: i32) -> (i32, i32) {
    %c0_i32 = arith.constant 0 : i32
    %c0_i32_0 = arith.constant 0 : i32
    return %arg0, %c0_i32 : i32, i32
  }
  func.func @transform_1(%arg0: i32, %arg1: i32) -> (i32, i32) {
    %c0_i32 = arith.constant 0 : i32
    %c0_i32_0 = arith.constant 0 : i32
    %c0_i32_1 = arith.constant 0 : i32
    return %c0_i32, %c0_i32_0 : i32, i32
  }
  func.func @transform_2(%arg0: i32, %arg1: i32) -> (i32, i32) {
    %c0_i32 = arith.constant 0 : i32
    %c0_i32_0 = arith.constant 0 : i32
    %c0_i32_1 = arith.constant 0 : i32
    return %c0_i32, %c0_i32_0 : i32, i32
  }
  func.func @transform_3(%arg0: i32, %arg1: i32) -> (i32, i32) {
    %c0_i32 = arith.constant 0 : i32
    %c0_i32_0 = arith.constant 0 : i32
    return %c0_i32, %arg1 : i32, i32
  }
  func.func @transform_4(%arg0: i32, %arg1: i32) -> (i32, i32) {
    %c0_i32 = arith.constant 0 : i32
    %c0_i32_0 = arith.constant 0 : i32
    return %c0_i32, %arg1 : i32, i32
  }
  func.func @transform_5(%arg0: i32, %arg1: i32) -> (i32, i32) {
    %c0_i32 = arith.constant 0 : i32
    return %arg0, %arg1 : i32, i32
  }
}

module attributes {stable_mosaic.version = 11 : i64} {
  func.func @_logits_kernel(%arg0: i32, %arg1: i32, %arg2: memref<2x32xf32, #tpu.memory_space<vmem>>, %arg3: memref<2x32xf32, #tpu.memory_space<vmem>>, %arg4: memref<1x1xf32, #tpu.memory_space<vmem>>, %arg5: memref<2x2xf32, #tpu.memory_space<vmem>>) attributes {dimension_semantics = [#tpu.dimension_semantics<parallel>, #tpu.dimension_semantics<parallel>], iteration_bounds = array<i64: 1, 1>, scalar_prefetch = 0 : i64, scratch_operands = 0 : i64, tpu.core_type = #tpu.core_type<tc>, window_params = [{transform_indices = @transform_0, window_bounds = array<i64: 2, 32>}, {transform_indices = @transform_1, window_bounds = array<i64: 2, 32>}, {pipeline_mode = #tpu.pipeline_mode<synchronous>, transform_indices = @transform_2, window_bounds = array<i64: 1, 1>}, {transform_indices = @transform_3, window_bounds = array<i64: 2, 2>}]} {
    %c0 = arith.constant 0 : index
    %c0_0 = arith.constant 0 : index
    %0 = vector.load %arg4[%c0, %c0_0] : memref<1x1xf32, #tpu.memory_space<vmem>>, vector<1x1xf32>
    %1 = vector.extract %0[0, 0] : f32 from vector<1x1xf32>
    %2 = math.exp %1 : f32
    %c0_1 = arith.constant 0 : index
    %c0_2 = arith.constant 0 : index
    %3 = vector.load %arg2[%c0_1, %c0_2] : memref<2x32xf32, #tpu.memory_space<vmem>>, vector<2x32xf32>
    %c0_3 = arith.constant 0 : index
    %c0_4 = arith.constant 0 : index
    %4 = vector.load %arg3[%c0_3, %c0_4] : memref<2x32xf32, #tpu.memory_space<vmem>>, vector<2x32xf32>
    %cst = arith.constant dense<0.000000e+00> : vector<2x2xf32>
    %5 = tpu.matmul %3, %4, %cst {dimension_numbers = #tpu.dot_dimension_numbers<[1], [1], [0], [0], [0, 0, 1, 0], [], []>} : vector<2x32xf32>, vector<2x32xf32>, vector<2x2xf32> -> vector<2x2xf32>
    %6 = vector.broadcast %2 : f32 to vector<2x2xf32>
    %7 = arith.mulf %6, %5 : vector<2x2xf32>
    %c0_5 = arith.constant 0 : index
    %c0_6 = arith.constant 0 : index
    %8 = vector.load %arg5[%c0_5, %c0_6] : memref<2x2xf32, #tpu.memory_space<vmem>>, vector<2x2xf32>
    tpu.vector_store %arg5[%c0_5, %c0_6], %7 {strides = array<i32>} : memref<2x2xf32, #tpu.memory_space<vmem>>, vector<2x2xf32>,
    return
  }
  func.func @transform_0(%arg0: i32, %arg1: i32) -> (i32, i32) {
    %c0_i32 = arith.constant 0 : i32
    %c0_i32_0 = arith.constant 0 : i32
    return %arg0, %c0_i32 : i32, i32
  }
  func.func @transform_1(%arg0: i32, %arg1: i32) -> (i32, i32) {
    %c0_i32 = arith.constant 0 : i32
    %c0_i32_0 = arith.constant 0 : i32
    return %arg1, %c0_i32 : i32, i32
  }
  func.func @transform_2(%arg0: i32, %arg1: i32) -> (i32, i32) {
    %c0_i32 = arith.constant 0 : i32
    %c0_i32_0 = arith.constant 0 : i32
    %c0_i32_1 = arith.constant 0 : i32
    return %c0_i32, %c0_i32_0 : i32, i32
  }
  func.func @transform_3(%arg0: i32, %arg1: i32) -> (i32, i32) {
    %c0_i32 = arith.constant 0 : i32
    return %arg0, %arg1 : i32, i32
  }
}

</mosaic_0001>

<bundles_post_ra>
// kernel: _lambda_.26
= control target key start
LH: loop header
LB: loop body
LE: loop exit
PB: predicated region body
PF: predicated region fallthrough
CT: control target
= control target key end

     0   :  { %vm19_vm0 = vcmask 261120   ;;  %v174_v1 = vmov 0.0   ;;  %vm58_vm1 = vcmask 392192   ;;  %s243_s1 = inlined_call_operand.vmem [shape: bf16[48,32], index: 1, kind: input, shape index: {}]   ;;  %s244_s0 = inlined_call_operand.vmem [shape: f32[32,48], index: 0, kind: input, shape index: {}]   ;;  %s245_s2 = inlined_call_operand.vmem [shape: f32[1,32], index: 2, kind: input, shape index: {}]   ;;  %s246_s3 = inlined_call_operand.vmem [shape: f32[32,32], index: 3, kind: output, shape index: {}]  }
   0x1   :  { %v171_v0 = vld [vmem:[%s243_s1] sm:$0xff]   ;;  %22 = vst.msk [vmem:[#allocation2 + $0x10] sm:$0xff] %vm19_vm0, %v174_v1  ;;  %20 = vst.msk [vmem:[#allocation2] sm:$0xff] %vm19_vm0, %v174_v1  ;;  %v172_v2 = vld [vmem:[%s243_s1 + $0x8] sm:$0xff]  }
   0x2   :  { %21 = vst.msk [vmem:[#allocation2 + $0x8] sm:$0xff] %vm19_vm0, %v174_v1  ;;  %23 = vst.msk [vmem:[#allocation2 + $0x18] sm:$0xff] %vm19_vm0, %v174_v1  ;;  %160 = vmatprep.subr.bf16.mxu0 %v171_v0  ;;  %v28_v3 = vld [vmem:[%s244_s0] sm:$0xff]  ;;  %v29_v4 = vld [vmem:[%s244_s0 + $0x8] sm:$0xff] }
   0x3   :  { %161 = vmatpush3.bf16.msra.mxu0 %v171_v0  ;;  %v173_v5 = vld [vmem:[%s243_s1 + $0x10] sm:$0xff]   ;;  %v32_v6 = vpack.c.bf16 %v29_v4, %v28_v3  ;;  %v31_v8 = vld [vmem:[%s244_s0 + $0x18] sm:$0xff]  ;;  %v154_v22 = vld [vmem:[%s245_s2] ss:$0 sm:$0xff] }
   0x4   :  { %162 = vmatprep.subr.bf16.mxu0 %v172_v2  ;;  %v30_v7 = vld [vmem:[%s244_s0 + $0x10] sm:$0xff] }
   0x5   :  { %166 = vmatprep.mubr.msk.bf16.mxu0 %vm58_vm1, %v32_v6  ;;  %v33_v9 = vpack.c.bf16 %v31_v8, %v30_v7 }
   0x7   :  { %163 = vmatpush3.bf16.msra.mxu0 %v172_v2 }
   0x8   :  { %164 = vmatprep.subr.bf16.mxu0 %v173_v5  ;;  %v26_v10 = vld [vmem:[#allocation2 + $0x10] sm:$0xff]  ;;  %v24_v11 = vld [vmem:[#allocation2] sm:$0xff] }
   0x9   :  { %v27_v13 = vld [vmem:[#allocation2 + $0x18] sm:$0xff]  ;;  %v25_v16 = vld [vmem:[#allocation2 + $0x8] sm:$0xff] }
   0xb   :  { %165 = vmatpush3.bf16.msra.mxu0 %v173_v5 }
   0xe   :  { %167 = vmatmul.mubr.msk.bf16.vlgmr.msra.gmra.mrb[0].mxu0 %vm58_vm1, %v33_v9 }
  0xe1   :  { %v168_v12 = vpop.f32.mrb[0].mxu0 }
  0xe2   :  { %v116_v14 = vadd.f32 %v168_v12, %v26_v10  ;;  %v99_v15 = vpop.f32.mrb[1].mxu0 }
  0xe3   :  { %v114_v17 = vadd.f32 %v99_v15, %v24_v11  ;;  %v169_v18 = vpop.f32.mrb[2].mxu0 }
  0xe4   :  { %121 = vst.msk [vmem:[#allocation2 + $0x10] sm:$0xff] %vm19_vm0, %v116_v14  ;;  %v117_v19 = vadd.f32 %v169_v18, %v27_v13  ;;  %v102_v20 = vpop.f32.mrb[3].mxu0 }
  0xe5   :  { %119 = vst.msk [vmem:[#allocation2] sm:$0xff] %vm19_vm0, %v114_v17  ;;  %v115_v21 = vadd.f32 %v102_v20, %v25_v16 }
  0xe6   :  { %122 = vst.msk [vmem:[#allocation2 + $0x18] sm:$0xff] %vm19_vm0, %v117_v19 }
  0xe7   :  { %120 = vst.msk [vmem:[#allocation2 + $0x8] sm:$0xff] %vm19_vm0, %v115_v21 }
  0xeb   :  { %v128_v23 = vld [vmem:[#allocation2 + $0x10] sm:$0xff] }
  0xec   :  { %v139_v24 = vadd.f32 %v154_v22, %v128_v23  ;;  %v126_v25 = vld [vmem:[#allocation2] sm:$0xff] }
  0xed   :  { %v137_v26 = vadd.f32 %v154_v22, %v126_v25  ;;  %v129_v27 = vld [vmem:[#allocation2 + $0x18] sm:$0xff] }
  0xee   :  { %143 = vst.msk [vmem:[%s246_s3 + $0x10] sm:$0xff] %vm19_vm0, %v139_v24  ;;  %v140_v28 = vadd.f32 %v154_v22, %v129_v27  ;;  %v127_v29 = vld [vmem:[#allocation2 + $0x8] sm:$0xff] }
  0xef   :  { %141 = vst.msk [vmem:[%s246_s3] sm:$0xff] %vm19_vm0, %v137_v26  ;;  %v138_v30 = vadd.f32 %v154_v22, %v127_v29 }
  0xf0   :  { %144 = vst.msk [vmem:[%s246_s3 + $0x18] sm:$0xff] %vm19_vm0, %v140_v28 }
  0xf1   :  { %142 = vst.msk [vmem:[%s246_s3 + $0x8] sm:$0xff] %vm19_vm0, %v138_v30 }

// kernel: _lambda_.28
= control target key start
LH: loop header
LB: loop body
LE: loop exit
PB: predicated region body
PF: predicated region fallthrough
CT: control target
= control target key end

     0   :  { %s708_s6 = smov 0   ;;  %s792_s0 = inlined_call_operand.vmem [shape: bf16[2,17,96], index: 0, kind: input, shape index: {}]   ;;  %s793_s1 = inlined_call_operand.vmem [shape: bf16[2,17,32], index: 1, kind: output, shape index: {}]  }
   0x1 LB: > { %s559_s7 = sadd.s32 4294967295, %s689_s6   ;;  %p563_p0 = scmp.ge.s32.totalorder %s689_s6, 1  ;;  %s689_s6 = sphi %s708_s6, %s11_s6  }
   0x2   : > { %p87_p1 = scmp.lt.s32.totalorder %s689_s6, 3 }
   0x4   : > { %p88_p2 = pnand %p563_p0, %p87_p1 }
   0x5   : > { %p107_p3 = scmp.lt.s32.totalorder (!%p88_p2), %s559_s7, 1  ;;  %vm133_vm0 = vcmask (!%p88_p2), 130048   ;;  %s691_s12 = smov (!%p88_p2), 96   ;;  %vm204_vm1 = vcmask (!%p88_p2), 131072   ;;  %vm197_vm2 = vcmask (!%p88_p2), 138240   ;;  %vm245_vm3 = vcmask (!%p88_p2), 1040384  }
   0x6   : > { %91 = sbr.rel (%p88_p2) target bundleno = 1582 (0x62e), region = 24  ;;  %s692_s13 = smov (!%p88_p2), 64   ;;  %v695_v35 = vmov (!%p88_p2), 0   ;;  %vm498_vm4 = vcmask (!%p88_p2), 253952   ;;  %vm499_vm5 = vsmask.f32 (!%p88_p2), 256 }
   0x7   : > { %s693_s14 = smov (!%p88_p2), 80   ;;  %s694_s15 = smov (!%p88_p2), 112   ;;  %v750_v36 = vsel (!%p88_p2), %vm245_vm3, 65535, %v695_v35  ;;  %vm495_vm6 = vcmask (!%p88_p2), 257024   ;;  %vm500_vm7 = vmand (!%p88_p2), %vm498_vm4, %vm499_vm5 }
   0x8   : > { %s696_s16 = smov (!%p88_p2), 48   ;;  %s697_s17 = smov (!%p88_p2), 16  }
   0xd   : > { %s795_s7 = smov (!%p107_p3, %s559_s7), 1 }
   0xe   : > { %s636_s8 = smul.u32 12, %s795_s7 }
  0x10   : > { %s111_s11 = scalar_lea.vmem %s792_s0, %s636_s8  ;;  %s116_s20 = scalar_lea.vmem %s793_s1, %s636_s8 }
  0x11   : > { %v724_v0 = vld [vmem:[%s111_s11] sm:$0xff]   ;;  %v727_v1 = vld [vmem:[%s111_s11 + $0x8] ss:$0 sps:$4 sm:$0x11]  }
  0x12   : > { %129 = vrot.lane.b32.xlu0 %v724_v0, %s691_s12  ;;  %604 = vmatprep.mubr.msk.bf16.mxu0 %vm133_vm0, %v724_v0 }
  0x16   : > { %131 = vrot.lane.b32.xlu0 %v727_v1, %s691_s12 }
  0x84   : > { %v130_v2 = vpop.permute.xlu0 %129 }
  0x85   : > { %632 = vmatprep.subr.msk.bf16.mxu0 %vm133_vm0, %v130_v2  ;;  %v141_v3 = vsel %vm133_vm0, %v130_v2, 0 }
  0x86   : > { %601 = vmatpush3.bf16.xpose.msra.mxu0 %v141_v3 }
  0x88   : > { %v132_v4 = vpop.permute.xlu0 %131 }
  0x89   : > { %633 = vmatprep.subr.msk.bf16.mxu0 %vm133_vm0, %v132_v4  ;;  %v144_v5 = vsel %vm133_vm0, %v132_v4, 0 }
  0x8e   : > { %603 = vmatpush3.bf16.xpose.msra.mxu0 %v144_v5 }
  0x95   : > { %605 = vmatmul.mubr.msk.bf16.vlgmr.msra.gmra.mrb[0].mxu0 %vm133_vm0, %v727_v1 }
 0x168   : > { %v606_v6 = vpop.f32.mrb[0].mxu0 }
 0x169   : > { %v196_v7 = vmul.f32 0.25, %v606_v6  ;;  %v180_v8 = vpop.f32.mrb[1].mxu0 }
 0x16a   : > { %v194_v9 = vmul.f32 0.25, %v180_v8  ;;  %v607_v10 = vpop.f32.mrb[2].mxu0 }
 0x16b   : > { %v183_v11 = vpop.f32.mrb[3].mxu0  ;;  %v205_v12 = vsel %vm204_vm1, %v196_v7, -inf }
 0x16c   : > { %v195_v13 = vmul.f32 0.25, %v183_v11  ;;  %206 = vmax.xlane.f32.xlu0 %v205_v12  ;;  %v198_v14 = vsel %vm197_vm2, %v194_v9, -inf }
 0x16d   : > { %199 = vmax.xlane.f32.xlu1 %v198_v14 }
 0x16e   : > { %v201_v15 = vsel %vm197_vm2, %v195_v13, -inf }
 0x171   : > { %202 = vmax.xlane.f32.xlu1 %v201_v15 }
 0x182   : > { %234 = vrot.lane.b32.xlu1 %v724_v0, %s692_s13  ;;  %303 = vrot.lane.b32.xlu0 %v724_v0, %s693_s14 }
 0x1f9   : > { %v207_v16 = vpop.xlane.xlu0 %206 }
 0x1fa   : > { %v210_v17 = vsub.f32 %v196_v7, %v207_v16  ;;  %v200_v18 = vpop.xlane.xlu1 %199 }
 0x1fb   : > { %v208_v19 = vsub.f32 %v194_v9, %v200_v18 }
 0x1fc   : > { %v215_v20 = vmul.f32 1.442695, %v210_v17 }
 0x1fd   : > { %v211_v21 = vmul.f32 1.442695, %v208_v19  ;;  %v304_v39 = vpop.permute.xlu0 %303 }
 0x1fe   : > { %659 = vpow2.f32 %v215_v20  ;;  %v203_v22 = vpop.xlane.xlu1 %202  ;;  %v314_v48 = vsel %vm133_vm0, %v304_v39, 0 }
 0x1ff   : > { %v209_v23 = vsub.f32 %v195_v13, %v203_v22  ;;  %661 = vpow2.f32 %v211_v21 }
 0x201   : > { %v213_v24 = vmul.f32 1.442695, %v209_v23 }
 0x202   : > { %v235_v25 = vpop.permute.xlu1 %234 }
 0x203   : > { %608 = vmatprep.subr.bf16.mxu1 %v235_v25  ;;  %663 = vpow2.f32 %v213_v24 }
 0x204   : > { %609 = vmatpush3.bf16.msra.mxu1 %v235_v25 }
 0x208   : > { %v660_v26 = vpop.eup %659 }
 0x209   : > { %v223_v27 = vsel %vm204_vm1, %v660_v26, 0.0  ;;  %v662_v28 = vpop.eup %661 }
 0x20a   : > { %224 = vadd.xlane.f32.xlu1 %v223_v27  ;;  %v217_v29 = vsel %vm197_vm2, %v662_v28, 0.0 }
 0x20d   : > { %v664_v30 = vpop.eup %663 }
 0x20e   : > { %218 = vadd.xlane.f32.xlu1 %v217_v29  ;;  %v220_v31 = vsel %vm197_vm2, %v664_v30, 0.0 }
 0x212   : > { %221 = vadd.xlane.f32.xlu1 %v220_v31 }
 0x223   : > { %236 = vrot.lane.b32.xlu1 %v727_v1, %s692_s13 }
 0x227   : > { %305 = vrot.lane.b32.xlu1 %v727_v1, %s693_s14 }
 0x22b   : > { %299 = vrot.lane.b32.xlu1 %v724_v0, %s694_s15 }
 0x22f   : > { %301 = vrot.lane.b32.xlu1 %v727_v1, %s694_s15 }
 0x297   : > { %v225_v32 = vpop.xlane.xlu1 %224 }
 0x298   : > { %665 = vrcp.f32 %v225_v32 }
 0x29b   : > { %v219_v33 = vpop.xlane.xlu1 %218 }
 0x29c   : > { %667 = vrcp.f32 %v219_v33 }
 0x29f   : > { %v222_v34 = vpop.xlane.xlu1 %221 }
 0x2a0   : > { %669 = vrcp.f32 %v222_v34 }
 0x2a2   : > { %v666_v40 = vpop.eup %665 }
 0x2a3   : > { %v237_v37 = vpop.permute.xlu1 %236  ;;  %v231_v44 = vmul.f32 %v666_v40, %v660_v26 }
 0x2a4   : > { %v249_v38 = vand.u32 %v750_v36, %v237_v37 }
 0x2a5   : > { %v233_v49 = vpack.c.bf16 %v231_v44, %v231_v44 }
 0x2a6   : > { %610 = vmatprep.subr.bf16.mxu1 %v249_v38  ;;  %v668_v41 = vpop.eup %667 }
 0x2a7   : > { %611 = vmatpush3.bf16.msra.mxu1 %v249_v38  ;;  %v306_v42 = vpop.permute.xlu1 %305  ;;  %v229_v45 = vmul.f32 %v668_v41, %v662_v28 }
 0x2a8   : > { %634 = vmatprep.subr.msk.bf16.mxu1 %vm133_vm0, %v304_v39  ;;  %v317_v51 = vsel %vm133_vm0, %v306_v42, 0 }
 0x2aa   : > { %v670_v43 = vpop.eup %669 }
 0x2ab   : > { %v230_v46 = vmul.f32 %v670_v43, %v664_v30  ;;  %v300_v50 = vpop.permute.xlu1 %299 }
 0x2ad   : > { %v232_v47 = vpack.c.bf16 %v230_v46, %v229_v45 }
 0x2af   : > { %612 = vmatprep.mubr.msk.bf16.mxu1 %vm197_vm2, %v232_v47  ;;  %v302_v52 = vpop.permute.xlu1 %301 }
 0x2b0   : > { %613 = vmatmul.mubr.msk.bf16.vlgmr.msra.gmra.mrb[0].mxu1 %vm197_vm2, %v233_v49 }
 0x2b1   : > { %617 = vmatpush3.bf16.xpose.msra.mxu1 %v314_v48  ;;  %620 = vmatprep.mubr.msk.bf16.mxu1 %vm133_vm0, %v300_v50 }
 0x2b2   : > { %635 = vmatprep.subr.msk.bf16.mxu1 %vm133_vm0, %v306_v42  ;;  %v501_v42 = vld [vmem:[%s116_s20 + $0x8] sm:$0x1] }
 0x2b9   : > { %619 = vmatpush3.bf16.xpose.msra.mxu1 %v317_v51 }
 0x2c0   : > { %621 = vmatmul.mubr.msk.bf16.vlgmr.msra.gmra.mrb[4].mxu1 %vm133_vm0, %v302_v52 }
 0x383   : > { %v761_v53 = vpop.f32.mrb[0].mxu1 }
 0x384   : > { %v763_v54 = vpop.f32.mrb[1].mxu1 }
 0x385   : > { %v615_v55 = vpop.f32.mrb[2].mxu1 }
 0x386   : > { %v765_v56 = vpop.f32.mrb[3].mxu1 }
 0x393   : > { %v622_v57 = vpop.f32.mrb[4].mxu1 }
 0x394   : > { %v353_v58 = vpop.f32.mrb[5].mxu1  ;;  %v369_v62 = vmul.f32 0.25, %v622_v57 }
 0x395   : > { %v367_v59 = vmul.f32 0.25, %v353_v58  ;;  %v623_v60 = vpop.f32.mrb[6].mxu1 }
 0x396   : > { %v356_v61 = vpop.f32.mrb[7].mxu1  ;;  %v376_v4 = vsel %vm204_vm1, %v369_v62, -inf }
 0x397   : > { %v368_v63 = vmul.f32 0.25, %v356_v61  ;;  %v370_v2 = vsel %vm197_vm2, %v367_v59, -inf }
 0x398   : > { %371 = vmax.xlane.f32.xlu1 %v370_v2 }
 0x399   : > { %v373_v3 = vsel %vm197_vm2, %v368_v63, -inf }
 0x39a   : > { %374 = vmax.xlane.f32.xlu0 %v373_v3 }
 0x39c   : > { %377 = vmax.xlane.f32.xlu1 %v376_v4 }
 0x425   : > { %v372_v5 = vpop.xlane.xlu1 %371 }
 0x426   : > { %v379_v7 = vsub.f32 %v367_v59, %v372_v5 }
 0x427   : > { %v375_v6 = vpop.xlane.xlu0 %374 }
 0x428   : > { %v380_v8 = vsub.f32 %v368_v63, %v375_v6  ;;  %v382_v12 = vmul.f32 1.442695, %v379_v7 }
 0x429   : > { %v378_v9 = vpop.xlane.xlu1 %377 }
 0x42a   : > { %v384_v10 = vmul.f32 1.442695, %v380_v8  ;;  %v381_v11 = vsub.f32 %v369_v62, %v378_v9 }
 0x42c   : > { %671 = vpow2.f32 %v384_v10  ;;  %v386_v13 = vmul.f32 1.442695, %v381_v11 }
 0x42e   : > { %673 = vpow2.f32 %v386_v13 }
 0x42f   : > { %675 = vpow2.f32 %v382_v12 }
 0x436   : > { %v672_v14 = vpop.eup %671 }
 0x437   : > { %v391_v15 = vsel %vm197_vm2, %v672_v14, 0.0 }
 0x438   : > { %v674_v16 = vpop.eup %673  ;;  %392 = vadd.xlane.f32.xlu1 %v391_v15 }
 0x439   : > { %v394_v17 = vsel %vm204_vm1, %v674_v16, 0.0  ;;  %v676_v18 = vpop.eup %675 }
 0x43a   : > { %395 = vadd.xlane.f32.xlu0 %v394_v17  ;;  %v388_v19 = vsel %vm197_vm2, %v676_v18, 0.0 }
 0x43e   : > { %389 = vadd.xlane.f32.xlu0 %v388_v19 }
 0x449   : > { %405 = vrot.lane.b32.xlu1 %v724_v0, %s696_s16 }
 0x454   : > { %407 = vrot.lane.b32.xlu0 %v727_v1, %s696_s16 }
 0x4c5   : > { %v393_v20 = vpop.xlane.xlu1 %392 }
 0x4c7   : > { %v396_v21 = vpop.xlane.xlu0 %395 }
 0x4c8   : > { %677 = vrcp.f32 %v396_v21 }
 0x4c9   : > { %v406_v22 = vpop.permute.xlu1 %405  ;;  %679 = vrcp.f32 %v393_v20 }
 0x4ca   : > { %624 = vmatprep.subr.bf16.mxu0 %v406_v22 }
 0x4cb   : > { %v390_v23 = vpop.xlane.xlu0 %389  ;;  %625 = vmatpush3.bf16.msra.mxu0 %v406_v22 }
 0x4cc   : > { %681 = vrcp.f32 %v390_v23 }
 0x4cf   : > { %v408_v24 = vpop.permute.xlu0 %407 }
 0x4d0   : > { %v417_v25 = vand.u32 %v408_v24, %v750_v36 }
 0x4d2   : > { %626 = vmatprep.subr.bf16.mxu0 %v417_v25  ;;  %v678_v26 = vpop.eup %677 }
 0x4d3   : > { %627 = vmatpush3.bf16.msra.mxu0 %v417_v25  ;;  %v680_v27 = vpop.eup %679  ;;  %v402_v0 = vmul.f32 %v678_v26, %v674_v16 }
 0x4d4   : > { %v401_v29 = vmul.f32 %v680_v27, %v672_v14 }
 0x4d5   : > { %v404_v31 = vpack.c.bf16 %v402_v0, %v402_v0 }
 0x4d6   : > { %v682_v28 = vpop.eup %681 }
 0x4d7   : > { %v400_v1 = vmul.f32 %v682_v28, %v676_v18 }
 0x4d9   : > { %v403_v30 = vpack.c.bf16 %v401_v29, %v400_v1 }
 0x4db   : > { %628 = vmatprep.mubr.msk.bf16.mxu0 %vm197_vm2, %v403_v30 }
 0x4dc   : > { %629 = vmatmul.mubr.msk.bf16.vlgmr.msra.gmra.mrb[4].mxu0 %vm197_vm2, %v404_v31 }
 0x5af   : > { %v630_v32 = vpop.f32.mrb[4].mxu0 }
 0x5b0   : > { %v453_v33 = vpop.f32.mrb[5].mxu0 }
 0x5b1   : > { %v652_v34 = vpack.i.bf16 %v453_v33, %v630_v32  ;;  %v631_v35 = vpop.f32.mrb[6].mxu0 }
 0x5b2   : > { %v456_v36 = vpop.f32.mrb[7].mxu0 }
 0x5b3   : > { %653 = vrot.lane.b32.xlu1 %v652_v34, %s697_s17 }
 0x5b7   : > { %472 = vrot.lane.b32.xlu1 %v456_v36, %s697_s17 }
 0x625   : > { %v654_v37 = vpop.permute.xlu1 %653 }
 0x626   : > { %v656_v38 = vunpack.i.h.bf16 %v654_v37  ;;  %v655_v39 = vunpack.i.l.bf16 %v654_v37 }
 0x628   : > { %v479_v40 = vsel %vm133_vm0, %v763_v54, %v656_v38  ;;  %v481_v41 = vsel %vm133_vm0, %v761_v53, %v655_v39 }
 0x629   : > { %v581_v43 = vpack.c.bf16 %v479_v40, %v479_v40  ;;  %v583_v44 = vpack.c.bf16 %v481_v41, %v481_v41  ;;  %v473_v45 = vpop.permute.xlu1 %472 }
 0x62a   : > { %v480_v46 = vsel %vm133_vm0, %v765_v56, %v473_v45 }
 0x62b   : > { %496 = vst.msk [vmem:[%s116_s20] sm:$0xf] %vm495_vm6, %v581_v43  ;;  %v502_v47 = vsel %vm500_vm7, %v583_v44, %v501_v42  ;;  %v582_v48 = vpack.c.bf16 %v480_v46, %v480_v46 }
 0x62c   : > { %503 = vst [vmem:[%s116_s20 + $0x8] sm:$0x1] %v502_v47 }
 0x62d   : > { %497 = vst.msk [vmem:[%s116_s20 + $0x4] sm:$0xf] %vm495_vm6, %v582_v48 }
 0x62e PF: > { %s11_s6 = sadd.s32 1, %s689_s6  }
 0x62f   : > { %p8_p4 = scmp.ge.s32.totalorder %s11_s6, 4  }
 0x631   :  { %10 = sbr.rel (!%p8_p4) target bundleno = 1 (0x1), region = 54 }

// kernel: _lambda_.27
= control target key start
LH: loop header
LB: loop body
LE: loop exit
PB: predicated region body
PF: predicated region fallthrough
CT: control target
= control target key end

     0   :  { %vm30_vm0 = vcmask 261120   ;;  %v359_v36 = vmov 0.0   ;;  %vm360_vm1 = vmmov 0   ;;  %vm142_vm2 = vcmask 257024   ;;  %s494_s0 = inlined_call_operand.vmem [shape: f32[40,32], index: 0, kind: input, shape index: {}]   ;;  %s495_s3 = inlined_call_operand.vmem [shape: bf16[32,96], index: 3, kind: input, shape index: {}]   ;;  %s496_s1 = inlined_call_operand.vmem [shape: f32[1,32], index: 1, kind: input, shape index: {}]   ;;  %s497_s2 = inlined_call_operand.vmem [shape: f32[1,32], index: 2, kind: input, shape index: {}]   ;;  %s498_s4 = inlined_call_operand.vmem [shape: f32[1,96], index: 4, kind: input, shape index: {}]   ;;  %s499_s5 = inlined_call_operand.vmem [shape: bf16[40,96], index: 5, kind: output, shape index: {}]  }
   0x1   :  { %v27_v0 = vld [vmem:[%s494_s0 + $0x10] sm:$0xff]  ;;  %v28_v1 = vld [vmem:[%s494_s0 + $0x18] sm:$0xff]  ;;  %v25_v2 = vld [vmem:[%s494_s0] sm:$0xff]  ;;  %338 = vmatprep.subr.bf16.mxu1 %v359_v36  ;;  %322 = vmatprep.subr.bf16.mxu0 %v359_v36  ;;  %vm276_vm3 = vcmask 781312  }
   0x2   :  { %v37_v3 = vsel %vm30_vm0, %v27_v0, 0.0  ;;  %v31_v4 = vsel %vm30_vm0, %v25_v2, 0.0  ;;  %v26_v5 = vld [vmem:[%s494_s0 + $0x8] sm:$0xff]  ;;  %v40_v6 = vsel %vm30_vm0, %v28_v1, 0.0  ;;  %v29_v8 = vld [vmem:[%s494_s0 + $0x20] sm:$0xff]  ;;  %330 = vmatprep.mubr.msk.bf16.mxu1 %vm360_vm1, %v359_v36  ;;  %326 = vmatprep.mubr.msk.bf16.mxu0 %vm360_vm1, %v359_v36 }
   0x3   :  { %38 = vadd.xlane.f32.xlu0 %v37_v3  ;;  %32 = vadd.xlane.f32.xlu1 %v31_v4  ;;  %v34_v7 = vsel %vm30_vm0, %v26_v5, 0.0  ;;  %v43_v9 = vsel %vm30_vm0, %v29_v8, 0.0  ;;  %v344_v35 = vld [vmem:[%s495_s3] sm:$0xff]   ;;  %v345_v37 = vld [vmem:[%s495_s3 + $0x8] sm:$0xff]  }
   0x4   :  { %340 = vmatpush3.bf16.msra.mxu1 %v344_v35  ;;  %323 = vmatpush3.bf16.msra.mxu0 %v344_v35  ;;  %v286_v54 = vld [vmem:[%s496_s1] ss:$0 sm:$0xff] }
   0x5   :  { %339 = vmatprep.subr.bf16.mxu1 %v359_v36  ;;  %324 = vmatprep.subr.bf16.mxu0 %v359_v36  ;;  %v287_v56 = vld [vmem:[%s497_s2] ss:$0 sm:$0xff] }
   0x7   :  { %41 = vadd.xlane.f32.xlu0 %v40_v6  ;;  %35 = vadd.xlane.f32.xlu1 %v34_v7 }
   0x8   :  { %341 = vmatpush3.bf16.msra.mxu1 %v345_v37  ;;  %325 = vmatpush3.bf16.msra.mxu0 %v345_v37 }
   0xb   :  { %44 = vadd.xlane.f32.xlu0 %v43_v9 }
  0x90   :  { %v39_v10 = vpop.xlane.xlu0 %38  ;;  %v33_v11 = vpop.xlane.xlu1 %32 }
  0x91   :  { %v49_v12 = vmul.f32 0.03125, %v39_v10  ;;  %v47_v13 = vmul.f32 0.03125, %v33_v11 }
  0x93   :  { %v411_v14 = vsub.f32 %v27_v0, %v49_v12  ;;  %v413_v15 = vsub.f32 %v25_v2, %v47_v13 }
  0x94   :  { %v42_v16 = vpop.xlane.xlu0 %41  ;;  %v36_v17 = vpop.xlane.xlu1 %35 }
  0x95   :  { %v50_v18 = vmul.f32 0.03125, %v42_v16  ;;  %v59_v19 = vmul.f32 %v411_v14, %v411_v14  ;;  %v48_v20 = vmul.f32 0.03125, %v36_v17  ;;  %v57_v21 = vmul.f32 %v413_v15, %v413_v15 }
  0x97   :  { %v419_v22 = vsub.f32 %v28_v1, %v50_v18  ;;  %v68_v23 = vsel %vm30_vm0, %v59_v19, 0.0  ;;  %v422_v24 = vsub.f32 %v26_v5, %v48_v20  ;;  %v62_v28 = vsel %vm30_vm0, %v57_v21, 0.0  ;;  %v293_v19 = vld [vmem:[%s498_s4] ss:$0 sm:$0xff] }
  0x98   :  { %v45_v25 = vpop.xlane.xlu0 %44  ;;  %69 = vadd.xlane.f32.xlu1 %v68_v23 }
  0x99   :  { %v51_v26 = vmul.f32 0.03125, %v45_v25  ;;  %v60_v27 = vmul.f32 %v419_v22, %v419_v22  ;;  %v58_v29 = vmul.f32 %v422_v24, %v422_v24 }
  0x9b   :  { %v429_v30 = vsub.f32 %v29_v8, %v51_v26  ;;  %v71_v31 = vsel %vm30_vm0, %v60_v27, 0.0  ;;  %v65_v33 = vsel %vm30_vm0, %v58_v29, 0.0 }
  0x9c   :  { %72 = vadd.xlane.f32.xlu0 %v71_v31  ;;  %63 = vadd.xlane.f32.xlu1 %v62_v28 }
  0x9d   :  { %v61_v32 = vmul.f32 %v429_v30, %v429_v30 }
  0x9f   :  { %v74_v34 = vsel %vm30_vm0, %v61_v32, 0.0 }
  0xa0   :  { %75 = vadd.xlane.f32.xlu1 %v74_v34  ;;  %66 = vadd.xlane.f32.xlu0 %v65_v33 }
 0x125   :  { %v70_v38 = vpop.xlane.xlu1 %69 }
 0x126   :  { %v79_v39 = vmul.f32 0.03125, %v70_v38 }
 0x128   :  { %v84_v40 = vadd.f32 1e-05, %v79_v39 }
 0x129   :  { %v73_v41 = vpop.xlane.xlu0 %72  ;;  %v64_v42 = vpop.xlane.xlu1 %63 }
 0x12a   :  { %349 = vrsqrt.f32 %v84_v40  ;;  %v80_v43 = vmul.f32 0.03125, %v73_v41  ;;  %v77_v44 = vmul.f32 0.03125, %v64_v42 }
 0x12c   :  { %v85_v45 = vadd.f32 1e-05, %v80_v43  ;;  %v82_v46 = vadd.f32 1e-05, %v77_v44 }
 0x12d   :  { %v67_v47 = vpop.xlane.xlu0 %66  ;;  %v76_v48 = vpop.xlane.xlu1 %75 }
 0x12e   :  { %351 = vrsqrt.f32 %v85_v45  ;;  %v78_v49 = vmul.f32 0.03125, %v67_v47  ;;  %v81_v50 = vmul.f32 0.03125, %v76_v48 }
 0x12f   :  { %353 = vrsqrt.f32 %v82_v46 }
 0x130   :  { %v83_v51 = vadd.f32 1e-05, %v78_v49  ;;  %v86_v52 = vadd.f32 1e-05, %v81_v50 }
 0x132   :  { %355 = vrsqrt.f32 %v83_v51 }
 0x133   :  { %357 = vrsqrt.f32 %v86_v52 }
 0x134   :  { %v350_v53 = vpop.eup %349 }
 0x135   :  { %v94_v55 = vmul.f32 %v350_v53, %v411_v14 }
 0x137   :  { %v106_v57 = vmul.f32 %v286_v54, %v94_v55 }
 0x138   :  { %v352_v58 = vpop.eup %351 }
 0x139   :  { %v354_v59 = vpop.eup %353  ;;  %v118_v60 = vadd.f32 %v287_v56, %v106_v57  ;;  %v95_v61 = vmul.f32 %v352_v58, %v419_v22 }
 0x13a   :  { %v92_v62 = vmul.f32 %v354_v59, %v413_v15 }
 0x13b   :  { %v309_v63 = vpack.c.bf16 %v118_v60, %v118_v60  ;;  %v107_v0 = vmul.f32 %v286_v54, %v95_v61 }
 0x13c   :  { %v356_v1 = vpop.eup %355  ;;  %v104_v2 = vmul.f32 %v286_v54, %v92_v62 }
 0x13d   :  { %v358_v3 = vpop.eup %357  ;;  %145 = vst.msk [vmem:[#allocation2 + $0x8] sm:$0xf] %vm142_vm2, %v309_v63  ;;  %v119_v4 = vadd.f32 %v287_v56, %v107_v0  ;;  %v93_v5 = vmul.f32 %v356_v1, %v422_v24 }
 0x13e   :  { %v116_v6 = vadd.f32 %v287_v56, %v104_v2  ;;  %v96_v7 = vmul.f32 %v358_v3, %v429_v30 }
 0x13f   :  { %v310_v8 = vpack.c.bf16 %v119_v4, %v119_v4  ;;  %v105_v9 = vmul.f32 %v286_v54, %v93_v5 }
 0x140   :  { %v307_v10 = vpack.c.bf16 %v116_v6, %v116_v6  ;;  %v108_v11 = vmul.f32 %v286_v54, %v96_v7 }
 0x141   :  { %146 = vst.msk [vmem:[#allocation2 + $0xc] sm:$0xf] %vm142_vm2, %v310_v8  ;;  %v117_v12 = vadd.f32 %v287_v56, %v105_v9 }
 0x142   :  { %143 = vst.msk [vmem:[#allocation2] sm:$0xf] %vm142_vm2, %v307_v10  ;;  %v120_v13 = vadd.f32 %v287_v56, %v108_v11 }
 0x143   :  { %v308_v14 = vpack.c.bf16 %v117_v12, %v117_v12 }
 0x144   :  { %v311_v15 = vpack.c.bf16 %v120_v13, %v120_v13 }
 0x145   :  { %144 = vst.msk [vmem:[#allocation2 + $0x4] sm:$0xf] %vm142_vm2, %v308_v14 }
 0x146   :  { %147 = vst.msk [vmem:[#allocation2 + $0x10] sm:$0xf] %vm142_vm2, %v311_v15 }
 0x148   :  { %v346_v16 = vld [vmem:[#allocation2 + $0x8] sm:$0xff]  }
 0x149   :  { %331 = vmatmul.mubr.msk.bf16.vlgmr.msra.gmra.mrb[0].mxu1 %vm30_vm0, %v346_v16 }
 0x14a   :  { %334 = vmatprep.mubr.msk.bf16.mxu1 %vm360_vm1, %v359_v36 }
 0x14c   :  { %v347_v17 = vld [vmem:[#allocation2] sm:$0xff]  }
 0x14d   :  { %327 = vmatmul.mubr.msk.bf16.vlgmr.msra.gmra.mrb[0].mxu0 %vm30_vm0, %v347_v17  ;;  %v348_v18 = vld [vmem:[#allocation2 + $0x10] ss:$0 sps:$4 sm:$0xff]  }
 0x151   :  { %335 = vmatmul.mubr.msk.bf16.gmra.mrb[4].mxu1 %vm30_vm0, %v348_v18 }
 0x21c   :  { %v241_v20 = vpop.f32.mrb[0].mxu1 }
 0x21d   :  { %v242_v21 = vadd.f32 %v293_v19, %v241_v20  ;;  %v332_v22 = vpop.f32.mrb[1].mxu1 }
 0x21e   :  { %v244_v23 = vpop.f32.mrb[2].mxu1 }
 0x21f   :  { %v314_v24 = vpack.c.bf16 %v242_v21, %v242_v21  ;;  %v245_v25 = vadd.f32 %v293_v19, %v244_v23  ;;  %v333_v26 = vpop.f32.mrb[3].mxu1 }
 0x220   :  { %v233_v27 = vpop.f32.mrb[0].mxu0 }
 0x221   :  { %279 = vst.msk [vmem:[%s499_s5 + $0x8] sm:$0xf] %vm276_vm3, %v314_v24  ;;  %v315_v28 = vpack.c.bf16 %v245_v25, %v245_v25  ;;  %v234_v29 = vadd.f32 %v293_v19, %v233_v27  ;;  %v328_v30 = vpop.f32.mrb[1].mxu0 }
 0x222   :  { %v236_v31 = vpop.f32.mrb[2].mxu0 }
 0x223   :  { %280 = vst.msk [vmem:[%s499_s5 + $0xc] sm:$0xf] %vm276_vm3, %v315_v28  ;;  %v312_v32 = vpack.c.bf16 %v234_v29, %v234_v29  ;;  %v237_v33 = vadd.f32 %v293_v19, %v236_v31  ;;  %v329_v34 = vpop.f32.mrb[3].mxu0 }
 0x224   :  { %v249_v35 = vpop.f32.mrb[4].mxu1 }
 0x225   :  { %277 = vst.msk [vmem:[%s499_s5] sm:$0xf] %vm276_vm3, %v312_v32  ;;  %v313_v36 = vpack.c.bf16 %v237_v33, %v237_v33  ;;  %v250_v37 = vadd.f32 %v293_v19, %v249_v35  ;;  %v336_v38 = vpop.f32.mrb[5].mxu1 }
 0x226   :  { %v252_v39 = vpop.f32.mrb[6].mxu1 }
 0x227   :  { %278 = vst.msk [vmem:[%s499_s5 + $0x4] sm:$0xf] %vm276_vm3, %v313_v36  ;;  %v316_v40 = vpack.c.bf16 %v250_v37, %v250_v37  ;;  %v337_v41 = vpop.f32.mrb[7].mxu1 }
 0x229   :  { %281 = vst.msk [vmem:[%s499_s5 + $0x10] sm:$0xf] %vm276_vm3, %v316_v40 }

// kernel: _lambda_.29
= control target key start
LH: loop header
LB: loop body
LE: loop exit
PB: predicated region body
PF: predicated region fallthrough
CT: control target
= control target key end

     0   :  { %vm22_vm0 = vcmask 261120   ;;  %v223_v0 = vmov 0.0   ;;  %vm224_vm1 = vmmov 0   ;;  %s316_s1 = inlined_call_operand.vmem [shape: bf16[32,32], index: 1, kind: input, shape index: {}]   ;;  %s317_s0 = inlined_call_operand.vmem [shape: bf16[40,32], index: 0, kind: input, shape index: {}]   ;;  %s318_s2 = inlined_call_operand.vmem [shape: f32[1,32], index: 2, kind: input, shape index: {}]   ;;  %s319_s3 = inlined_call_operand.vmem [shape: f32[40,32], index: 3, kind: input, shape index: {}]   ;;  %s320_s4 = inlined_call_operand.vmem [shape: f32[40,32], index: 4, kind: output, shape index: {}]  }
   0x1   :  { %212 = vmatprep.subr.bf16.mxu1 %v223_v0  ;;  %v218_v1 = vld [vmem:[%s316_s1] sm:$0xff]   ;;  %196 = vmatprep.subr.bf16.mxu0 %v223_v0  ;;  %23 = vst.msk [vmem:[#allocation2] sm:$0xff] %vm22_vm0, %v223_v0  ;;  %24 = vst.msk [vmem:[#allocation2 + $0x8] sm:$0xff] %vm22_vm0, %v223_v0  ;;  %v219_v2 = vld [vmem:[%s316_s1 + $0x8] sm:$0xff]  }
   0x2   :  { %25 = vst.msk [vmem:[#allocation2 + $0x10] sm:$0xff] %vm22_vm0, %v223_v0  ;;  %26 = vst.msk [vmem:[#allocation2 + $0x18] sm:$0xff] %vm22_vm0, %v223_v0  ;;  %204 = vmatprep.mubr.msk.bf16.mxu1 %vm224_vm1, %v223_v0  ;;  %200 = vmatprep.mubr.msk.bf16.mxu0 %vm224_vm1, %v223_v0  ;;  %v220_v3 = vld [vmem:[%s317_s0 + $0x8] sm:$0xff]   ;;  %v221_v4 = vld [vmem:[%s317_s0] sm:$0xff]  }
   0x3   :  { %27 = vst.msk [vmem:[#allocation2 + $0x20] sm:$0xff] %vm22_vm0, %v223_v0  ;;  %214 = vmatpush3.bf16.msra.mxu1 %v218_v1  ;;  %197 = vmatpush3.bf16.msra.mxu0 %v218_v1  ;;  %v222_v5 = vld [vmem:[%s317_s0 + $0x10] ss:$0 sps:$4 sm:$0xff]   ;;  %v190_v23 = vld [vmem:[%s318_s2] ss:$0 sm:$0xff]  ;;  %v166_v33 = vld [vmem:[%s319_s3 + $0x18] sm:$0xff] }
   0x4   :  { %213 = vmatprep.subr.bf16.mxu1 %v223_v0  ;;  %198 = vmatprep.subr.bf16.mxu0 %v223_v0  ;;  %v165_v25 = vld [vmem:[%s319_s3 + $0x10] sm:$0xff]  ;;  %v163_v30 = vld [vmem:[%s319_s3] sm:$0xff]  ;;  %v164_v38 = vld [vmem:[%s319_s3 + $0x8] sm:$0xff] }
   0x5   :  { %v167_v46 = vld [vmem:[%s319_s3 + $0x20] sm:$0xff] }
   0x7   :  { %215 = vmatpush3.bf16.msra.mxu1 %v219_v2  ;;  %199 = vmatpush3.bf16.msra.mxu0 %v219_v2 }
   0x8   :  { %v28_v7 = vld [vmem:[#allocation2] sm:$0xff]  ;;  %v29_v11 = vld [vmem:[#allocation2 + $0x8] sm:$0xff] }
   0x9   :  { %v30_v6 = vld [vmem:[#allocation2 + $0x10] sm:$0xff]  ;;  %v31_v9 = vld [vmem:[#allocation2 + $0x18] sm:$0xff] }
   0xa   :  { %205 = vmatmul.mubr.msk.bf16.vlgmr.msra.gmra.mrb[0].mxu1 %vm22_vm0, %v220_v3  ;;  %201 = vmatmul.mubr.msk.bf16.vlgmr.msra.gmra.mrb[0].mxu0 %vm22_vm0, %v221_v4  ;;  %v32_v22 = vld [vmem:[#allocation2 + $0x20] sm:$0xff] }
   0xb   :  { %208 = vmatprep.mubr.msk.bf16.mxu1 %vm224_vm1, %v223_v0 }
  0x12   :  { %209 = vmatmul.mubr.msk.bf16.gmra.mrb[4].mxu1 %vm22_vm0, %v222_v5 }
  0xdd   :  { %v119_v8 = vpop.f32.mrb[0].mxu1  ;;  %v111_v10 = vpop.f32.mrb[0].mxu0 }
  0xde   :  { %v135_v12 = vadd.f32 %v119_v8, %v30_v6  ;;  %v206_v13 = vpop.f32.mrb[1].mxu1  ;;  %v133_v14 = vadd.f32 %v111_v10, %v28_v7  ;;  %v202_v15 = vpop.f32.mrb[1].mxu0 }
  0xdf   :  { %v122_v16 = vpop.f32.mrb[2].mxu1  ;;  %v114_v17 = vpop.f32.mrb[2].mxu0 }
  0xe0   :  { %140 = vst.msk [vmem:[#allocation2 + $0x10] sm:$0xff] %vm22_vm0, %v135_v12  ;;  %v136_v18 = vadd.f32 %v122_v16, %v31_v9  ;;  %138 = vst.msk [vmem:[#allocation2] sm:$0xff] %vm22_vm0, %v133_v14  ;;  %v207_v19 = vpop.f32.mrb[3].mxu1  ;;  %v134_v20 = vadd.f32 %v114_v17, %v29_v11  ;;  %v203_v21 = vpop.f32.mrb[3].mxu0 }
  0xe2   :  { %141 = vst.msk [vmem:[#allocation2 + $0x18] sm:$0xff] %vm22_vm0, %v136_v18  ;;  %139 = vst.msk [vmem:[#allocation2 + $0x8] sm:$0xff] %vm22_vm0, %v134_v20 }
  0xe5   :  { %v127_v24 = vpop.f32.mrb[4].mxu1 }
  0xe6   :  { %v137_v26 = vadd.f32 %v127_v24, %v32_v22  ;;  %v210_v27 = vpop.f32.mrb[5].mxu1 }
  0xe7   :  { %v148_v28 = vld [vmem:[#allocation2 + $0x10] sm:$0xff]  ;;  %v146_v29 = vld [vmem:[#allocation2] sm:$0xff]  ;;  %v130_v31 = vpop.f32.mrb[6].mxu1 }
  0xe8   :  { %v160_v32 = vadd.f32 %v190_v23, %v148_v28  ;;  %v158_v34 = vadd.f32 %v190_v23, %v146_v29  ;;  %142 = vst.msk [vmem:[#allocation2 + $0x20] sm:$0xff] %vm22_vm0, %v137_v26  ;;  %v211_v35 = vpop.f32.mrb[7].mxu1 }
  0xe9   :  { %v149_v36 = vld [vmem:[#allocation2 + $0x18] sm:$0xff]  ;;  %v147_v37 = vld [vmem:[#allocation2 + $0x8] sm:$0xff] }
  0xea   :  { %v170_v39 = vadd.f32 %v165_v25, %v160_v32  ;;  %v161_v40 = vadd.f32 %v190_v23, %v149_v36  ;;  %v168_v41 = vadd.f32 %v163_v30, %v158_v34  ;;  %v159_v42 = vadd.f32 %v190_v23, %v147_v37 }
  0xec   :  { %175 = vst.msk [vmem:[%s320_s4 + $0x10] sm:$0xff] %vm22_vm0, %v170_v39  ;;  %v171_v43 = vadd.f32 %v166_v33, %v161_v40  ;;  %173 = vst.msk [vmem:[%s320_s4] sm:$0xff] %vm22_vm0, %v168_v41  ;;  %v169_v44 = vadd.f32 %v164_v38, %v159_v42 }
  0xee   :  { %176 = vst.msk [vmem:[%s320_s4 + $0x18] sm:$0xff] %vm22_vm0, %v171_v43  ;;  %174 = vst.msk [vmem:[%s320_s4 + $0x8] sm:$0xff] %vm22_vm0, %v169_v44 }
  0xef   :  { %v150_v45 = vld [vmem:[#allocation2 + $0x20] sm:$0xff] }
  0xf0   :  { %v162_v47 = vadd.f32 %v190_v23, %v150_v45 }
  0xf2   :  { %v172_v48 = vadd.f32 %v167_v46, %v162_v47 }
  0xf4   :  { %177 = vst.msk [vmem:[%s320_s4 + $0x20] sm:$0xff] %vm22_vm0, %v172_v48 }

// kernel: _lambda_.30
= control target key start
LH: loop header
LB: loop body
LE: loop exit
PB: predicated region body
PF: predicated region fallthrough
CT: control target
= control target key end

     0   :  { %vm30_vm0 = vcmask 261120   ;;  %v414_v36 = vmov 0.0   ;;  %vm415_vm1 = vmmov 0   ;;  %vm142_vm2 = vcmask 257024   ;;  %s549_s0 = inlined_call_operand.vmem [shape: f32[40,32], index: 0, kind: input, shape index: {}]   ;;  %s550_s3 = inlined_call_operand.vmem [shape: bf16[32,64], index: 3, kind: input, shape index: {}]   ;;  %s551_s1 = inlined_call_operand.vmem [shape: f32[1,32], index: 1, kind: input, shape index: {}]   ;;  %s552_s2 = inlined_call_operand.vmem [shape: f32[1,32], index: 2, kind: input, shape index: {}]   ;;  %s553_s4 = inlined_call_operand.vmem [shape: f32[1,64], index: 4, kind: input, shape index: {}]   ;;  %s554_s5 = inlined_call_operand.vmem [shape: bf16[40,64], index: 5, kind: output, shape index: {}]  }
   0x1   :  { %v27_v0 = vld [vmem:[%s549_s0 + $0x10] sm:$0xff]  ;;  %v28_v1 = vld [vmem:[%s549_s0 + $0x18] sm:$0xff]  ;;  %v25_v2 = vld [vmem:[%s549_s0] sm:$0xff]  ;;  %383 = vmatprep.subr.bf16.mxu1 %v414_v36  ;;  %367 = vmatprep.subr.bf16.mxu0 %v414_v36  ;;  %vm321_vm3 = vcmask 519168  }
   0x2   :  { %v37_v3 = vsel %vm30_vm0, %v27_v0, 0.0  ;;  %v31_v4 = vsel %vm30_vm0, %v25_v2, 0.0  ;;  %v26_v5 = vld [vmem:[%s549_s0 + $0x8] sm:$0xff]  ;;  %v40_v6 = vsel %vm30_vm0, %v28_v1, 0.0  ;;  %v29_v8 = vld [vmem:[%s549_s0 + $0x20] sm:$0xff]  ;;  %375 = vmatprep.mubr.msk.bf16.mxu1 %vm415_vm1, %v414_v36  ;;  %371 = vmatprep.mubr.msk.bf16.mxu0 %vm415_vm1, %v414_v36 }
   0x3   :  { %38 = vadd.xlane.f32.xlu0 %v37_v3  ;;  %32 = vadd.xlane.f32.xlu1 %v31_v4  ;;  %v34_v7 = vsel %vm30_vm0, %v26_v5, 0.0  ;;  %v43_v9 = vsel %vm30_vm0, %v29_v8, 0.0  ;;  %v389_v35 = vld [vmem:[%s550_s3] sm:$0xff]   ;;  %v390_v37 = vld [vmem:[%s550_s3 + $0x8] sm:$0xff]  }
   0x4   :  { %385 = vmatpush3.bf16.msra.mxu1 %v389_v35  ;;  %368 = vmatpush3.bf16.msra.mxu0 %v389_v35  ;;  %v331_v54 = vld [vmem:[%s551_s1] ss:$0 sm:$0xff] }
   0x5   :  { %384 = vmatprep.subr.bf16.mxu1 %v414_v36  ;;  %369 = vmatprep.subr.bf16.mxu0 %v414_v36  ;;  %v332_v56 = vld [vmem:[%s552_s2] ss:$0 sm:$0xff] }
   0x7   :  { %41 = vadd.xlane.f32.xlu0 %v40_v6  ;;  %35 = vadd.xlane.f32.xlu1 %v34_v7 }
   0x8   :  { %386 = vmatpush3.bf16.msra.mxu1 %v390_v37  ;;  %370 = vmatpush3.bf16.msra.mxu0 %v390_v37 }
   0xb   :  { %44 = vadd.xlane.f32.xlu0 %v43_v9 }
  0x90   :  { %v39_v10 = vpop.xlane.xlu0 %38  ;;  %v33_v11 = vpop.xlane.xlu1 %32 }
  0x91   :  { %v49_v12 = vmul.f32 0.03125, %v39_v10  ;;  %v47_v13 = vmul.f32 0.03125, %v33_v11 }
  0x93   :  { %v466_v14 = vsub.f32 %v27_v0, %v49_v12  ;;  %v468_v15 = vsub.f32 %v25_v2, %v47_v13 }
  0x94   :  { %v42_v16 = vpop.xlane.xlu0 %41  ;;  %v36_v17 = vpop.xlane.xlu1 %35 }
  0x95   :  { %v50_v18 = vmul.f32 0.03125, %v42_v16  ;;  %v59_v19 = vmul.f32 %v466_v14, %v466_v14  ;;  %v48_v20 = vmul.f32 0.03125, %v36_v17  ;;  %v57_v21 = vmul.f32 %v468_v15, %v468_v15 }
  0x97   :  { %v474_v22 = vsub.f32 %v28_v1, %v50_v18  ;;  %v68_v23 = vsel %vm30_vm0, %v59_v19, 0.0  ;;  %v477_v24 = vsub.f32 %v26_v5, %v48_v20  ;;  %v62_v28 = vsel %vm30_vm0, %v57_v21, 0.0  ;;  %v338_v19 = vld [vmem:[%s553_s4] ss:$0 sm:$0xff] }
  0x98   :  { %v45_v25 = vpop.xlane.xlu0 %44  ;;  %69 = vadd.xlane.f32.xlu1 %v68_v23 }
  0x99   :  { %v51_v26 = vmul.f32 0.03125, %v45_v25  ;;  %v60_v27 = vmul.f32 %v474_v22, %v474_v22  ;;  %v58_v29 = vmul.f32 %v477_v24, %v477_v24 }
  0x9b   :  { %v484_v30 = vsub.f32 %v29_v8, %v51_v26  ;;  %v71_v31 = vsel %vm30_vm0, %v60_v27, 0.0  ;;  %v65_v33 = vsel %vm30_vm0, %v58_v29, 0.0 }
  0x9c   :  { %72 = vadd.xlane.f32.xlu0 %v71_v31  ;;  %63 = vadd.xlane.f32.xlu1 %v62_v28 }
  0x9d   :  { %v61_v32 = vmul.f32 %v484_v30, %v484_v30 }
  0x9f   :  { %v74_v34 = vsel %vm30_vm0, %v61_v32, 0.0 }
  0xa0   :  { %75 = vadd.xlane.f32.xlu1 %v74_v34  ;;  %66 = vadd.xlane.f32.xlu0 %v65_v33 }
 0x125   :  { %v70_v38 = vpop.xlane.xlu1 %69 }
 0x126   :  { %v79_v39 = vmul.f32 0.03125, %v70_v38 }
 0x128   :  { %v84_v40 = vadd.f32 1e-05, %v79_v39 }
 0x129   :  { %v73_v41 = vpop.xlane.xlu0 %72  ;;  %v64_v42 = vpop.xlane.xlu1 %63 }
 0x12a   :  { %394 = vrsqrt.f32 %v84_v40  ;;  %v80_v43 = vmul.f32 0.03125, %v73_v41  ;;  %v77_v44 = vmul.f32 0.03125, %v64_v42 }
 0x12c   :  { %v85_v45 = vadd.f32 1e-05, %v80_v43  ;;  %v82_v46 = vadd.f32 1e-05, %v77_v44 }
 0x12d   :  { %v67_v47 = vpop.xlane.xlu0 %66  ;;  %v76_v48 = vpop.xlane.xlu1 %75 }
 0x12e   :  { %396 = vrsqrt.f32 %v85_v45  ;;  %v78_v49 = vmul.f32 0.03125, %v67_v47  ;;  %v81_v50 = vmul.f32 0.03125, %v76_v48 }
 0x12f   :  { %398 = vrsqrt.f32 %v82_v46 }
 0x130   :  { %v83_v51 = vadd.f32 1e-05, %v78_v49  ;;  %v86_v52 = vadd.f32 1e-05, %v81_v50 }
 0x132   :  { %400 = vrsqrt.f32 %v83_v51 }
 0x133   :  { %402 = vrsqrt.f32 %v86_v52 }
 0x134   :  { %v395_v53 = vpop.eup %394 }
 0x135   :  { %v94_v55 = vmul.f32 %v395_v53, %v466_v14 }
 0x137   :  { %v106_v57 = vmul.f32 %v331_v54, %v94_v55 }
 0x138   :  { %v397_v58 = vpop.eup %396 }
 0x139   :  { %v399_v59 = vpop.eup %398  ;;  %v118_v60 = vadd.f32 %v332_v56, %v106_v57  ;;  %v95_v61 = vmul.f32 %v397_v58, %v474_v22 }
 0x13a   :  { %v92_v62 = vmul.f32 %v399_v59, %v468_v15 }
 0x13b   :  { %v354_v63 = vpack.c.bf16 %v118_v60, %v118_v60  ;;  %v107_v0 = vmul.f32 %v331_v54, %v95_v61 }
 0x13c   :  { %v401_v1 = vpop.eup %400  ;;  %v104_v2 = vmul.f32 %v331_v54, %v92_v62 }
 0x13d   :  { %v403_v3 = vpop.eup %402  ;;  %145 = vst.msk [vmem:[#allocation2 + $0x8] sm:$0xf] %vm142_vm2, %v354_v63  ;;  %v119_v4 = vadd.f32 %v332_v56, %v107_v0  ;;  %v93_v5 = vmul.f32 %v401_v1, %v477_v24 }
 0x13e   :  { %v116_v6 = vadd.f32 %v332_v56, %v104_v2  ;;  %v96_v7 = vmul.f32 %v403_v3, %v484_v30 }
 0x13f   :  { %v355_v8 = vpack.c.bf16 %v119_v4, %v119_v4  ;;  %v105_v9 = vmul.f32 %v331_v54, %v93_v5 }
 0x140   :  { %v352_v10 = vpack.c.bf16 %v116_v6, %v116_v6  ;;  %v108_v11 = vmul.f32 %v331_v54, %v96_v7 }
 0x141   :  { %146 = vst.msk [vmem:[#allocation2 + $0xc] sm:$0xf] %vm142_vm2, %v355_v8  ;;  %v117_v12 = vadd.f32 %v332_v56, %v105_v9 }
 0x142   :  { %143 = vst.msk [vmem:[#allocation2] sm:$0xf] %vm142_vm2, %v352_v10  ;;  %v120_v13 = vadd.f32 %v332_v56, %v108_v11 }
 0x143   :  { %v353_v14 = vpack.c.bf16 %v117_v12, %v117_v12 }
 0x144   :  { %v356_v15 = vpack.c.bf16 %v120_v13, %v120_v13 }
 0x145   :  { %144 = vst.msk [vmem:[#allocation2 + $0x4] sm:$0xf] %vm142_vm2, %v353_v14 }
 0x146   :  { %147 = vst.msk [vmem:[#allocation2 + $0x10] sm:$0xf] %vm142_vm2, %v356_v15 }
 0x148   :  { %v391_v16 = vld [vmem:[#allocation2 + $0x8] sm:$0xff]  }
 0x149   :  { %376 = vmatmul.mubr.msk.bf16.vlgmr.msra.gmra.mrb[0].mxu1 %vm30_vm0, %v391_v16 }
 0x14a   :  { %379 = vmatprep.mubr.msk.bf16.mxu1 %vm415_vm1, %v414_v36 }
 0x14c   :  { %v392_v17 = vld [vmem:[#allocation2] sm:$0xff]  }
 0x14d   :  { %372 = vmatmul.mubr.msk.bf16.vlgmr.msra.gmra.mrb[0].mxu0 %vm30_vm0, %v392_v17  ;;  %v393_v18 = vld [vmem:[#allocation2 + $0x10] ss:$0 sps:$4 sm:$0xff]  }
 0x151   :  { %380 = vmatmul.mubr.msk.bf16.gmra.mrb[4].mxu1 %vm30_vm0, %v393_v18 }
 0x21c   :  { %v241_v20 = vpop.f32.mrb[0].mxu1 }
 0x21d   :  { %v242_v21 = vadd.f32 %v338_v19, %v241_v20  ;;  %v377_v22 = vpop.f32.mrb[1].mxu1 }
 0x21e   :  { %v244_v23 = vpop.f32.mrb[2].mxu1 }
 0x21f   :  { %v262_v24 = vmul.f32 0.044715, %v242_v21  ;;  %v245_v25 = vadd.f32 %v338_v19, %v244_v23  ;;  %v378_v26 = vpop.f32.mrb[3].mxu1  ;;  %v257_v63 = vmul.f32 0.5, %v242_v21 }
 0x220   :  { %v233_v27 = vpop.f32.mrb[0].mxu0 }
 0x221   :  { %v267_v28 = vmul.f32 %v262_v24, %v242_v21  ;;  %v263_v29 = vmul.f32 0.044715, %v245_v25  ;;  %v234_v30 = vadd.f32 %v338_v19, %v233_v27  ;;  %v373_v31 = vpop.f32.mrb[1].mxu0  ;;  %v258_v3 = vmul.f32 0.5, %v245_v25 }
 0x222   :  { %v236_v32 = vpop.f32.mrb[2].mxu0 }
 0x223   :  { %v272_v33 = vmul.f32 %v267_v28, %v242_v21  ;;  %v268_v34 = vmul.f32 %v263_v29, %v245_v25  ;;  %v260_v35 = vmul.f32 0.044715, %v234_v30  ;;  %v374_v36 = vpop.f32.mrb[3].mxu0  ;;  %v237_v37 = vadd.f32 %v338_v19, %v236_v32 }
 0x224   :  { %v249_v38 = vpop.f32.mrb[4].mxu1  ;;  %v255_v8 = vmul.f32 0.5, %v234_v30 }
 0x225   :  { %v277_v39 = vadd.f32 %v272_v33, %v242_v21  ;;  %v273_v40 = vmul.f32 %v268_v34, %v245_v25  ;;  %v265_v41 = vmul.f32 %v260_v35, %v234_v30  ;;  %v250_v42 = vadd.f32 %v338_v19, %v249_v38  ;;  %v381_v43 = vpop.f32.mrb[5].mxu1 }
 0x226   :  { %v261_v44 = vmul.f32 0.044715, %v237_v37  ;;  %v252_v45 = vpop.f32.mrb[6].mxu1  ;;  %v256_v13 = vmul.f32 0.5, %v237_v37 }
 0x227   :  { %v282_v46 = vmul.f32 0.7978846, %v277_v39  ;;  %v278_v47 = vadd.f32 %v273_v40, %v245_v25  ;;  %v270_v48 = vmul.f32 %v265_v41, %v234_v30  ;;  %v382_v49 = vpop.f32.mrb[7].mxu1  ;;  %v264_v51 = vmul.f32 0.044715, %v250_v42 }
 0x228   :  { %v266_v50 = vmul.f32 %v261_v44, %v237_v37  ;;  %v259_v18 = vmul.f32 0.5, %v250_v42 }
 0x229   :  { %404 = vtanh.f32 %v282_v46  ;;  %v283_v52 = vmul.f32 0.7978846, %v278_v47  ;;  %v275_v53 = vadd.f32 %v270_v48, %v234_v30  ;;  %v269_v55 = vmul.f32 %v264_v51, %v250_v42 }
 0x22a   :  { %v271_v54 = vmul.f32 %v266_v50, %v237_v37 }
 0x22b   :  { %406 = vtanh.f32 %v283_v52  ;;  %v280_v56 = vmul.f32 0.7978846, %v275_v53  ;;  %v274_v58 = vmul.f32 %v269_v55, %v250_v42 }
 0x22c   :  { %v276_v57 = vadd.f32 %v271_v54, %v237_v37 }
 0x22d   :  { %408 = vtanh.f32 %v280_v56  ;;  %v279_v60 = vadd.f32 %v274_v58, %v250_v42 }
 0x22e   :  { %v281_v59 = vmul.f32 0.7978846, %v276_v57 }
 0x22f   :  { %v284_v61 = vmul.f32 0.7978846, %v279_v60 }
 0x230   :  { %410 = vtanh.f32 %v281_v59 }
 0x231   :  { %412 = vtanh.f32 %v284_v61 }
 0x233   :  { %v405_v62 = vpop.eup %404 }
 0x234   :  { %v292_v0 = vadd.f32 1.0, %v405_v62 }
 0x235   :  { %v407_v1 = vpop.eup %406 }
 0x236   :  { %v297_v2 = vmul.f32 %v292_v0, %v257_v63  ;;  %v293_v4 = vadd.f32 1.0, %v407_v1 }
 0x237   :  { %v409_v5 = vpop.eup %408 }
 0x238   :  { %v359_v6 = vpack.c.bf16 %v297_v2, %v297_v2  ;;  %v298_v7 = vmul.f32 %v293_v4, %v258_v3  ;;  %v290_v9 = vadd.f32 1.0, %v409_v5 }
 0x23a   :  { %v411_v10 = vpop.eup %410  ;;  %324 = vst.msk [vmem:[%s554_s5 + $0x8] sm:$0xf] %vm321_vm3, %v359_v6  ;;  %v360_v11 = vpack.c.bf16 %v298_v7, %v298_v7  ;;  %v295_v12 = vmul.f32 %v290_v9, %v255_v8 }
 0x23b   :  { %v291_v14 = vadd.f32 1.0, %v411_v10  ;;  %v413_v15 = vpop.eup %412 }
 0x23c   :  { %325 = vst.msk [vmem:[%s554_s5 + $0xc] sm:$0xf] %vm321_vm3, %v360_v11  ;;  %v357_v16 = vpack.c.bf16 %v295_v12, %v295_v12  ;;  %v294_v19 = vadd.f32 1.0, %v413_v15 }
 0x23d   :  { %v296_v17 = vmul.f32 %v291_v14, %v256_v13 }
 0x23e   :  { %322 = vst.msk [vmem:[%s554_s5] sm:$0xf] %vm321_vm3, %v357_v16  ;;  %v299_v21 = vmul.f32 %v294_v19, %v259_v18 }
 0x23f   :  { %v358_v20 = vpack.c.bf16 %v296_v17, %v296_v17 }
 0x240   :  { %v361_v22 = vpack.c.bf16 %v299_v21, %v299_v21 }
 0x241   :  { %323 = vst.msk [vmem:[%s554_s5 + $0x4] sm:$0xf] %vm321_vm3, %v358_v20 }
 0x242   :  { %326 = vst.msk [vmem:[%s554_s5 + $0x10] sm:$0xf] %vm321_vm3, %v361_v22 }

// kernel: _lambda_.49
= control target key start
LH: loop header
LB: loop body
LE: loop exit
PB: predicated region body
PF: predicated region fallthrough
CT: control target
= control target key end

     0   :  { %vm10_vm0 = vcmask 254976   ;;  %s39_s0 = inlined_call_operand.vmem [shape: f32[2,32], index: 0, kind: input, shape index: {}]   ;;  %s40_s1 = inlined_call_operand.vmem [shape: f32[2,32], index: 1, kind: output, shape index: {}]  }
   0x1   :  { %v8_v0 = vld [vmem:[%s39_s0] sm:$0x3] }
   0x2   :  { %v9_v1 = vmul.f32 %v8_v0, %v8_v0 }
   0x4   :  { %v11_v2 = vsel %vm10_vm0, %v9_v1, 0.0 }
   0x5   :  { %12 = vadd.xlane.f32.xlu0 %v11_v2 }
  0x92   :  { %v13_v3 = vpop.xlane.xlu0 %12 }
  0x93   :  { %21 = vrsqrt.f32 %v13_v3 }
  0x9d   :  { %v22_v4 = vpop.eup %21 }
  0x9e   :  { %v15_v5 = vmul.f32 %v22_v4, %v8_v0 }
  0xa0   :  { %16 = vst.msk [vmem:[%s40_s1] sm:$0x3] %vm10_vm0, %v15_v5 }

// kernel: _lambda_.37
= control target key start
LH: loop header
LB: loop body
LE: loop exit
PB: predicated region body
PF: predicated region fallthrough
CT: control target
= control target key end

     0   :  { %vm15_vm0 = vcmask 254976   ;;  %s90_s0 = inlined_call_operand.vmem [shape: f32[2,32], index: 0, kind: input, shape index: {}]   ;;  %s91_s1 = inlined_call_operand.vmem [shape: f32[1,32], index: 1, kind: input, shape index: {}]   ;;  %s92_s2 = inlined_call_operand.vmem [shape: f32[1,32], index: 2, kind: input, shape index: {}]   ;;  %s93_s3 = inlined_call_operand.vmem [shape: f32[2,32], index: 3, kind: output, shape index: {}]  }
   0x1   :  { %v14_v0 = vld [vmem:[%s90_s0] sm:$0x3] }
   0x2   :  { %v16_v1 = vsel %vm15_vm0, %v14_v0, 0.0  ;;  %v51_v11 = vld [vmem:[%s91_s1] ss:$0 sm:$0xff] }
   0x3   :  { %17 = vadd.xlane.f32.xlu0 %v16_v1  ;;  %v52_v13 = vld [vmem:[%s92_s2] ss:$0 sm:$0xff] }
  0x90   :  { %v18_v2 = vpop.xlane.xlu0 %17 }
  0x91   :  { %v20_v3 = vmul.f32 0.03125, %v18_v2 }
  0x93   :  { %v21_v4 = vsub.f32 %v14_v0, %v20_v3 }
  0x95   :  { %v22_v5 = vmul.f32 %v21_v4, %v21_v4 }
  0x97   :  { %v23_v6 = vsel %vm15_vm0, %v22_v5, 0.0 }
  0x98   :  { %24 = vadd.xlane.f32.xlu0 %v23_v6 }
 0x125   :  { %v25_v7 = vpop.xlane.xlu0 %24 }
 0x126   :  { %v26_v8 = vmul.f32 0.03125, %v25_v7 }
 0x128   :  { %v27_v9 = vadd.f32 1e-05, %v26_v8 }
 0x12a   :  { %53 = vrsqrt.f32 %v27_v9 }
 0x134   :  { %v54_v10 = vpop.eup %53 }
 0x135   :  { %v29_v12 = vmul.f32 %v54_v10, %v21_v4 }
 0x137   :  { %v37_v14 = vmul.f32 %v51_v11, %v29_v12 }
 0x139   :  { %v45_v15 = vadd.f32 %v52_v13, %v37_v14 }
 0x13b   :  { %46 = vst.msk [vmem:[%s93_s3] sm:$0x3] %vm15_vm0, %v45_v15 }

// kernel: _lambda_.31
= control target key start
LH: loop header
LB: loop body
LE: loop exit
PB: predicated region body
PF: predicated region fallthrough
CT: control target
= control target key end

     0   :  { %vm22_vm0 = vcmask 261120   ;;  %v254_v0 = vmov 0.0   ;;  %vm255_vm1 = vmmov 0   ;;  %vm83_vm2 = vcmask 523264   ;;  %s353_s1 = inlined_call_operand.vmem [shape: bf16[64,32], index: 1, kind: input, shape index: {}]   ;;  %s354_s0 = inlined_call_operand.vmem [shape: bf16[40,64], index: 0, kind: input, shape index: {}]   ;;  %s355_s2 = inlined_call_operand.vmem [shape: f32[1,32], index: 2, kind: input, shape index: {}]   ;;  %s356_s3 = inlined_call_operand.vmem [shape: f32[40,32], index: 3, kind: input, shape index: {}]   ;;  %s357_s4 = inlined_call_operand.vmem [shape: f32[40,32], index: 4, kind: output, shape index: {}]  }
   0x1   :  { %237 = vmatprep.subr.bf16.mxu1 %v254_v0  ;;  %v247_v1 = vld [vmem:[%s353_s1] sm:$0xff]   ;;  %217 = vmatprep.subr.bf16.mxu0 %v254_v0  ;;  %25 = vst.msk [vmem:[#allocation2 + $0x10] sm:$0xff] %vm22_vm0, %v254_v0  ;;  %23 = vst.msk [vmem:[#allocation2] sm:$0xff] %vm22_vm0, %v254_v0  ;;  %v248_v2 = vld [vmem:[%s353_s1 + $0x8] sm:$0xff]  }
   0x2   :  { %24 = vst.msk [vmem:[#allocation2 + $0x8] sm:$0xff] %vm22_vm0, %v254_v0  ;;  %26 = vst.msk [vmem:[#allocation2 + $0x18] sm:$0xff] %vm22_vm0, %v254_v0  ;;  %229 = vmatprep.mubr.msk.bf16.mxu1 %vm255_vm1, %v254_v0  ;;  %225 = vmatprep.mubr.msk.bf16.mxu0 %vm255_vm1, %v254_v0  ;;  %v249_v3 = vld [vmem:[%s353_s1 + $0x10] sm:$0xff]   ;;  %v250_v4 = vld [vmem:[%s353_s1 + $0x18] sm:$0xff]  }
   0x3   :  { %27 = vst.msk [vmem:[#allocation2 + $0x20] sm:$0xff] %vm22_vm0, %v254_v0  ;;  %241 = vmatpush3.bf16.msra.mxu1 %v247_v1  ;;  %218 = vmatpush3.bf16.msra.mxu0 %v247_v1  ;;  %v251_v5 = vld [vmem:[%s354_s0 + $0x8] sm:$0xff]   ;;  %v252_v6 = vld [vmem:[%s354_s0] sm:$0xff]   ;;  %v253_v7 = vld [vmem:[%s354_s0 + $0x10] ss:$0 sps:$4 sm:$0xff]  }
   0x4   :  { %238 = vmatprep.subr.bf16.mxu1 %v254_v0  ;;  %219 = vmatprep.subr.bf16.mxu0 %v254_v0  ;;  %v209_v25 = vld [vmem:[%s355_s2] ss:$0 sm:$0xff]  ;;  %v182_v27 = vld [vmem:[%s356_s3 + $0x10] sm:$0xff]  ;;  %v183_v35 = vld [vmem:[%s356_s3 + $0x18] sm:$0xff] }
   0x5   :  { %v180_v32 = vld [vmem:[%s356_s3] sm:$0xff]  ;;  %v181_v40 = vld [vmem:[%s356_s3 + $0x8] sm:$0xff] }
   0x6   :  { %v184_v48 = vld [vmem:[%s356_s3 + $0x20] sm:$0xff] }
   0x7   :  { %242 = vmatpush3.bf16.msra.mxu1 %v248_v2  ;;  %220 = vmatpush3.bf16.msra.mxu0 %v248_v2 }
   0x8   :  { %239 = vmatprep.subr.bf16.mxu1 %v254_v0  ;;  %221 = vmatprep.subr.bf16.mxu0 %v254_v0  ;;  %v30_v8 = vld [vmem:[#allocation2 + $0x10] sm:$0xff]  ;;  %v28_v9 = vld [vmem:[#allocation2] sm:$0xff] }
   0x9   :  { %v31_v11 = vld [vmem:[#allocation2 + $0x18] sm:$0xff]  ;;  %v29_v13 = vld [vmem:[#allocation2 + $0x8] sm:$0xff] }
   0xa   :  { %v32_v24 = vld [vmem:[#allocation2 + $0x20] sm:$0xff] }
   0xb   :  { %243 = vmatpush3.bf16.msra.mxu1 %v249_v3  ;;  %222 = vmatpush3.bf16.msra.mxu0 %v249_v3 }
   0xc   :  { %240 = vmatprep.subr.bf16.mxu1 %v254_v0  ;;  %223 = vmatprep.subr.bf16.mxu0 %v254_v0 }
   0xf   :  { %244 = vmatpush3.bf16.msra.mxu1 %v250_v4  ;;  %224 = vmatpush3.bf16.msra.mxu0 %v250_v4 }
  0x12   :  { %230 = vmatmul.mubr.msk.bf16.vlgmr.msra.gmra.mrb[0].mxu1 %vm83_vm2, %v251_v5  ;;  %226 = vmatmul.mubr.msk.bf16.vlgmr.msra.gmra.mrb[0].mxu0 %vm83_vm2, %v252_v6 }
  0x13   :  { %233 = vmatprep.mubr.msk.bf16.mxu1 %vm255_vm1, %v254_v0 }
  0x1a   :  { %234 = vmatmul.mubr.msk.bf16.gmra.mrb[4].mxu1 %vm83_vm2, %v253_v7 }
  0xe5   :  { %v135_v10 = vpop.f32.mrb[0].mxu1  ;;  %v127_v12 = vpop.f32.mrb[0].mxu0 }
  0xe6   :  { %v151_v14 = vadd.f32 %v135_v10, %v30_v8  ;;  %v231_v15 = vpop.f32.mrb[1].mxu1  ;;  %v149_v16 = vadd.f32 %v127_v12, %v28_v9  ;;  %v227_v17 = vpop.f32.mrb[1].mxu0 }
  0xe7   :  { %v138_v18 = vpop.f32.mrb[2].mxu1  ;;  %v130_v19 = vpop.f32.mrb[2].mxu0 }
  0xe8   :  { %157 = vst.msk [vmem:[#allocation2 + $0x10] sm:$0xff] %vm22_vm0, %v151_v14  ;;  %v152_v20 = vadd.f32 %v138_v18, %v31_v11  ;;  %155 = vst.msk [vmem:[#allocation2] sm:$0xff] %vm22_vm0, %v149_v16  ;;  %v232_v21 = vpop.f32.mrb[3].mxu1  ;;  %v150_v22 = vadd.f32 %v130_v19, %v29_v13  ;;  %v228_v23 = vpop.f32.mrb[3].mxu0 }
  0xea   :  { %158 = vst.msk [vmem:[#allocation2 + $0x18] sm:$0xff] %vm22_vm0, %v152_v20  ;;  %156 = vst.msk [vmem:[#allocation2 + $0x8] sm:$0xff] %vm22_vm0, %v150_v22 }
  0xed   :  { %v143_v26 = vpop.f32.mrb[4].mxu1 }
  0xee   :  { %v153_v28 = vadd.f32 %v143_v26, %v32_v24  ;;  %v235_v29 = vpop.f32.mrb[5].mxu1 }
  0xef   :  { %v165_v30 = vld [vmem:[#allocation2 + $0x10] sm:$0xff]  ;;  %v163_v31 = vld [vmem:[#allocation2] sm:$0xff]  ;;  %v146_v33 = vpop.f32.mrb[6].mxu1 }
  0xf0   :  { %v177_v34 = vadd.f32 %v209_v25, %v165_v30  ;;  %v175_v36 = vadd.f32 %v209_v25, %v163_v31  ;;  %159 = vst.msk [vmem:[#allocation2 + $0x20] sm:$0xff] %vm22_vm0, %v153_v28  ;;  %v236_v37 = vpop.f32.mrb[7].mxu1 }
  0xf1   :  { %v166_v38 = vld [vmem:[#allocation2 + $0x18] sm:$0xff]  ;;  %v164_v39 = vld [vmem:[#allocation2 + $0x8] sm:$0xff] }
  0xf2   :  { %v187_v41 = vadd.f32 %v182_v27, %v177_v34  ;;  %v178_v42 = vadd.f32 %v209_v25, %v166_v38  ;;  %v185_v43 = vadd.f32 %v180_v32, %v175_v36  ;;  %v176_v44 = vadd.f32 %v209_v25, %v164_v39 }
  0xf4   :  { %192 = vst.msk [vmem:[%s357_s4 + $0x10] sm:$0xff] %vm22_vm0, %v187_v41  ;;  %v188_v45 = vadd.f32 %v183_v35, %v178_v42  ;;  %190 = vst.msk [vmem:[%s357_s4] sm:$0xff] %vm22_vm0, %v185_v43  ;;  %v186_v46 = vadd.f32 %v181_v40, %v176_v44 }
  0xf6   :  { %193 = vst.msk [vmem:[%s357_s4 + $0x18] sm:$0xff] %vm22_vm0, %v188_v45  ;;  %191 = vst.msk [vmem:[%s357_s4 + $0x8] sm:$0xff] %vm22_vm0, %v186_v46 }
  0xf7   :  { %v167_v47 = vld [vmem:[#allocation2 + $0x20] sm:$0xff] }
  0xf8   :  { %v179_v49 = vadd.f32 %v209_v25, %v167_v47 }
  0xfa   :  { %v189_v50 = vadd.f32 %v184_v48, %v179_v49 }
  0xfc   :  { %194 = vst.msk [vmem:[%s357_s4 + $0x20] sm:$0xff] %vm22_vm0, %v189_v50 }

// kernel: _lambda_.38
= control target key start
LH: loop header
LB: loop body
LE: loop exit
PB: predicated region body
PF: predicated region fallthrough
CT: control target
= control target key end

     0   :  { %vm27_vm0 = vcmask 261120   ;;  %v188_v15 = vmov 0.0   ;;  %vm189_vm1 = vmmov 0   ;;  %vm152_vm2 = vcmask 781312   ;;  %s253_s0 = inlined_call_operand.vmem [shape: f32[16,32], index: 0, kind: input, shape index: {}]   ;;  %s254_s3 = inlined_call_operand.vmem [shape: bf16[32,96], index: 3, kind: input, shape index: {}]   ;;  %s255_s1 = inlined_call_operand.vmem [shape: f32[1,32], index: 1, kind: input, shape index: {}]   ;;  %s256_s2 = inlined_call_operand.vmem [shape: f32[1,32], index: 2, kind: input, shape index: {}]   ;;  %s257_s4 = inlined_call_operand.vmem [shape: f32[1,96], index: 4, kind: input, shape index: {}]   ;;  %s258_s5 = inlined_call_operand.vmem [shape: bf16[16,96], index: 5, kind: output, shape index: {}]  }
   0x1   :  { %v25_v0 = vld [vmem:[%s253_s0] sm:$0xff]  ;;  %v26_v1 = vld [vmem:[%s253_s0 + $0x8] sm:$0xff]  ;;  %172 = vmatprep.subr.bf16.mxu0 %v188_v15  ;;  %176 = vmatprep.mubr.msk.bf16.mxu0 %vm189_vm1, %v188_v15 }
   0x2   :  { %v28_v2 = vsel %vm27_vm0, %v25_v0, 0.0  ;;  %v31_v3 = vsel %vm27_vm0, %v26_v1, 0.0  ;;  %v182_v14 = vld [vmem:[%s254_s3] sm:$0xff]   ;;  %v183_v16 = vld [vmem:[%s254_s3 + $0x8] sm:$0xff]  }
   0x3   :  { %29 = vadd.xlane.f32.xlu0 %v28_v2  ;;  %173 = vmatpush3.bf16.msra.mxu0 %v182_v14  ;;  %v159_v25 = vld [vmem:[%s255_s1] ss:$0 sm:$0xff] }
   0x4   :  { %174 = vmatprep.subr.bf16.mxu0 %v188_v15  ;;  %v160_v29 = vld [vmem:[%s256_s2] ss:$0 sm:$0xff] }
   0x5   :  { %v161_v35 = vld [vmem:[%s257_s4] ss:$0 sm:$0xff] }
   0x7   :  { %32 = vadd.xlane.f32.xlu0 %v31_v3  ;;  %175 = vmatpush3.bf16.msra.mxu0 %v183_v16 }
  0x90   :  { %v30_v4 = vpop.xlane.xlu0 %29 }
  0x91   :  { %v35_v5 = vmul.f32 0.03125, %v30_v4 }
  0x93   :  { %v37_v6 = vsub.f32 %v25_v0, %v35_v5 }
  0x94   :  { %v33_v7 = vpop.xlane.xlu0 %32 }
  0x95   :  { %v36_v8 = vmul.f32 0.03125, %v33_v7  ;;  %v39_v9 = vmul.f32 %v37_v6, %v37_v6 }
  0x97   :  { %v38_v10 = vsub.f32 %v26_v1, %v36_v8  ;;  %v41_v11 = vsel %vm27_vm0, %v39_v9, 0.0 }
  0x98   :  { %42 = vadd.xlane.f32.xlu1 %v41_v11 }
  0x99   :  { %v40_v12 = vmul.f32 %v38_v10, %v38_v10 }
  0x9b   :  { %v44_v13 = vsel %vm27_vm0, %v40_v12, 0.0 }
  0x9c   :  { %45 = vadd.xlane.f32.xlu1 %v44_v13 }
 0x125   :  { %v43_v17 = vpop.xlane.xlu1 %42 }
 0x126   :  { %v47_v18 = vmul.f32 0.03125, %v43_v17 }
 0x128   :  { %v49_v19 = vadd.f32 1e-05, %v47_v18 }
 0x129   :  { %v46_v20 = vpop.xlane.xlu1 %45 }
 0x12a   :  { %184 = vrsqrt.f32 %v49_v19  ;;  %v48_v21 = vmul.f32 0.03125, %v46_v20 }
 0x12c   :  { %v50_v22 = vadd.f32 1e-05, %v48_v21 }
 0x12e   :  { %186 = vrsqrt.f32 %v50_v22 }
 0x134   :  { %v185_v23 = vpop.eup %184 }
 0x135   :  { %v53_v24 = vmul.f32 %v185_v23, %v37_v6 }
 0x137   :  { %v62_v27 = vmul.f32 %v159_v25, %v53_v24 }
 0x138   :  { %v187_v26 = vpop.eup %186 }
 0x139   :  { %v54_v28 = vmul.f32 %v187_v26, %v38_v10  ;;  %v71_v31 = vadd.f32 %v160_v29, %v62_v27 }
 0x13b   :  { %v63_v30 = vmul.f32 %v159_v25, %v54_v28 }
 0x13d   :  { %v72_v32 = vadd.f32 %v160_v29, %v63_v30 }
 0x13f   :  { %v73_v33 = vpack.c.bf16 %v72_v32, %v71_v31 }
 0x141   :  { %74 = vst.msk [vmem:[#allocation2] sm:$0xff] %vm27_vm0, %v73_v33 }
 0x148   :  { %v75_v34 = vld [vmem:[#allocation2] sm:$0xff] }
 0x149   :  { %177 = vmatmul.mubr.msk.bf16.vlgmr.msra.gmra.mrb[0].mxu0 %vm27_vm0, %v75_v34 }
 0x21c   :  { %v137_v36 = vpop.f32.mrb[0].mxu0 }
 0x21d   :  { %v138_v37 = vadd.f32 %v161_v35, %v137_v36  ;;  %v178_v38 = vpop.f32.mrb[1].mxu0 }
 0x21e   :  { %v140_v39 = vpop.f32.mrb[2].mxu0 }
 0x21f   :  { %v167_v40 = vpack.c.bf16 %v138_v37, %v138_v37  ;;  %v141_v41 = vadd.f32 %v161_v35, %v140_v39  ;;  %v179_v42 = vpop.f32.mrb[3].mxu0 }
 0x221   :  { %153 = vst.msk [vmem:[%s258_s5] sm:$0xf] %vm152_vm2, %v167_v40  ;;  %v168_v43 = vpack.c.bf16 %v141_v41, %v141_v41 }
 0x223   :  { %154 = vst.msk [vmem:[%s258_s5 + $0x4] sm:$0xf] %vm152_vm2, %v168_v43 }

// kernel: _lambda_.40
= control target key start
LH: loop header
LB: loop body
LE: loop exit
PB: predicated region body
PF: predicated region fallthrough
CT: control target
= control target key end

     0   :  { %vm22_vm0 = vcmask 261120   ;;  %v144_v0 = vmov 0.0   ;;  %vm145_vm1 = vmmov 0   ;;  %s202_s1 = inlined_call_operand.vmem [shape: bf16[32,32], index: 1, kind: input, shape index: {}]   ;;  %s203_s0 = inlined_call_operand.vmem [shape: bf16[16,32], index: 0, kind: input, shape index: {}]   ;;  %s204_s2 = inlined_call_operand.vmem [shape: f32[1,32], index: 2, kind: input, shape index: {}]   ;;  %s205_s3 = inlined_call_operand.vmem [shape: f32[16,32], index: 3, kind: input, shape index: {}]   ;;  %s206_s4 = inlined_call_operand.vmem [shape: f32[16,32], index: 4, kind: output, shape index: {}]  }
   0x1   :  { %131 = vmatprep.subr.bf16.mxu0 %v144_v0  ;;  %v141_v1 = vld [vmem:[%s202_s1] sm:$0xff]   ;;  %135 = vmatprep.mubr.msk.bf16.mxu0 %vm145_vm1, %v144_v0  ;;  %23 = vst.msk [vmem:[#allocation2] sm:$0xff] %vm22_vm0, %v144_v0  ;;  %24 = vst.msk [vmem:[#allocation2 + $0x8] sm:$0xff] %vm22_vm0, %v144_v0  ;;  %v142_v2 = vld [vmem:[%s202_s1 + $0x8] sm:$0xff]  }
   0x2   :  { %132 = vmatpush3.bf16.msra.mxu0 %v141_v1  ;;  %v143_v3 = vld [vmem:[%s203_s0] sm:$0xff]   ;;  %v114_v17 = vld [vmem:[%s205_s3 + $0x8] sm:$0xff] }
   0x3   :  { %133 = vmatprep.subr.bf16.mxu0 %v144_v0  ;;  %v127_v12 = vld [vmem:[%s204_s2] ss:$0 sm:$0xff] }
   0x4   :  { %v113_v14 = vld [vmem:[%s205_s3] sm:$0xff] }
   0x6   :  { %134 = vmatpush3.bf16.msra.mxu0 %v142_v2 }
   0x8   :  { %v25_v4 = vld [vmem:[#allocation2] sm:$0xff]  ;;  %v26_v6 = vld [vmem:[#allocation2 + $0x8] sm:$0xff] }
   0x9   :  { %136 = vmatmul.mubr.msk.bf16.vlgmr.msra.gmra.mrb[0].mxu0 %vm22_vm0, %v143_v3 }
  0xdc   :  { %v88_v5 = vpop.f32.mrb[0].mxu0 }
  0xdd   :  { %v95_v7 = vadd.f32 %v88_v5, %v25_v4  ;;  %v137_v8 = vpop.f32.mrb[1].mxu0 }
  0xde   :  { %v91_v9 = vpop.f32.mrb[2].mxu0 }
  0xdf   :  { %97 = vst.msk [vmem:[#allocation2] sm:$0xff] %vm22_vm0, %v95_v7  ;;  %v96_v10 = vadd.f32 %v91_v9, %v26_v6  ;;  %v138_v11 = vpop.f32.mrb[3].mxu0 }
  0xe1   :  { %98 = vst.msk [vmem:[#allocation2 + $0x8] sm:$0xff] %vm22_vm0, %v96_v10 }
  0xe6   :  { %v102_v13 = vld [vmem:[#allocation2] sm:$0xff] }
  0xe7   :  { %v111_v15 = vadd.f32 %v127_v12, %v102_v13 }
  0xe8   :  { %v103_v16 = vld [vmem:[#allocation2 + $0x8] sm:$0xff] }
  0xe9   :  { %v115_v18 = vadd.f32 %v113_v14, %v111_v15  ;;  %v112_v19 = vadd.f32 %v127_v12, %v103_v16 }
  0xeb   :  { %117 = vst.msk [vmem:[%s206_s4] sm:$0xff] %vm22_vm0, %v115_v18  ;;  %v116_v20 = vadd.f32 %v114_v17, %v112_v19 }
  0xed   :  { %118 = vst.msk [vmem:[%s206_s4 + $0x8] sm:$0xff] %vm22_vm0, %v116_v20 }

// kernel: _lambda_.39
= control target key start
LH: loop header
LB: loop body
LE: loop exit
PB: predicated region body
PF: predicated region fallthrough
CT: control target
= control target key end

     0   :  { %s498_s6 = smov 0   ;;  %s546_s0 = inlined_call_operand.vmem [shape: bf16[2,8,96], index: 0, kind: input, shape index: {}]   ;;  %s547_s1 = inlined_call_operand.vmem [shape: bf16[2,8,32], index: 1, kind: output, shape index: {}]  }
   0x1 LB: > { %s401_s7 = sadd.s32 4294967295, %s478_s6   ;;  %p405_p0 = scmp.ge.s32.totalorder %s478_s6, 1  ;;  %s478_s6 = sphi %s498_s6, %s11_s6  }
   0x2   : > { %p86_p1 = scmp.lt.s32.totalorder %s478_s6, 3 }
   0x4   : > { %p87_p2 = pnand %p405_p0, %p86_p1 }
   0x5   : > { %p104_p3 = scmp.lt.s32.totalorder (!%p87_p2), %s401_s7, 1  ;;  %v480_v0 = vmov (!%p87_p2), 0.0   ;;  %vm481_vm0 = vmmov (!%p87_p2), 0   ;;  %s482_s12 = smov (!%p87_p2), 96   ;;  %vm119_vm1 = vcmask (!%p87_p2), 130048   ;;  %vm167_vm2 = vcmask (!%p87_p2), 64512  }
   0x6   : > { %90 = sbr.rel (%p87_p2) target bundleno = 1541 (0x605), region = 24  ;;  %423 = vmatprep.subr.bf16.mxu0 (!%p87_p2), %v480_v0  ;;  %425 = vmatprep.mubr.msk.bf16.mxu0 (!%p87_p2), %vm481_vm0, %v480_v0  ;;  %s483_s13 = smov (!%p87_p2), 64   ;;  %vm185_vm3 = vcmask (!%p87_p2), 1043456   ;;  %vm346_vm4 = vcmask (!%p87_p2), 257024  }
   0x7   : > { %429 = vmatprep.subr.bf16.mxu1 (!%p87_p2), %v480_v0  ;;  %431 = vmatprep.mubr.msk.bf16.mxu1 (!%p87_p2), %vm481_vm0, %v480_v0  ;;  %s484_s14 = smov (!%p87_p2), 80   ;;  %s485_s15 = smov (!%p87_p2), 112  }
   0x8   : > { %s486_s16 = smov (!%p87_p2), 48   ;;  %s487_s17 = smov (!%p87_p2), 16  }
   0xd   : > { %s549_s7 = smov (!%p104_p3, %s401_s7), 1 }
   0xe   : > { %s406_s8 = sshll.u32 %s549_s7, 2 }
   0xf   : > { %s107_s11 = scalar_lea.vmem %s546_s0, %s406_s8  ;;  %s111_s20 = scalar_lea.vmem %s547_s1, %s406_s8 }
  0x10   : > { %v113_v1 = vld [vmem:[%s107_s11] sm:$0xf] }
  0x11   : > { %v516_v2 = vcombine.low %v113_v1, %v113_v1 }
  0x13   : > { %117 = vrot.lane.b32.xlu0 %v516_v2, %s482_s12  ;;  %180 = vrot.lane.b32.xlu1 %v516_v2, %s483_s13 }
  0x85   : > { %v118_v3 = vpop.permute.xlu0 %117  ;;  %v181_v11 = vpop.permute.xlu1 %180 }
  0x86   : > { %v124_v4 = vsel %vm119_vm1, %v118_v3, 0  ;;  %v187_v12 = vsel %vm185_vm3, %v181_v11, 0 }
  0x87   : > { %424 = vmatpush3.bf16.xpose.msra.mxu0 %v124_v4  ;;  %430 = vmatpush3.bf16.msra.mxu1 %v187_v12 }
  0x88   : > { %441 = vmatprep.subr.bf16.mxu0 %v480_v0  ;;  %435 = vmatprep.subr.bf16.mxu1 %v480_v0 }
  0x8e   : > { %426 = vmatmul.mubr.msk.bf16.vlgmr.msra.gmra.mrb[0].mxu0 %vm119_vm1, %v113_v1 }
  0x8f   : > { %443 = vmatprep.mubr.msk.bf16.mxu0 %vm481_vm0, %v480_v0 }
 0x161   : > { %v160_v5 = vpop.f32.mrb[0].mxu0 }
 0x162   : > { %v166_v6 = vmul.f32 0.25, %v160_v5  ;;  %v427_v7 = vpop.f32.mrb[1].mxu0 }
 0x163   : > { %v163_v8 = vpop.f32.mrb[2].mxu0 }
 0x164   : > { %v428_v9 = vpop.f32.mrb[3].mxu0  ;;  %v168_v10 = vsel %vm167_vm2, %v166_v6, -inf }
 0x165   : > { %169 = vmax.xlane.f32.xlu0 %v168_v10 }
 0x1f2   : > { %v170_v13 = vpop.xlane.xlu0 %169 }
 0x1f3   : > { %v171_v14 = vsub.f32 %v166_v6, %v170_v13 }
 0x1f5   : > { %v172_v15 = vmul.f32 1.442695, %v171_v14 }
 0x1f7   : > { %464 = vpow2.f32 %v172_v15 }
 0x201   : > { %v465_v16 = vpop.eup %464 }
 0x202   : > { %v174_v17 = vsel %vm167_vm2, %v465_v16, 0.0 }
 0x203   : > { %175 = vadd.xlane.f32.xlu1 %v174_v17 }
 0x214   : > { %231 = vrot.lane.b32.xlu1 %v516_v2, %s484_s14 }
 0x218   : > { %229 = vrot.lane.b32.xlu1 %v516_v2, %s485_s15 }
 0x290   : > { %v176_v18 = vpop.xlane.xlu1 %175 }
 0x291   : > { %466 = vrcp.f32 %v176_v18 }
 0x294   : > { %v232_v20 = vpop.permute.xlu1 %231 }
 0x295   : > { %v237_v22 = vsel %vm119_vm1, %v232_v20, 0 }
 0x298   : > { %v230_v24 = vpop.permute.xlu1 %229 }
 0x29b   : > { %v467_v19 = vpop.eup %466 }
 0x29c   : > { %v178_v21 = vmul.f32 %v467_v19, %v465_v16 }
 0x29e   : > { %v179_v23 = vpack.c.bf16 %v178_v21, %v178_v21 }
 0x2a0   : > { %432 = vmatmul.mubr.msk.bf16.vlgmr.msra.gmra.mrb[0].mxu1 %vm167_vm2, %v179_v23 }
 0x2a1   : > { %436 = vmatpush3.bf16.xpose.msra.mxu1 %v237_v22  ;;  %437 = vmatprep.mubr.msk.bf16.mxu1 %vm481_vm0, %v480_v0 }
 0x2a8   : > { %438 = vmatmul.mubr.msk.bf16.vlgmr.msra.gmra.mrb[4].mxu1 %vm119_vm1, %v230_v24 }
 0x373   : > { %v223_v25 = vpop.f32.mrb[0].mxu1 }
 0x374   : > { %v433_v26 = vpop.f32.mrb[1].mxu1 }
 0x375   : > { %v226_v27 = vpop.f32.mrb[2].mxu1 }
 0x376   : > { %v434_v28 = vpop.f32.mrb[3].mxu1 }
 0x37b   : > { %v273_v29 = vpop.f32.mrb[4].mxu1 }
 0x37c   : > { %v279_v30 = vmul.f32 0.25, %v273_v29  ;;  %v439_v31 = vpop.f32.mrb[5].mxu1 }
 0x37d   : > { %v276_v32 = vpop.f32.mrb[6].mxu1 }
 0x37e   : > { %v440_v33 = vpop.f32.mrb[7].mxu1  ;;  %v280_v34 = vsel %vm167_vm2, %v279_v30, -inf }
 0x37f   : > { %281 = vmax.xlane.f32.xlu1 %v280_v34 }
 0x40c   : > { %v282_v35 = vpop.xlane.xlu1 %281 }
 0x40d   : > { %v283_v36 = vsub.f32 %v279_v30, %v282_v35 }
 0x40f   : > { %v284_v37 = vmul.f32 1.442695, %v283_v36 }
 0x411   : > { %468 = vpow2.f32 %v284_v37 }
 0x41b   : > { %v469_v38 = vpop.eup %468 }
 0x41c   : > { %v286_v39 = vsel %vm167_vm2, %v469_v38, 0.0 }
 0x41d   : > { %287 = vadd.xlane.f32.xlu0 %v286_v39 }
 0x433   : > { %292 = vrot.lane.b32.xlu0 %v516_v2, %s486_s16 }
 0x4aa   : > { %v288_v40 = vpop.xlane.xlu0 %287 }
 0x4ab   : > { %470 = vrcp.f32 %v288_v40 }
 0x4ae   : > { %v293_v41 = vpop.permute.xlu0 %292 }
 0x4af   : > { %v298_v42 = vsel %vm185_vm3, %v293_v41, 0 }
 0x4b0   : > { %442 = vmatpush3.bf16.msra.mxu0 %v298_v42 }
 0x4b5   : > { %v471_v43 = vpop.eup %470 }
 0x4b6   : > { %v290_v44 = vmul.f32 %v471_v43, %v469_v38 }
 0x4b8   : > { %v291_v45 = vpack.c.bf16 %v290_v44, %v290_v44 }
 0x4ba   : > { %444 = vmatmul.mubr.msk.bf16.vlgmr.msra.gmra.mrb[4].mxu0 %vm167_vm2, %v291_v45 }
 0x58d   : > { %v334_v46 = vpop.f32.mrb[4].mxu0 }
 0x58e   : > { %341 = vrot.lane.b32.xlu0 %v334_v46, %s487_s17  ;;  %v445_v47 = vpop.f32.mrb[5].mxu0 }
 0x58f   : > { %v337_v48 = vpop.f32.mrb[6].mxu0 }
 0x590   : > { %v446_v49 = vpop.f32.mrb[7].mxu0 }
 0x600   : > { %v342_v50 = vpop.permute.xlu0 %341 }
 0x601   : > { %v344_v51 = vsel %vm119_vm1, %v223_v25, %v342_v50 }
 0x602   : > { %v345_v52 = vpack.c.bf16 %v344_v51, %v344_v51 }
 0x604   : > { %347 = vst.msk [vmem:[%s111_s20] sm:$0xf] %vm346_vm4, %v345_v52 }
 0x605 PF: > { %s11_s6 = sadd.s32 1, %s478_s6  }
 0x606   : > { %p8_p4 = scmp.ge.s32.totalorder %s11_s6, 4  }
 0x608   :  { %10 = sbr.rel (!%p8_p4) target bundleno = 1 (0x1), region = 54 }

// kernel: _lambda_.41
= control target key start
LH: loop header
LB: loop body
LE: loop exit
PB: predicated region body
PF: predicated region fallthrough
CT: control target
= control target key end

     0   :  { %vm27_vm0 = vcmask 261120   ;;  %v210_v15 = vmov 0.0   ;;  %vm211_vm1 = vmmov 0   ;;  %vm170_vm2 = vcmask 519168   ;;  %s275_s0 = inlined_call_operand.vmem [shape: f32[16,32], index: 0, kind: input, shape index: {}]   ;;  %s276_s3 = inlined_call_operand.vmem [shape: bf16[32,64], index: 3, kind: input, shape index: {}]   ;;  %s277_s1 = inlined_call_operand.vmem [shape: f32[1,32], index: 1, kind: input, shape index: {}]   ;;  %s278_s2 = inlined_call_operand.vmem [shape: f32[1,32], index: 2, kind: input, shape index: {}]   ;;  %s279_s4 = inlined_call_operand.vmem [shape: f32[1,64], index: 4, kind: input, shape index: {}]   ;;  %s280_s5 = inlined_call_operand.vmem [shape: bf16[16,64], index: 5, kind: output, shape index: {}]  }
   0x1   :  { %v25_v0 = vld [vmem:[%s275_s0] sm:$0xff]  ;;  %v26_v1 = vld [vmem:[%s275_s0 + $0x8] sm:$0xff]  ;;  %190 = vmatprep.subr.bf16.mxu0 %v210_v15  ;;  %194 = vmatprep.mubr.msk.bf16.mxu0 %vm211_vm1, %v210_v15 }
   0x2   :  { %v28_v2 = vsel %vm27_vm0, %v25_v0, 0.0  ;;  %v31_v3 = vsel %vm27_vm0, %v26_v1, 0.0  ;;  %v200_v14 = vld [vmem:[%s276_s3] sm:$0xff]   ;;  %v201_v16 = vld [vmem:[%s276_s3 + $0x8] sm:$0xff]  }
   0x3   :  { %29 = vadd.xlane.f32.xlu0 %v28_v2  ;;  %191 = vmatpush3.bf16.msra.mxu0 %v200_v14  ;;  %v177_v25 = vld [vmem:[%s277_s1] ss:$0 sm:$0xff] }
   0x4   :  { %192 = vmatprep.subr.bf16.mxu0 %v210_v15  ;;  %v178_v29 = vld [vmem:[%s278_s2] ss:$0 sm:$0xff] }
   0x5   :  { %v179_v35 = vld [vmem:[%s279_s4] ss:$0 sm:$0xff] }
   0x7   :  { %32 = vadd.xlane.f32.xlu0 %v31_v3  ;;  %193 = vmatpush3.bf16.msra.mxu0 %v201_v16 }
  0x90   :  { %v30_v4 = vpop.xlane.xlu0 %29 }
  0x91   :  { %v35_v5 = vmul.f32 0.03125, %v30_v4 }
  0x93   :  { %v37_v6 = vsub.f32 %v25_v0, %v35_v5 }
  0x94   :  { %v33_v7 = vpop.xlane.xlu0 %32 }
  0x95   :  { %v36_v8 = vmul.f32 0.03125, %v33_v7  ;;  %v39_v9 = vmul.f32 %v37_v6, %v37_v6 }
  0x97   :  { %v38_v10 = vsub.f32 %v26_v1, %v36_v8  ;;  %v41_v11 = vsel %vm27_vm0, %v39_v9, 0.0 }
  0x98   :  { %42 = vadd.xlane.f32.xlu1 %v41_v11 }
  0x99   :  { %v40_v12 = vmul.f32 %v38_v10, %v38_v10 }
  0x9b   :  { %v44_v13 = vsel %vm27_vm0, %v40_v12, 0.0 }
  0x9c   :  { %45 = vadd.xlane.f32.xlu1 %v44_v13 }
 0x125   :  { %v43_v17 = vpop.xlane.xlu1 %42 }
 0x126   :  { %v47_v18 = vmul.f32 0.03125, %v43_v17 }
 0x128   :  { %v49_v19 = vadd.f32 1e-05, %v47_v18 }
 0x129   :  { %v46_v20 = vpop.xlane.xlu1 %45 }
 0x12a   :  { %202 = vrsqrt.f32 %v49_v19  ;;  %v48_v21 = vmul.f32 0.03125, %v46_v20 }
 0x12c   :  { %v50_v22 = vadd.f32 1e-05, %v48_v21 }
 0x12e   :  { %204 = vrsqrt.f32 %v50_v22 }
 0x134   :  { %v203_v23 = vpop.eup %202 }
 0x135   :  { %v53_v24 = vmul.f32 %v203_v23, %v37_v6 }
 0x137   :  { %v62_v27 = vmul.f32 %v177_v25, %v53_v24 }
 0x138   :  { %v205_v26 = vpop.eup %204 }
 0x139   :  { %v54_v28 = vmul.f32 %v205_v26, %v38_v10  ;;  %v71_v31 = vadd.f32 %v178_v29, %v62_v27 }
 0x13b   :  { %v63_v30 = vmul.f32 %v177_v25, %v54_v28 }
 0x13d   :  { %v72_v32 = vadd.f32 %v178_v29, %v63_v30 }
 0x13f   :  { %v73_v33 = vpack.c.bf16 %v72_v32, %v71_v31 }
 0x141   :  { %74 = vst.msk [vmem:[#allocation2] sm:$0xff] %vm27_vm0, %v73_v33 }
 0x148   :  { %v75_v34 = vld [vmem:[#allocation2] sm:$0xff] }
 0x149   :  { %195 = vmatmul.mubr.msk.bf16.vlgmr.msra.gmra.mrb[0].mxu0 %vm27_vm0, %v75_v34 }
 0x21c   :  { %v137_v36 = vpop.f32.mrb[0].mxu0 }
 0x21d   :  { %v138_v37 = vadd.f32 %v179_v35, %v137_v36  ;;  %v196_v38 = vpop.f32.mrb[1].mxu0 }
 0x21e   :  { %v140_v39 = vpop.f32.mrb[2].mxu0 }
 0x21f   :  { %v146_v40 = vmul.f32 0.044715, %v138_v37  ;;  %v141_v41 = vadd.f32 %v179_v35, %v140_v39  ;;  %v197_v42 = vpop.f32.mrb[3].mxu0  ;;  %v144_v53 = vmul.f32 0.5, %v138_v37 }
 0x221   :  { %v148_v43 = vmul.f32 %v146_v40, %v138_v37  ;;  %v147_v44 = vmul.f32 0.044715, %v141_v41  ;;  %v145_v57 = vmul.f32 0.5, %v141_v41 }
 0x223   :  { %v150_v45 = vmul.f32 %v148_v43, %v138_v37  ;;  %v149_v46 = vmul.f32 %v147_v44, %v141_v41 }
 0x225   :  { %v152_v47 = vadd.f32 %v150_v45, %v138_v37  ;;  %v151_v48 = vmul.f32 %v149_v46, %v141_v41 }
 0x227   :  { %v154_v49 = vmul.f32 0.7978846, %v152_v47  ;;  %v153_v50 = vadd.f32 %v151_v48, %v141_v41 }
 0x229   :  { %206 = vtanh.f32 %v154_v49  ;;  %v155_v51 = vmul.f32 0.7978846, %v153_v50 }
 0x22b   :  { %208 = vtanh.f32 %v155_v51 }
 0x233   :  { %v207_v52 = vpop.eup %206 }
 0x234   :  { %v158_v54 = vadd.f32 1.0, %v207_v52 }
 0x235   :  { %v209_v55 = vpop.eup %208 }
 0x236   :  { %v160_v56 = vmul.f32 %v158_v54, %v144_v53  ;;  %v159_v58 = vadd.f32 1.0, %v209_v55 }
 0x238   :  { %v185_v59 = vpack.c.bf16 %v160_v56, %v160_v56  ;;  %v161_v60 = vmul.f32 %v159_v58, %v145_v57 }
 0x23a   :  { %171 = vst.msk [vmem:[%s280_s5] sm:$0xf] %vm170_vm2, %v185_v59  ;;  %v186_v61 = vpack.c.bf16 %v161_v60, %v161_v60 }
 0x23c   :  { %172 = vst.msk [vmem:[%s280_s5 + $0x4] sm:$0xf] %vm170_vm2, %v186_v61 }

// kernel: _lambda_.42
= control target key start
LH: loop header
LB: loop body
LE: loop exit
PB: predicated region body
PF: predicated region fallthrough
CT: control target
= control target key end

     0   :  { %vm22_vm0 = vcmask 261120   ;;  %v171_v0 = vmov 0.0   ;;  %vm172_vm1 = vmmov 0   ;;  %vm66_vm2 = vcmask 523264   ;;  %s234_s1 = inlined_call_operand.vmem [shape: bf16[64,32], index: 1, kind: input, shape index: {}]   ;;  %s235_s0 = inlined_call_operand.vmem [shape: bf16[16,64], index: 0, kind: input, shape index: {}]   ;;  %s236_s2 = inlined_call_operand.vmem [shape: f32[1,32], index: 2, kind: input, shape index: {}]   ;;  %s237_s3 = inlined_call_operand.vmem [shape: f32[16,32], index: 3, kind: input, shape index: {}]   ;;  %s238_s4 = inlined_call_operand.vmem [shape: f32[16,32], index: 4, kind: output, shape index: {}]  }
   0x1   :  { %152 = vmatprep.subr.bf16.mxu0 %v171_v0  ;;  %v166_v1 = vld [vmem:[%s234_s1] sm:$0xff]   ;;  %160 = vmatprep.mubr.msk.bf16.mxu0 %vm172_vm1, %v171_v0  ;;  %23 = vst.msk [vmem:[#allocation2] sm:$0xff] %vm22_vm0, %v171_v0  ;;  %24 = vst.msk [vmem:[#allocation2 + $0x8] sm:$0xff] %vm22_vm0, %v171_v0  ;;  %v167_v2 = vld [vmem:[%s234_s1 + $0x8] sm:$0xff]  }
   0x2   :  { %153 = vmatpush3.bf16.msra.mxu0 %v166_v1  ;;  %v168_v3 = vld [vmem:[%s234_s1 + $0x10] sm:$0xff]   ;;  %v169_v4 = vld [vmem:[%s234_s1 + $0x18] sm:$0xff]   ;;  %v170_v5 = vld [vmem:[%s235_s0] sm:$0xff]  }
   0x3   :  { %154 = vmatprep.subr.bf16.mxu0 %v171_v0  ;;  %v146_v14 = vld [vmem:[%s236_s2] ss:$0 sm:$0xff]  ;;  %v131_v18 = vld [vmem:[%s237_s3 + $0x8] sm:$0xff] }
   0x4   :  { %v130_v16 = vld [vmem:[%s237_s3] sm:$0xff] }
   0x6   :  { %155 = vmatpush3.bf16.msra.mxu0 %v167_v2 }
   0x7   :  { %156 = vmatprep.subr.bf16.mxu0 %v171_v0 }
   0x8   :  { %v25_v6 = vld [vmem:[#allocation2] sm:$0xff]  ;;  %v26_v8 = vld [vmem:[#allocation2 + $0x8] sm:$0xff] }
   0xa   :  { %157 = vmatpush3.bf16.msra.mxu0 %v168_v3 }
   0xb   :  { %158 = vmatprep.subr.bf16.mxu0 %v171_v0 }
   0xe   :  { %159 = vmatpush3.bf16.msra.mxu0 %v169_v4 }
  0x11   :  { %161 = vmatmul.mubr.msk.bf16.vlgmr.msra.gmra.mrb[0].mxu0 %vm66_vm2, %v170_v5 }
  0xe4   :  { %v104_v7 = vpop.f32.mrb[0].mxu0 }
  0xe5   :  { %v111_v9 = vadd.f32 %v104_v7, %v25_v6  ;;  %v162_v10 = vpop.f32.mrb[1].mxu0 }
  0xe6   :  { %v107_v11 = vpop.f32.mrb[2].mxu0 }
  0xe7   :  { %114 = vst.msk [vmem:[#allocation2] sm:$0xff] %vm22_vm0, %v111_v9  ;;  %v112_v12 = vadd.f32 %v107_v11, %v26_v8  ;;  %v163_v13 = vpop.f32.mrb[3].mxu0 }
  0xe9   :  { %115 = vst.msk [vmem:[#allocation2 + $0x8] sm:$0xff] %vm22_vm0, %v112_v12 }
  0xee   :  { %v119_v15 = vld [vmem:[#allocation2] sm:$0xff] }
  0xef   :  { %v128_v17 = vadd.f32 %v146_v14, %v119_v15 }
  0xf0   :  { %v120_v19 = vld [vmem:[#allocation2 + $0x8] sm:$0xff] }
  0xf1   :  { %v132_v20 = vadd.f32 %v130_v16, %v128_v17  ;;  %v129_v21 = vadd.f32 %v146_v14, %v120_v19 }
  0xf3   :  { %134 = vst.msk [vmem:[%s238_s4] sm:$0xff] %vm22_vm0, %v132_v20  ;;  %v133_v22 = vadd.f32 %v131_v18, %v129_v21 }
  0xf5   :  { %135 = vst.msk [vmem:[%s238_s4 + $0x8] sm:$0xff] %vm22_vm0, %v133_v22 }

// kernel: _lambda_.48
= control target key start
LH: loop header
LB: loop body
LE: loop exit
PB: predicated region body
PF: predicated region fallthrough
CT: control target
= control target key end

     0   :  { %vm26_vm0 = vcmask 254976   ;;  %v157_v8 = vmov 0.0   ;;  %vm158_vm1 = vmmov 0   ;;  %vm58_vm2 = vcmask 253952   ;;  %s213_s0 = inlined_call_operand.vmem [shape: f32[2,32], index: 0, kind: input, shape index: {}]   ;;  %s214_s3 = inlined_call_operand.vmem [shape: bf16[32,32], index: 3, kind: input, shape index: {}]   ;;  %s215_s1 = inlined_call_operand.vmem [shape: f32[1,32], index: 1, kind: input, shape index: {}]   ;;  %s216_s2 = inlined_call_operand.vmem [shape: f32[1,32], index: 2, kind: input, shape index: {}, may-alias: {2,4}]   ;;  %s217_s4 = inlined_call_operand.vmem [shape: f32[1,32], index: 4, kind: input, shape index: {}, may-alias: {2,4}]   ;;  %s218_s5 = inlined_call_operand.vmem [shape: f32[2,32], index: 5, kind: output, shape index: {}]  }
   0x1   :  { %v25_v0 = vld [vmem:[%s213_s0] sm:$0x3]  ;;  %143 = vmatprep.subr.bf16.mxu0 %v157_v8  ;;  %v154_v9 = vld [vmem:[%s214_s3 + $0x8] sm:$0xff]   ;;  %147 = vmatprep.mubr.msk.bf16.mxu0 %vm158_vm1, %v157_v8  ;;  %vm84_vm3 = vcmask 261120  }
   0x2   :  { %v27_v1 = vsel %vm26_vm0, %v25_v0, 0.0  ;;  %v153_v7 = vld [vmem:[%s214_s3] sm:$0xff]  }
   0x3   :  { %28 = vadd.xlane.f32.xlu0 %v27_v1  ;;  %144 = vmatpush3.bf16.msra.mxu0 %v153_v7  ;;  %v134_v14 = vld [vmem:[%s215_s1] ss:$0 sm:$0xff] }
   0x4   :  { %145 = vmatprep.subr.bf16.mxu0 %v157_v8  ;;  %v135_v16 = vld [vmem:[%s216_s2] ss:$0 sm:$0xff] }
   0x5   :  { %v136_v21 = vld [vmem:[%s217_s4] ss:$0 sm:$0xff] }
   0x7   :  { %146 = vmatpush3.bf16.msra.mxu0 %v154_v9 }
  0x90   :  { %v29_v2 = vpop.xlane.xlu0 %28 }
  0x91   :  { %v31_v3 = vmul.f32 0.03125, %v29_v2 }
  0x93   :  { %v32_v4 = vsub.f32 %v25_v0, %v31_v3 }
  0x95   :  { %v33_v5 = vmul.f32 %v32_v4, %v32_v4 }
  0x97   :  { %v34_v6 = vsel %vm26_vm0, %v33_v5, 0.0 }
  0x98   :  { %35 = vadd.xlane.f32.xlu0 %v34_v6 }
 0x125   :  { %v36_v10 = vpop.xlane.xlu0 %35 }
 0x126   :  { %v37_v11 = vmul.f32 0.03125, %v36_v10 }
 0x128   :  { %v38_v12 = vadd.f32 1e-05, %v37_v11 }
 0x12a   :  { %155 = vrsqrt.f32 %v38_v12 }
 0x134   :  { %v156_v13 = vpop.eup %155 }
 0x135   :  { %v40_v15 = vmul.f32 %v156_v13, %v32_v4 }
 0x137   :  { %v48_v17 = vmul.f32 %v134_v14, %v40_v15 }
 0x139   :  { %v56_v18 = vadd.f32 %v135_v16, %v48_v17 }
 0x13b   :  { %v57_v19 = vpack.c.bf16 %v56_v18, %v56_v18 }
 0x13d   :  { %59 = vst.msk [vmem:[#allocation2] sm:$0x1] %vm58_vm2, %v57_v19 }
 0x144   :  { %v60_v20 = vld [vmem:[#allocation2] sm:$0x1] }
 0x145   :  { %148 = vmatmul.mubr.msk.bf16.vlgmr.msra.gmra.mrb[0].mxu0 %vm84_vm3, %v60_v20 }
 0x218   :  { %v122_v22 = vpop.f32.mrb[0].mxu0 }
 0x219   :  { %v123_v23 = vadd.f32 %v136_v21, %v122_v22  ;;  %v149_v24 = vpop.f32.mrb[1].mxu0 }
 0x21a   :  { %v125_v25 = vpop.f32.mrb[2].mxu0 }
 0x21b   :  { %129 = vst.msk [vmem:[%s218_s5] sm:$0x3] %vm26_vm0, %v123_v23  ;;  %v150_v26 = vpop.f32.mrb[3].mxu0 }

// kernel: _lambda_.51
= control target key start
LH: loop header
LB: loop body
LE: loop exit
PB: predicated region body
PF: predicated region fallthrough
CT: control target
= control target key end

     0   :  { %vm24_vm0 = vcmask 261120   ;;  %v126_v0 = vmov 0.0   ;;  %vm127_vm1 = vmmov 0   ;;  %vm103_vm2 = vcmask 9216   ;;  %s160_s1 = inlined_call_operand.vmem [shape: f32[2,32], index: 1, kind: input, shape index: {}]   ;;  %s161_s0 = inlined_call_operand.vmem [shape: f32[2,32], index: 0, kind: input, shape index: {}]   ;;  %s162_s2 = inlined_call_operand.<no memory space> [shape: f32[1,1], index: 2, kind: input, shape index: {}]   ;;  %s163_s3 = inlined_call_operand.vmem [shape: f32[2,2], index: 3, kind: output, shape index: {}]  }
   0x1   :  { %113 = vmatprep.subr.mxu0 %v126_v0  ;;  %v23_v1 = vld [vmem:[%s160_s1] sm:$0x3]  ;;  %115 = vmatprep.mubr.msk.f32.mxu0 %vm127_vm1, %v126_v0  ;;  %v8_v2 = vstv %s162_s2 }
   0x2   :  { %114 = vmatpush3.xpose.msk.msra.mxu0 %vm24_vm0, %v23_v1  ;;  %v22_v3 = vld [vmem:[%s161_s0] sm:$0x3]  ;;  %9 = vst [vmem:[#allocation2] sm:$0x1] %v8_v2 }
   0x5   :  { %116 = vmatmul.mubr.msk.f32.vlgmr.msra.gmra.mrb[0].mxu0 %vm24_vm0, %v22_v3 }
   0x9   :  { %v16_v4 = vld [vmem:[#allocation2] sm:$0x1] }
   0xa   :  { %118 = vpush %v16_v4 }
  0x3b   :  { %s119_s18 = spop %118 }
  0x3c   :  { %v18_v5 = vstv %s119_s18 }
  0x3d   :  { %v19_v6 = vmul.f32 1.442695, %v18_v5 }
  0x3f   :  { %124 = vpow2.f32 %v19_v6 }
  0x49   :  { %v125_v7 = vpop.eup %124 }
  0x4a   :  { %120 = vpush %v125_v7 }
  0x7b   :  { %s121_s1 = spop %120 }
  0x7c   :  { %v101_v8 = vstv %s121_s1 }
  0xd8   :  { %v97_v9 = vpop.f32.mrb[0].mxu0 }
  0xd9   :  { %v102_v10 = vmul.f32 %v101_v8, %v97_v9  ;;  %v117_v11 = vpop.f32.mrb[1].mxu0 }
  0xdb   :  { %104 = vst.msk [vmem:[%s163_s3] sm:$0x3] %vm103_vm2, %v102_v10 }

</bundles_post_ra>
